<compile_context>
chip_gen: v7x
topology: tpu7x:2x2x1
jax: 0.10.0
libtpu: 0.0.40
codegen_flags: <defaults>
</compile_context>

<pallas_src>
import math

import jax
import jax.numpy as jnp
from jax.experimental import pallas as pl
from jax.experimental.pallas import tpu as pltpu


# ------------------------------ kernel factory ------------------------------ #

def _make_kernel(meta, batch, s_src, s_tgt):
    d = meta["d"]
    n_enc = meta["n_enc"]
    n_dec = meta["n_dec"]
    v_pad = meta["v_pad"]
    wslots = meta["wslots"]          # name -> (slot index, true width)
    prows = meta["prows"]            # name -> (row index, true width)
    ns = s_src * batch               # flattened encoder rows (row = s*B + b)
    nt = s_tgt * batch               # flattened decoder rows

    def kernel(act_ref, w32_ref, genw_ref, pf_ref, out_ref):
        f32, bf16 = jnp.float32, jnp.bfloat16

        def w(name):                                # (d, width) bf16 weight
            idx, width = wslots[name]
            return w32_ref[idx][:, :width]

        def pv(name):                               # (1, width) f32 bias / LN param
            row, width = prows[name]
            return pf_ref[row:row + 1, :width]

        def mm(a, b):                               # a @ b   (bf16 MXU, f32 acc)
            return jax.lax.dot_general(
                a.astype(bf16), b.astype(bf16),
                (((1,), (0,)), ((), ())), preferred_element_type=f32)

        def mm_t(a, b):                             # a @ b.T without XLU transpose
            return jax.lax.dot_general(
                a.astype(bf16), b.astype(bf16),
                (((1,), (1,)), ((), ())), preferred_element_type=f32)

        def ln(y, gname, bname):                    # LayerNorm, eps=1e-5, f32 math
            mean = jnp.mean(y, axis=-1, keepdims=True)
            var = jnp.mean((y - mean) ** 2, axis=-1, keepdims=True)
            return (y - mean) * jax.lax.rsqrt(var + 1e-5) * pv(gname) + pv(bname)

        def softmax_rows(s, approx):
            s = s - jnp.max(s, axis=-1, keepdims=True)
            e = jnp.exp(s)
            return e * pl.reciprocal(jnp.sum(e, axis=-1, keepdims=True), approx=approx)

        def batch_mask(nq, nk):                     # True where query/key share a batch
            ri = jax.lax.broadcasted_iota(jnp.int32, (nq, nk), 0)
            ci = jax.lax.broadcasted_iota(jnp.int32, (nq, nk), 1)
            return (ri % batch) == (ci % batch)

        def attention(q, k, v, mask, wo_name, bo_name):
            s = mm_t(q, k)                          # 1/sqrt(d) folded into q-projection
            s = jnp.where(mask, s, -1e30)           # keep within-batch keys only
            p = softmax_rows(s, approx=True)
            return mm(mm(p, v), w(wo_name)) + pv(bo_name)

        # hoisted, computed once
        m_src = batch_mask(ns, ns)
        m_tgt = batch_mask(nt, nt)
        m_x = batch_mask(nt, ns)

        # -------------------------------- encoder --------------------------------
        x = act_ref[0:ns, :]                        # (S_src*B, D) f32 residual stream
        for l in range(n_enc):
            qkv = mm(x, w(f"e{l}_wqkv")) + pv(f"e{l}_bqkv")
            q, k, v = qkv[:, :d], qkv[:, d:2 * d], qkv[:, 2 * d:]
            x = ln(x + attention(q, k, v, m_src, f"e{l}_wo", f"e{l}_bo"),
                   f"e{l}_ln1g", f"e{l}_ln1b")
            h = jnp.maximum(mm(x, w(f"e{l}_w1")) + pv(f"e{l}_b1"), 0.0)
            x = ln(x + mm_t(h, w(f"e{l}_w2T")) + pv(f"e{l}_b2"),
                   f"e{l}_ln2g", f"e{l}_ln2b")
        memory_bf = ln(x, "enc_ng", "enc_nb").astype(bf16)   # cast once, reused n_dec x

        # -------------------------------- decoder --------------------------------
        y = act_ref[ns:ns + nt, :]                  # (S_tgt*B, D) f32
        for l in range(n_dec):
            qkv = mm(y, w(f"d{l}_swqkv")) + pv(f"d{l}_sbqkv")
            q, k, v = qkv[:, :d], qkv[:, d:2 * d], qkv[:, 2 * d:]
            y = ln(y + attention(q, k, v, m_tgt, f"d{l}_swo", f"d{l}_sbo"),
                   f"d{l}_ln1g", f"d{l}_ln1b")
            cq = mm(y, w(f"d{l}_cwq")) + pv(f"d{l}_cbq")
            ckv = mm(memory_bf, w(f"d{l}_cwkv")) + pv(f"d{l}_cbkv")
            y = ln(y + attention(cq, ckv[:, :d], ckv[:, d:], m_x,
                                 f"d{l}_cwo", f"d{l}_cbo"),
                   f"d{l}_ln2g", f"d{l}_ln2b")
            h = jnp.maximum(mm(y, w(f"d{l}_w1")) + pv(f"d{l}_b1"), 0.0)
            y = ln(y + mm_t(h, w(f"d{l}_w2T")) + pv(f"d{l}_b2"),
                   f"d{l}_ln3g", f"d{l}_ln3b")
        y = ln(y, "dec_ng", "dec_nb")               # (S_tgt*B, D)

        # ---------------- generator: flatten(S*D) @ W + bias + softmax ----------
        # logits[b, v] = gen_b[v] + sum_{s,dd} y[s*B+b, dd] * genw[s, dd, v]
        # (identical element ordering to PyTorch's transpose(0,1).contiguous().view()).
        logits = mm(y[0:batch, :], genw_ref[0]) + pv("gen_b")   # (B, v_pad)
        for s in range(1, s_tgt):
            logits = logits + mm(y[s * batch:(s + 1) * batch, :], genw_ref[s])
        # pad columns carry bias -1e9 -> exp underflows to 0, softmax over v_pad
        # equals softmax over the true vocab.  Exact reciprocal here.
        out_ref[...] = softmax_rows(logits, approx=False)       # one lane-dense store

    return kernel


# ------------------------------ parameter setup ------------------------------ #

def _linear(key, in_dim, out_dim, scale=0.1):
    kw, kb = jax.random.split(key)
    w = scale * jax.random.normal(kw, (in_dim, out_dim), jnp.float32)
    b = scale * jax.random.normal(kb, (1, out_dim), jnp.float32)
    return w, b


def init_transformer_params(key, src_vocab, tgt_vocab, tgt_seq, d=32, f=128,
                            n_enc=2, n_dec=2, v_pad=128):
    assert 3 * d <= 128 and f <= 128 and tgt_vocab <= v_pad
    sm = 1.0 / math.sqrt(d)          # attention scale, folded into q-projections
    keys = jax.random.split(key, 5)

    w_slots, w_bufs = {}, []         # bf16 weight slab: (n_w, d, 128)
    p_rows, p_bufs = {}, []          # f32 param slab:   (n_p, 128)

    def addw(name, arr):             # arr (d, width<=128) f32
        w_slots[name] = (len(w_bufs), arr.shape[1])
        w_bufs.append(jnp.pad(arr, ((0, 0), (0, 128 - arr.shape[1]))))

    def addp(name, vec):             # vec (1, width<=128) f32
        p_rows[name] = (len(p_bufs), vec.shape[1])
        p_bufs.append(jnp.pad(vec, ((0, 0), (0, 128 - vec.shape[1]))))

    ones_d = jnp.ones((1, d), jnp.float32)
    zeros_d = jnp.zeros((1, d), jnp.float32)

    # ---------------- encoder layers ----------------
    for l, lk in enumerate(jax.random.split(keys[2], n_enc)):
        k0, k1, k2, k3, k4, k5 = jax.random.split(lk, 6)
        wq, bq = _linear(k0, d, d); wk, bk = _linear(k1, d, d); wv, bv = _linear(k2, d, d)
        wo, bo = _linear(k3, d, d)
        w1, b1 = _linear(k4, d, f); w2, b2 = _linear(k5, f, d)
        addw(f"e{l}_wqkv", jnp.concatenate([wq * sm, wk, wv], axis=1))
        addp(f"e{l}_bqkv", jnp.concatenate([bq * sm, bk, bv], axis=1))
        addw(f"e{l}_wo", wo);    addp(f"e{l}_bo", bo)
        addw(f"e{l}_w1", w1);    addp(f"e{l}_b1", b1)
        addw(f"e{l}_w2T", w2.T); addp(f"e{l}_b2", b2)      # stored transposed (trans_b)
        addp(f"e{l}_ln1g", ones_d); addp(f"e{l}_ln1b", zeros_d)
        addp(f"e{l}_ln2g", ones_d); addp(f"e{l}_ln2b", zeros_d)
    addp("enc_ng", ones_d); addp("enc_nb", zeros_d)

    # ---------------- decoder layers ----------------
    for l, lk in enumerate(jax.random.split(keys[3], n_dec)):
        ks = jax.random.split(lk, 10)
        wq, bq = _linear(ks[0], d, d); wk, bk = _linear(ks[1], d, d); wv, bv = _linear(ks[2], d, d)
        wo, bo = _linear(ks[3], d, d)
        cwq, cbq = _linear(ks[4], d, d); cwk, cbk = _linear(ks[5], d, d); cwv, cbv = _linear(ks[6], d, d)
        cwo, cbo = _linear(ks[7], d, d)
        w1, b1 = _linear(ks[8], d, f); w2, b2 = _linear(ks[9], f, d)
        addw(f"d{l}_swqkv", jnp.concatenate([wq * sm, wk, wv], axis=1))
        addp(f"d{l}_sbqkv", jnp.concatenate([bq * sm, bk, bv], axis=1))
        addw(f"d{l}_swo", wo);        addp(f"d{l}_sbo", bo)
        addw(f"d{l}_cwq", cwq * sm);  addp(f"d{l}_cbq", cbq * sm)
        addw(f"d{l}_cwkv", jnp.concatenate([cwk, cwv], axis=1))
        addp(f"d{l}_cbkv", jnp.concatenate([cbk, cbv], axis=1))
        addw(f"d{l}_cwo", cwo);       addp(f"d{l}_cbo", cbo)
        addw(f"d{l}_w1", w1);         addp(f"d{l}_b1", b1)
        addw(f"d{l}_w2T", w2.T);      addp(f"d{l}_b2", b2)
        addp(f"d{l}_ln1g", ones_d); addp(f"d{l}_ln1b", zeros_d)
        addp(f"d{l}_ln2g", ones_d); addp(f"d{l}_ln2b", zeros_d)
        addp(f"d{l}_ln3g", ones_d); addp(f"d{l}_ln3b", zeros_d)
    addp("dec_ng", ones_d); addp("dec_nb", zeros_d)

    # ---------------- generator ----------------
    # PyTorch Linear(d*tgt_seq, V) weight.T; flattened feature index = s*d + dd.
    gw, gb = _linear(keys[4], d * tgt_seq, tgt_vocab)
    genw = jnp.pad(gw.reshape(tgt_seq, d, tgt_vocab),
                   ((0, 0), (0, 0), (0, v_pad - tgt_vocab))).astype(jnp.bfloat16)
    gb_pad = jnp.concatenate(
        [gb, jnp.full((1, v_pad - tgt_vocab), -1e9, jnp.float32)], axis=1)
    addp("gen_b", gb_pad)

    params = {
        "src_emb": 0.1 * jax.random.normal(keys[0], (src_vocab, d), jnp.float32),
        "tgt_emb": 0.1 * jax.random.normal(keys[1], (tgt_vocab, d), jnp.float32),
        "w32": jnp.stack(w_bufs).astype(jnp.bfloat16),    # (n_w, d, 128) bf16
        "genw": genw,                                     # (tgt_seq, d, v_pad) bf16
        "pf": jnp.concatenate(p_bufs, axis=0),            # (n_p, 128) f32
    }
    meta = {"wslots": w_slots, "prows": p_rows, "d": d, "f": f,
            "v": tgt_vocab, "v_pad": v_pad, "n_enc": n_enc, "n_dec": n_dec,
            "tgt_seq": tgt_seq}
    return params, meta


def sinusoidal_pe(max_len, d):
    pos = jnp.arange(max_len, dtype=jnp.float32)[:, None]
    div = jnp.exp(jnp.arange(0, d, 2, dtype=jnp.float32) * (-math.log(10000.0) / d))
    pe = jnp.zeros((max_len, d), jnp.float32)
    pe = pe.at[:, 0::2].set(jnp.sin(pos * div))
    pe = pe.at[:, 1::2].set(jnp.cos(pos * div))
    return pe


# ------------------------------ forward wrapper ------------------------------ #

def transformer_forward(params, meta, src_tok, tgt_tok):
    b, s_src = src_tok.shape
    s_tgt = tgt_tok.shape[1]
    d = meta["d"]

    # Embedding lookup + positional encoding (gather glue, outside the kernel).
    pe = sinusoidal_pe(max(s_src, s_tgt), d)
    src = params["src_emb"][src_tok] + pe[:s_src][None]       # (B, S_src, D) f32
    tgt = params["tgt_emb"][tgt_tok] + pe[:s_tgt][None]       # (B, S_tgt, D) f32
    # s-major flatten (row = s*B + b) == PyTorch's internal (S, B, D) layout;
    # both streams packed into one buffer -> one DMA.
    act = jnp.concatenate(
        [jnp.transpose(src, (1, 0, 2)).reshape(s_src * b, d),
         jnp.transpose(tgt, (1, 0, 2)).reshape(s_tgt * b, d)], axis=0)

    kernel = _make_kernel(meta, b, s_src, s_tgt)
    # Single fused kernel, no grid: 4 input DMAs, 1 lane-dense output store.
    out_pad = pl.pallas_call(
        kernel,
        out_shape=jax.ShapeDtypeStruct((b, meta["v_pad"]), jnp.float32),
        compiler_params=pltpu.CompilerParams(vmem_limit_bytes=32 * 1024 * 1024),
    )(act, params["w32"], params["genw"], params["pf"])
    return out_pad[:, :meta["v"]]


# ------------------------------------ main ----------------------------------- #

if __name__ == "__main__":
    SRC_VOCAB = 50
    TGT_VOCAB = 40
    B = 2
    S_SRC = 8
    S_TGT = 8          # == tgt_sequence_size
    D = 32             # word_emb_dim
    F = 128            # dim_feedforward

    key = jax.random.PRNGKey(0)
    kp, ks, kt = jax.random.split(key, 3)
    params, meta = init_transformer_params(kp, SRC_VOCAB, TGT_VOCAB, S_TGT, d=D, f=F)

    src_tok = jax.random.randint(ks, (B, S_SRC), 0, SRC_VOCAB, dtype=jnp.int32)
    tgt_tok = jax.random.randint(kt, (B, S_TGT), 0, TGT_VOCAB, dtype=jnp.int32)

    fwd = jax.jit(lambda prm, s, t: transformer_forward(prm, meta, s, t))
    out = jax.block_until_ready(fwd(params, src_tok, tgt_tok))

    assert out.shape == (B, TGT_VOCAB), out.shape
    # generator softmax rows sum to 1 (exact reciprocal; pad columns are exactly 0)
    assert jnp.allclose(jnp.sum(out, axis=-1), 1.0, atol=1e-4)
    print("KERNEL_OK")
</pallas_src>

<mosaic_0001>
module attributes {stable_mosaic.version = 11 : i64} {
  func.func @kernel(%arg0: memref<32x32xf32, #tpu.memory_space<vmem>>, %arg1: memref<22x32x128xbf16, #tpu.memory_space<vmem>>, %arg2: memref<8x32x128xbf16, #tpu.memory_space<vmem>>, %arg3: memref<47x128xf32, #tpu.memory_space<vmem>>, %arg4: memref<2x128xf32, #tpu.memory_space<vmem>>) attributes {dimension_semantics = [], scalar_prefetch = 0 : i64, scratch_operands = 0 : i64, tpu.core_type = #tpu.core_type<tc>} {
    %0 = tpu.iota {dimensions = array<i32: 0>} : vector<16x16xi32>
    %1 = tpu.iota {dimensions = array<i32: 1>} : vector<16x16xi32>
    %c2_i32 = arith.constant 2 : i32
    %c0_i32 = arith.constant 0 : i32
    %2 = arith.cmpi eq, %c2_i32, %c0_i32 : i32
    %c1_i32 = arith.constant 1 : i32
    %3 = arith.select %2, %c1_i32, %c2_i32 : i32
    %4 = vector.broadcast %3 : i32 to vector<16x16xi32>
    %5 = arith.remsi %0, %4 : vector<16x16xi32>
    %c0_i32_0 = arith.constant 0 : i32
    %6 = vector.broadcast %c0_i32_0 : i32 to vector<16x16xi32>
    %7 = arith.cmpi ne, %5, %6 : vector<16x16xi32>
    %c0_i32_1 = arith.constant 0 : i32
    %8 = vector.broadcast %c0_i32_1 : i32 to vector<16x16xi32>
    %9 = arith.cmpi slt, %5, %8 : vector<16x16xi32>
    %c0_i32_2 = arith.constant 0 : i32
    %10 = arith.cmpi slt, %3, %c0_i32_2 : i32
    %11 = vector.broadcast %10 : i1 to vector<16x16xi1>
    %12 = vector.broadcast %11 : vector<16x16xi1> to vector<16x16xi1>
    %13 = arith.xori %9, %12 : vector<16x16xi1>
    %14 = arith.andi %13, %7 : vector<16x16xi1>
    %15 = vector.broadcast %3 : i32 to vector<16x16xi32>
    %16 = arith.addi %5, %15 : vector<16x16xi32>
    %17 = arith.select %14, %16, %5 : vector<16x16xi1>, vector<16x16xi32>
    %c2_i32_3 = arith.constant 2 : i32
    %c0_i32_4 = arith.constant 0 : i32
    %18 = arith.cmpi eq, %c2_i32_3, %c0_i32_4 : i32
    %c1_i32_5 = arith.constant 1 : i32
    %19 = arith.select %18, %c1_i32_5, %c2_i32_3 : i32
    %20 = vector.broadcast %19 : i32 to vector<16x16xi32>
    %21 = arith.remsi %1, %20 : vector<16x16xi32>
    %c0_i32_6 = arith.constant 0 : i32
    %22 = vector.broadcast %c0_i32_6 : i32 to vector<16x16xi32>
    %23 = arith.cmpi ne, %21, %22 : vector<16x16xi32>
    %c0_i32_7 = arith.constant 0 : i32
    %24 = vector.broadcast %c0_i32_7 : i32 to vector<16x16xi32>
    %25 = arith.cmpi slt, %21, %24 : vector<16x16xi32>
    %c0_i32_8 = arith.constant 0 : i32
    %26 = arith.cmpi slt, %19, %c0_i32_8 : i32
    %27 = vector.broadcast %26 : i1 to vector<16x16xi1>
    %28 = vector.broadcast %27 : vector<16x16xi1> to vector<16x16xi1>
    %29 = arith.xori %25, %28 : vector<16x16xi1>
    %30 = arith.andi %29, %23 : vector<16x16xi1>
    %31 = vector.broadcast %19 : i32 to vector<16x16xi32>
    %32 = arith.addi %21, %31 : vector<16x16xi32>
    %33 = arith.select %30, %32, %21 : vector<16x16xi1>, vector<16x16xi32>
    %34 = arith.cmpi eq, %17, %33 : vector<16x16xi32>
    %35 = tpu.iota {dimensions = array<i32: 0>} : vector<16x16xi32>
    %36 = tpu.iota {dimensions = array<i32: 1>} : vector<16x16xi32>
    %c2_i32_9 = arith.constant 2 : i32
    %c0_i32_10 = arith.constant 0 : i32
    %37 = arith.cmpi eq, %c2_i32_9, %c0_i32_10 : i32
    %c1_i32_11 = arith.constant 1 : i32
    %38 = arith.select %37, %c1_i32_11, %c2_i32_9 : i32
    %39 = vector.broadcast %38 : i32 to vector<16x16xi32>
    %40 = arith.remsi %35, %39 : vector<16x16xi32>
    %c0_i32_12 = arith.constant 0 : i32
    %41 = vector.broadcast %c0_i32_12 : i32 to vector<16x16xi32>
    %42 = arith.cmpi ne, %40, %41 : vector<16x16xi32>
    %c0_i32_13 = arith.constant 0 : i32
    %43 = vector.broadcast %c0_i32_13 : i32 to vector<16x16xi32>
    %44 = arith.cmpi slt, %40, %43 : vector<16x16xi32>
    %c0_i32_14 = arith.constant 0 : i32
    %45 = arith.cmpi slt, %38, %c0_i32_14 : i32
    %46 = vector.broadcast %45 : i1 to vector<16x16xi1>
    %47 = vector.broadcast %46 : vector<16x16xi1> to vector<16x16xi1>
    %48 = arith.xori %44, %47 : vector<16x16xi1>
    %49 = arith.andi %48, %42 : vector<16x16xi1>
    %50 = vector.broadcast %38 : i32 to vector<16x16xi32>
    %51 = arith.addi %40, %50 : vector<16x16xi32>
    %52 = arith.select %49, %51, %40 : vector<16x16xi1>, vector<16x16xi32>
    %c2_i32_15 = arith.constant 2 : i32
    %c0_i32_16 = arith.constant 0 : i32
    %53 = arith.cmpi eq, %c2_i32_15, %c0_i32_16 : i32
    %c1_i32_17 = arith.constant 1 : i32
    %54 = arith.select %53, %c1_i32_17, %c2_i32_15 : i32
    %55 = vector.broadcast %54 : i32 to vector<16x16xi32>
    %56 = arith.remsi %36, %55 : vector<16x16xi32>
    %c0_i32_18 = arith.constant 0 : i32
    %57 = vector.broadcast %c0_i32_18 : i32 to vector<16x16xi32>
    %58 = arith.cmpi ne, %56, %57 : vector<16x16xi32>
    %c0_i32_19 = arith.constant 0 : i32
    %59 = vector.broadcast %c0_i32_19 : i32 to vector<16x16xi32>
    %60 = arith.cmpi slt, %56, %59 : vector<16x16xi32>
    %c0_i32_20 = arith.constant 0 : i32
    %61 = arith.cmpi slt, %54, %c0_i32_20 : i32
    %62 = vector.broadcast %61 : i1 to vector<16x16xi1>
    %63 = vector.broadcast %62 : vector<16x16xi1> to vector<16x16xi1>
    %64 = arith.xori %60, %63 : vector<16x16xi1>
    %65 = arith.andi %64, %58 : vector<16x16xi1>
    %66 = vector.broadcast %54 : i32 to vector<16x16xi32>
    %67 = arith.addi %56, %66 : vector<16x16xi32>
    %68 = arith.select %65, %67, %56 : vector<16x16xi1>, vector<16x16xi32>
    %69 = arith.cmpi eq, %52, %68 : vector<16x16xi32>
    %70 = tpu.iota {dimensions = array<i32: 0>} : vector<16x16xi32>
    %71 = tpu.iota {dimensions = array<i32: 1>} : vector<16x16xi32>
    %c2_i32_21 = arith.constant 2 : i32
    %c0_i32_22 = arith.constant 0 : i32
    %72 = arith.cmpi eq, %c2_i32_21, %c0_i32_22 : i32
    %c1_i32_23 = arith.constant 1 : i32
    %73 = arith.select %72, %c1_i32_23, %c2_i32_21 : i32
    %74 = vector.broadcast %73 : i32 to vector<16x16xi32>
    %75 = arith.remsi %70, %74 : vector<16x16xi32>
    %c0_i32_24 = arith.constant 0 : i32
    %76 = vector.broadcast %c0_i32_24 : i32 to vector<16x16xi32>
    %77 = arith.cmpi ne, %75, %76 : vector<16x16xi32>
    %c0_i32_25 = arith.constant 0 : i32
    %78 = vector.broadcast %c0_i32_25 : i32 to vector<16x16xi32>
    %79 = arith.cmpi slt, %75, %78 : vector<16x16xi32>
    %c0_i32_26 = arith.constant 0 : i32
    %80 = arith.cmpi slt, %73, %c0_i32_26 : i32
    %81 = vector.broadcast %80 : i1 to vector<16x16xi1>
    %82 = vector.broadcast %81 : vector<16x16xi1> to vector<16x16xi1>
    %83 = arith.xori %79, %82 : vector<16x16xi1>
    %84 = arith.andi %83, %77 : vector<16x16xi1>
    %85 = vector.broadcast %73 : i32 to vector<16x16xi32>
    %86 = arith.addi %75, %85 : vector<16x16xi32>
    %87 = arith.select %84, %86, %75 : vector<16x16xi1>, vector<16x16xi32>
    %c2_i32_27 = arith.constant 2 : i32
    %c0_i32_28 = arith.constant 0 : i32
    %88 = arith.cmpi eq, %c2_i32_27, %c0_i32_28 : i32
    %c1_i32_29 = arith.constant 1 : i32
    %89 = arith.select %88, %c1_i32_29, %c2_i32_27 : i32
    %90 = vector.broadcast %89 : i32 to vector<16x16xi32>
    %91 = arith.remsi %71, %90 : vector<16x16xi32>
    %c0_i32_30 = arith.constant 0 : i32
    %92 = vector.broadcast %c0_i32_30 : i32 to vector<16x16xi32>
    %93 = arith.cmpi ne, %91, %92 : vector<16x16xi32>
    %c0_i32_31 = arith.constant 0 : i32
    %94 = vector.broadcast %c0_i32_31 : i32 to vector<16x16xi32>
    %95 = arith.cmpi slt, %91, %94 : vector<16x16xi32>
    %c0_i32_32 = arith.constant 0 : i32
    %96 = arith.cmpi slt, %89, %c0_i32_32 : i32
    %97 = vector.broadcast %96 : i1 to vector<16x16xi1>
    %98 = vector.broadcast %97 : vector<16x16xi1> to vector<16x16xi1>
    %99 = arith.xori %95, %98 : vector<16x16xi1>
    %100 = arith.andi %99, %93 : vector<16x16xi1>
    %101 = vector.broadcast %89 : i32 to vector<16x16xi32>
    %102 = arith.addi %91, %101 : vector<16x16xi32>
    %103 = arith.select %100, %102, %91 : vector<16x16xi1>, vector<16x16xi32>
    %104 = arith.cmpi eq, %87, %103 : vector<16x16xi32>
    %c0 = arith.constant 0 : index
    %c0_33 = arith.constant 0 : index
    %105 = vector.load %arg0[%c0, %c0_33] : memref<32x32xf32, #tpu.memory_space<vmem>>, vector<16x32xf32>
    %c0_34 = arith.constant 0 : index
    %c0_35 = arith.constant 0 : index
    %c0_36 = arith.constant 0 : index
    %106 = vector.load %arg1[%c0_34, %c0_35, %c0_36] : memref<22x32x128xbf16, #tpu.memory_space<vmem>>, vector<1x32x128xbf16>
    %107 = vector.shape_cast %106 : vector<1x32x128xbf16> to vector<32x128xbf16>
    %108 = vector.extract_strided_slice %107 {offsets = [0, 0], sizes = [32, 96], strides = [1, 1]} : vector<32x128xbf16> to vector<32x96xbf16>
    %109 = arith.truncf %105 : vector<16x32xf32> to vector<16x32xbf16>
    %cst = arith.constant dense<0.000000e+00> : vector<16x96xf32>
    %110 = tpu.matmul %109, %108, %cst {dimension_numbers = #tpu.dot_dimension_numbers<[1], [0], [0], [1], [0, 0, 1, 1], [], []>} : vector<16x32xbf16>, vector<32x96xbf16>, vector<16x96xf32> -> vector<16x96xf32>
    %c0_37 = arith.constant 0 : index
    %c0_38 = arith.constant 0 : index
    %111 = vector.load %arg3[%c0_37, %c0_38] : memref<47x128xf32, #tpu.memory_space<vmem>>, vector<1x96xf32>
    %112 = vector.broadcast %111 : vector<1x96xf32> to vector<16x96xf32>
    %113 = arith.addf %110, %112 : vector<16x96xf32>
    %114 = vector.extract_strided_slice %113 {offsets = [0, 0], sizes = [16, 32], strides = [1, 1]} : vector<16x96xf32> to vector<16x32xf32>
    %115 = vector.extract_strided_slice %113 {offsets = [0, 32], sizes = [16, 32], strides = [1, 1]} : vector<16x96xf32> to vector<16x32xf32>
    %116 = vector.extract_strided_slice %113 {offsets = [0, 64], sizes = [16, 32], strides = [1, 1]} : vector<16x96xf32> to vector<16x32xf32>
    %117 = arith.truncf %114 : vector<16x32xf32> to vector<16x32xbf16>
    %118 = arith.truncf %115 : vector<16x32xf32> to vector<16x32xbf16>
    %cst_39 = arith.constant dense<0.000000e+00> : vector<16x16xf32>
    %119 = tpu.matmul %117, %118, %cst_39 {dimension_numbers = #tpu.dot_dimension_numbers<[1], [1], [0], [0], [0, 0, 1, 0], [], []>} : vector<16x32xbf16>, vector<16x32xbf16>, vector<16x16xf32> -> vector<16x16xf32>
    %cst_40 = arith.constant -1.000000e+30 : f32
    %120 = vector.broadcast %cst_40 : f32 to vector<16x16xf32>
    %121 = arith.select %34, %119, %120 : vector<16x16xi1>, vector<16x16xf32>
    %cst_41 = arith.constant dense<0xFF800000> : vector<16xf32>
    %122 = vector.multi_reduction <maximumf>, %121, %cst_41 [1] : vector<16x16xf32> to vector<16xf32>
    %123 = vector.shape_cast %122 : vector<16xf32> to vector<16x1xf32>
    %124 = vector.broadcast %123 : vector<16x1xf32> to vector<16x16xf32>
    %125 = arith.subf %121, %124 : vector<16x16xf32>
    %126 = math.exp %125 : vector<16x16xf32>
    %cst_42 = arith.constant dense<0.000000e+00> : vector<16xf32>
    %127 = vector.multi_reduction <add>, %126, %cst_42 [1] : vector<16x16xf32> to vector<16xf32>
    %128 = vector.shape_cast %127 : vector<16xf32> to vector<16x1xf32>
    %129 = tpu.reciprocal %128 {approx = true} : vector<16x1xf32> -> vector<16x1xf32>
    %130 = vector.broadcast %129 : vector<16x1xf32> to vector<16x16xf32>
    %131 = arith.mulf %126, %130 : vector<16x16xf32>
    %132 = arith.truncf %131 : vector<16x16xf32> to vector<16x16xbf16>
    %133 = arith.truncf %116 : vector<16x32xf32> to vector<16x32xbf16>
    %cst_43 = arith.constant dense<0.000000e+00> : vector<16x32xf32>
    %134 = tpu.matmul %132, %133, %cst_43 {dimension_numbers = #tpu.dot_dimension_numbers<[1], [0], [0], [1], [0, 0, 1, 1], [], []>} : vector<16x16xbf16>, vector<16x32xbf16>, vector<16x32xf32> -> vector<16x32xf32>
    %c1 = arith.constant 1 : index
    %c0_44 = arith.constant 0 : index
    %c0_45 = arith.constant 0 : index
    %135 = vector.load %arg1[%c1, %c0_44, %c0_45] : memref<22x32x128xbf16, #tpu.memory_space<vmem>>, vector<1x32x128xbf16>
    %136 = vector.shape_cast %135 : vector<1x32x128xbf16> to vector<32x128xbf16>
    %137 = vector.extract_strided_slice %136 {offsets = [0, 0], sizes = [32, 32], strides = [1, 1]} : vector<32x128xbf16> to vector<32x32xbf16>
    %138 = arith.truncf %134 : vector<16x32xf32> to vector<16x32xbf16>
    %cst_46 = arith.constant dense<0.000000e+00> : vector<16x32xf32>
    %139 = tpu.matmul %138, %137, %cst_46 {dimension_numbers = #tpu.dot_dimension_numbers<[1], [0], [0], [1], [0, 0, 1, 1], [], []>} : vector<16x32xbf16>, vector<32x32xbf16>, vector<16x32xf32> -> vector<16x32xf32>
    %c1_47 = arith.constant 1 : index
    %c0_48 = arith.constant 0 : index
    %140 = vector.load %arg3[%c1_47, %c0_48] : memref<47x128xf32, #tpu.memory_space<vmem>>, vector<1x32xf32>
    %141 = vector.broadcast %140 : vector<1x32xf32> to vector<16x32xf32>
    %142 = arith.addf %139, %141 : vector<16x32xf32>
    %143 = arith.addf %105, %142 : vector<16x32xf32>
    %cst_49 = arith.constant dense<0.000000e+00> : vector<16xf32>
    %144 = vector.multi_reduction <add>, %143, %cst_49 [1] : vector<16x32xf32> to vector<16xf32>
    %145 = vector.shape_cast %144 : vector<16xf32> to vector<16x1xf32>
    %cst_50 = arith.constant 3.200000e+01 : f32
    %146 = vector.broadcast %cst_50 : f32 to vector<16x1xf32>
    %147 = arith.divf %145, %146 : vector<16x1xf32>
    %148 = vector.broadcast %147 : vector<16x1xf32> to vector<16x32xf32>
    %149 = arith.subf %143, %148 : vector<16x32xf32>
    %150 = arith.mulf %149, %149 : vector<16x32xf32>
    %cst_51 = arith.constant dense<0.000000e+00> : vector<16xf32>
    %151 = vector.multi_reduction <add>, %150, %cst_51 [1] : vector<16x32xf32> to vector<16xf32>
    %152 = vector.shape_cast %151 : vector<16xf32> to vector<16x1xf32>
    %cst_52 = arith.constant 3.200000e+01 : f32
    %153 = vector.broadcast %cst_52 : f32 to vector<16x1xf32>
    %154 = arith.divf %152, %153 : vector<16x1xf32>
    %155 = vector.broadcast %147 : vector<16x1xf32> to vector<16x32xf32>
    %156 = arith.subf %143, %155 : vector<16x32xf32>
    %cst_53 = arith.constant 9.99999974E-6 : f32
    %157 = vector.broadcast %cst_53 : f32 to vector<16x1xf32>
    %158 = arith.addf %154, %157 : vector<16x1xf32>
    %159 = math.rsqrt %158 : vector<16x1xf32>
    %160 = vector.broadcast %159 : vector<16x1xf32> to vector<16x32xf32>
    %161 = arith.mulf %156, %160 : vector<16x32xf32>
    %c4 = arith.constant 4 : index
    %c0_54 = arith.constant 0 : index
    %162 = vector.load %arg3[%c4, %c0_54] : memref<47x128xf32, #tpu.memory_space<vmem>>, vector<1x32xf32>
    %163 = vector.broadcast %162 : vector<1x32xf32> to vector<16x32xf32>
    %164 = arith.mulf %161, %163 : vector<16x32xf32>
    %c5 = arith.constant 5 : index
    %c0_55 = arith.constant 0 : index
    %165 = vector.load %arg3[%c5, %c0_55] : memref<47x128xf32, #tpu.memory_space<vmem>>, vector<1x32xf32>
    %166 = vector.broadcast %165 : vector<1x32xf32> to vector<16x32xf32>
    %167 = arith.addf %164, %166 : vector<16x32xf32>
    %c2 = arith.constant 2 : index
    %c0_56 = arith.constant 0 : index
    %c0_57 = arith.constant 0 : index
    %168 = vector.load %arg1[%c2, %c0_56, %c0_57] : memref<22x32x128xbf16, #tpu.memory_space<vmem>>, vector<1x32x128xbf16>
    %169 = vector.shape_cast %168 : vector<1x32x128xbf16> to vector<32x128xbf16>
    %170 = arith.truncf %167 : vector<16x32xf32> to vector<16x32xbf16>
    %cst_58 = arith.constant dense<0.000000e+00> : vector<16x128xf32>
    %171 = tpu.matmul %170, %169, %cst_58 {dimension_numbers = #tpu.dot_dimension_numbers<[1], [0], [0], [1], [0, 0, 1, 1], [], []>} : vector<16x32xbf16>, vector<32x128xbf16>, vector<16x128xf32> -> vector<16x128xf32>
    %c2_59 = arith.constant 2 : index
    %c0_60 = arith.constant 0 : index
    %172 = vector.load %arg3[%c2_59, %c0_60] : memref<47x128xf32, #tpu.memory_space<vmem>>, vector<1x128xf32>
    %173 = vector.broadcast %172 : vector<1x128xf32> to vector<16x128xf32>
    %174 = arith.addf %171, %173 : vector<16x128xf32>
    %cst_61 = arith.constant 0.000000e+00 : f32
    %175 = vector.broadcast %cst_61 : f32 to vector<16x128xf32>
    %176 = arith.maximumf %174, %175 : vector<16x128xf32>
    %c3 = arith.constant 3 : index
    %c0_62 = arith.constant 0 : index
    %c0_63 = arith.constant 0 : index
    %177 = vector.load %arg1[%c3, %c0_62, %c0_63] : memref<22x32x128xbf16, #tpu.memory_space<vmem>>, vector<1x32x128xbf16>
    %178 = vector.shape_cast %177 : vector<1x32x128xbf16> to vector<32x128xbf16>
    %179 = arith.truncf %176 : vector<16x128xf32> to vector<16x128xbf16>
    %cst_64 = arith.constant dense<0.000000e+00> : vector<16x32xf32>
    %180 = tpu.matmul %179, %178, %cst_64 {dimension_numbers = #tpu.dot_dimension_numbers<[1], [1], [0], [0], [0, 0, 1, 0], [], []>} : vector<16x128xbf16>, vector<32x128xbf16>, vector<16x32xf32> -> vector<16x32xf32>
    %181 = arith.addf %167, %180 : vector<16x32xf32>
    %c3_65 = arith.constant 3 : index
    %c0_66 = arith.constant 0 : index
    %182 = vector.load %arg3[%c3_65, %c0_66] : memref<47x128xf32, #tpu.memory_space<vmem>>, vector<1x32xf32>
    %183 = vector.broadcast %182 : vector<1x32xf32> to vector<16x32xf32>
    %184 = arith.addf %181, %183 : vector<16x32xf32>
    %cst_67 = arith.constant dense<0.000000e+00> : vector<16xf32>
    %185 = vector.multi_reduction <add>, %184, %cst_67 [1] : vector<16x32xf32> to vector<16xf32>
    %186 = vector.shape_cast %185 : vector<16xf32> to vector<16x1xf32>
    %cst_68 = arith.constant 3.200000e+01 : f32
    %187 = vector.broadcast %cst_68 : f32 to vector<16x1xf32>
    %188 = arith.divf %186, %187 : vector<16x1xf32>
    %189 = vector.broadcast %188 : vector<16x1xf32> to vector<16x32xf32>
    %190 = arith.subf %184, %189 : vector<16x32xf32>
    %191 = arith.mulf %190, %190 : vector<16x32xf32>
    %cst_69 = arith.constant dense<0.000000e+00> : vector<16xf32>
    %192 = vector.multi_reduction <add>, %191, %cst_69 [1] : vector<16x32xf32> to vector<16xf32>
    %193 = vector.shape_cast %192 : vector<16xf32> to vector<16x1xf32>
    %cst_70 = arith.constant 3.200000e+01 : f32
    %194 = vector.broadcast %cst_70 : f32 to vector<16x1xf32>
    %195 = arith.divf %193, %194 : vector<16x1xf32>
    %196 = vector.broadcast %188 : vector<16x1xf32> to vector<16x32xf32>
    %197 = arith.subf %184, %196 : vector<16x32xf32>
    %cst_71 = arith.constant 9.99999974E-6 : f32
    %198 = vector.broadcast %cst_71 : f32 to vector<16x1xf32>
    %199 = arith.addf %195, %198 : vector<16x1xf32>
    %200 = math.rsqrt %199 : vector<16x1xf32>
    %201 = vector.broadcast %200 : vector<16x1xf32> to vector<16x32xf32>
    %202 = arith.mulf %197, %201 : vector<16x32xf32>
    %c6 = arith.constant 6 : index
    %c0_72 = arith.constant 0 : index
    %203 = vector.load %arg3[%c6, %c0_72] : memref<47x128xf32, #tpu.memory_space<vmem>>, vector<1x32xf32>
    %204 = vector.broadcast %203 : vector<1x32xf32> to vector<16x32xf32>
    %205 = arith.mulf %202, %204 : vector<16x32xf32>
    %c7 = arith.constant 7 : index
    %c0_73 = arith.constant 0 : index
    %206 = vector.load %arg3[%c7, %c0_73] : memref<47x128xf32, #tpu.memory_space<vmem>>, vector<1x32xf32>
    %207 = vector.broadcast %206 : vector<1x32xf32> to vector<16x32xf32>
    %208 = arith.addf %205, %207 : vector<16x32xf32>
    %c4_74 = arith.constant 4 : index
    %c0_75 = arith.constant 0 : index
    %c0_76 = arith.constant 0 : index
    %209 = vector.load %arg1[%c4_74, %c0_75, %c0_76] : memref<22x32x128xbf16, #tpu.memory_space<vmem>>, vector<1x32x128xbf16>
    %210 = vector.shape_cast %209 : vector<1x32x128xbf16> to vector<32x128xbf16>
    %211 = vector.extract_strided_slice %210 {offsets = [0, 0], sizes = [32, 96], strides = [1, 1]} : vector<32x128xbf16> to vector<32x96xbf16>
    %212 = arith.truncf %208 : vector<16x32xf32> to vector<16x32xbf16>
    %cst_77 = arith.constant dense<0.000000e+00> : vector<16x96xf32>
    %213 = tpu.matmul %212, %211, %cst_77 {dimension_numbers = #tpu.dot_dimension_numbers<[1], [0], [0], [1], [0, 0, 1, 1], [], []>} : vector<16x32xbf16>, vector<32x96xbf16>, vector<16x96xf32> -> vector<16x96xf32>
    %c8 = arith.constant 8 : index
    %c0_78 = arith.constant 0 : index
    %214 = vector.load %arg3[%c8, %c0_78] : memref<47x128xf32, #tpu.memory_space<vmem>>, vector<1x96xf32>
    %215 = vector.broadcast %214 : vector<1x96xf32> to vector<16x96xf32>
    %216 = arith.addf %213, %215 : vector<16x96xf32>
    %217 = vector.extract_strided_slice %216 {offsets = [0, 0], sizes = [16, 32], strides = [1, 1]} : vector<16x96xf32> to vector<16x32xf32>
    %218 = vector.extract_strided_slice %216 {offsets = [0, 32], sizes = [16, 32], strides = [1, 1]} : vector<16x96xf32> to vector<16x32xf32>
    %219 = vector.extract_strided_slice %216 {offsets = [0, 64], sizes = [16, 32], strides = [1, 1]} : vector<16x96xf32> to vector<16x32xf32>
    %220 = arith.truncf %217 : vector<16x32xf32> to vector<16x32xbf16>
    %221 = arith.truncf %218 : vector<16x32xf32> to vector<16x32xbf16>
    %cst_79 = arith.constant dense<0.000000e+00> : vector<16x16xf32>
    %222 = tpu.matmul %220, %221, %cst_79 {dimension_numbers = #tpu.dot_dimension_numbers<[1], [1], [0], [0], [0, 0, 1, 0], [], []>} : vector<16x32xbf16>, vector<16x32xbf16>, vector<16x16xf32> -> vector<16x16xf32>
    %cst_80 = arith.constant -1.000000e+30 : f32
    %223 = vector.broadcast %cst_80 : f32 to vector<16x16xf32>
    %224 = arith.select %34, %222, %223 : vector<16x16xi1>, vector<16x16xf32>
    %cst_81 = arith.constant dense<0xFF800000> : vector<16xf32>
    %225 = vector.multi_reduction <maximumf>, %224, %cst_81 [1] : vector<16x16xf32> to vector<16xf32>
    %226 = vector.shape_cast %225 : vector<16xf32> to vector<16x1xf32>
    %227 = vector.broadcast %226 : vector<16x1xf32> to vector<16x16xf32>
    %228 = arith.subf %224, %227 : vector<16x16xf32>
    %229 = math.exp %228 : vector<16x16xf32>
    %cst_82 = arith.constant dense<0.000000e+00> : vector<16xf32>
    %230 = vector.multi_reduction <add>, %229, %cst_82 [1] : vector<16x16xf32> to vector<16xf32>
    %231 = vector.shape_cast %230 : vector<16xf32> to vector<16x1xf32>
    %232 = tpu.reciprocal %231 {approx = true} : vector<16x1xf32> -> vector<16x1xf32>
    %233 = vector.broadcast %232 : vector<16x1xf32> to vector<16x16xf32>
    %234 = arith.mulf %229, %233 : vector<16x16xf32>
    %235 = arith.truncf %234 : vector<16x16xf32> to vector<16x16xbf16>
    %236 = arith.truncf %219 : vector<16x32xf32> to vector<16x32xbf16>
    %cst_83 = arith.constant dense<0.000000e+00> : vector<16x32xf32>
    %237 = tpu.matmul %235, %236, %cst_83 {dimension_numbers = #tpu.dot_dimension_numbers<[1], [0], [0], [1], [0, 0, 1, 1], [], []>} : vector<16x16xbf16>, vector<16x32xbf16>, vector<16x32xf32> -> vector<16x32xf32>
    %c5_84 = arith.constant 5 : index
    %c0_85 = arith.constant 0 : index
    %c0_86 = arith.constant 0 : index
    %238 = vector.load %arg1[%c5_84, %c0_85, %c0_86] : memref<22x32x128xbf16, #tpu.memory_space<vmem>>, vector<1x32x128xbf16>
    %239 = vector.shape_cast %238 : vector<1x32x128xbf16> to vector<32x128xbf16>
    %240 = vector.extract_strided_slice %239 {offsets = [0, 0], sizes = [32, 32], strides = [1, 1]} : vector<32x128xbf16> to vector<32x32xbf16>
    %241 = arith.truncf %237 : vector<16x32xf32> to vector<16x32xbf16>
    %cst_87 = arith.constant dense<0.000000e+00> : vector<16x32xf32>
    %242 = tpu.matmul %241, %240, %cst_87 {dimension_numbers = #tpu.dot_dimension_numbers<[1], [0], [0], [1], [0, 0, 1, 1], [], []>} : vector<16x32xbf16>, vector<32x32xbf16>, vector<16x32xf32> -> vector<16x32xf32>
    %c9 = arith.constant 9 : index
    %c0_88 = arith.constant 0 : index
    %243 = vector.load %arg3[%c9, %c0_88] : memref<47x128xf32, #tpu.memory_space<vmem>>, vector<1x32xf32>
    %244 = vector.broadcast %243 : vector<1x32xf32> to vector<16x32xf32>
    %245 = arith.addf %242, %244 : vector<16x32xf32>
    %246 = arith.addf %208, %245 : vector<16x32xf32>
    %cst_89 = arith.constant dense<0.000000e+00> : vector<16xf32>
    %247 = vector.multi_reduction <add>, %246, %cst_89 [1] : vector<16x32xf32> to vector<16xf32>
    %248 = vector.shape_cast %247 : vector<16xf32> to vector<16x1xf32>
    %cst_90 = arith.constant 3.200000e+01 : f32
    %249 = vector.broadcast %cst_90 : f32 to vector<16x1xf32>
    %250 = arith.divf %248, %249 : vector<16x1xf32>
    %251 = vector.broadcast %250 : vector<16x1xf32> to vector<16x32xf32>
    %252 = arith.subf %246, %251 : vector<16x32xf32>
    %253 = arith.mulf %252, %252 : vector<16x32xf32>
    %cst_91 = arith.constant dense<0.000000e+00> : vector<16xf32>
    %254 = vector.multi_reduction <add>, %253, %cst_91 [1] : vector<16x32xf32> to vector<16xf32>
    %255 = vector.shape_cast %254 : vector<16xf32> to vector<16x1xf32>
    %cst_92 = arith.constant 3.200000e+01 : f32
    %256 = vector.broadcast %cst_92 : f32 to vector<16x1xf32>
    %257 = arith.divf %255, %256 : vector<16x1xf32>
    %258 = vector.broadcast %250 : vector<16x1xf32> to vector<16x32xf32>
    %259 = arith.subf %246, %258 : vector<16x32xf32>
    %cst_93 = arith.constant 9.99999974E-6 : f32
    %260 = vector.broadcast %cst_93 : f32 to vector<16x1xf32>
    %261 = arith.addf %257, %260 : vector<16x1xf32>
    %262 = math.rsqrt %261 : vector<16x1xf32>
    %263 = vector.broadcast %262 : vector<16x1xf32> to vector<16x32xf32>
    %264 = arith.mulf %259, %263 : vector<16x32xf32>
    %c12 = arith.constant 12 : index
    %c0_94 = arith.constant 0 : index
    %265 = vector.load %arg3[%c12, %c0_94] : memref<47x128xf32, #tpu.memory_space<vmem>>, vector<1x32xf32>
    %266 = vector.broadcast %265 : vector<1x32xf32> to vector<16x32xf32>
    %267 = arith.mulf %264, %266 : vector<16x32xf32>
    %c13 = arith.constant 13 : index
    %c0_95 = arith.constant 0 : index
    %268 = vector.load %arg3[%c13, %c0_95] : memref<47x128xf32, #tpu.memory_space<vmem>>, vector<1x32xf32>
    %269 = vector.broadcast %268 : vector<1x32xf32> to vector<16x32xf32>
    %270 = arith.addf %267, %269 : vector<16x32xf32>
    %c6_96 = arith.constant 6 : index
    %c0_97 = arith.constant 0 : index
    %c0_98 = arith.constant 0 : index
    %271 = vector.load %arg1[%c6_96, %c0_97, %c0_98] : memref<22x32x128xbf16, #tpu.memory_space<vmem>>, vector<1x32x128xbf16>
    %272 = vector.shape_cast %271 : vector<1x32x128xbf16> to vector<32x128xbf16>
    %273 = arith.truncf %270 : vector<16x32xf32> to vector<16x32xbf16>
    %cst_99 = arith.constant dense<0.000000e+00> : vector<16x128xf32>
    %274 = tpu.matmul %273, %272, %cst_99 {dimension_numbers = #tpu.dot_dimension_numbers<[1], [0], [0], [1], [0, 0, 1, 1], [], []>} : vector<16x32xbf16>, vector<32x128xbf16>, vector<16x128xf32> -> vector<16x128xf32>
    %c10 = arith.constant 10 : index
    %c0_100 = arith.constant 0 : index
    %275 = vector.load %arg3[%c10, %c0_100] : memref<47x128xf32, #tpu.memory_space<vmem>>, vector<1x128xf32>
    %276 = vector.broadcast %275 : vector<1x128xf32> to vector<16x128xf32>
    %277 = arith.addf %274, %276 : vector<16x128xf32>
    %cst_101 = arith.constant 0.000000e+00 : f32
    %278 = vector.broadcast %cst_101 : f32 to vector<16x128xf32>
    %279 = arith.maximumf %277, %278 : vector<16x128xf32>
    %c7_102 = arith.constant 7 : index
    %c0_103 = arith.constant 0 : index
    %c0_104 = arith.constant 0 : index
    %280 = vector.load %arg1[%c7_102, %c0_103, %c0_104] : memref<22x32x128xbf16, #tpu.memory_space<vmem>>, vector<1x32x128xbf16>
    %281 = vector.shape_cast %280 : vector<1x32x128xbf16> to vector<32x128xbf16>
    %282 = arith.truncf %279 : vector<16x128xf32> to vector<16x128xbf16>
    %cst_105 = arith.constant dense<0.000000e+00> : vector<16x32xf32>
    %283 = tpu.matmul %282, %281, %cst_105 {dimension_numbers = #tpu.dot_dimension_numbers<[1], [1], [0], [0], [0, 0, 1, 0], [], []>} : vector<16x128xbf16>, vector<32x128xbf16>, vector<16x32xf32> -> vector<16x32xf32>
    %284 = arith.addf %270, %283 : vector<16x32xf32>
    %c11 = arith.constant 11 : index
    %c0_106 = arith.constant 0 : index
    %285 = vector.load %arg3[%c11, %c0_106] : memref<47x128xf32, #tpu.memory_space<vmem>>, vector<1x32xf32>
    %286 = vector.broadcast %285 : vector<1x32xf32> to vector<16x32xf32>
    %287 = arith.addf %284, %286 : vector<16x32xf32>
    %cst_107 = arith.constant dense<0.000000e+00> : vector<16xf32>
    %288 = vector.multi_reduction <add>, %287, %cst_107 [1] : vector<16x32xf32> to vector<16xf32>
    %289 = vector.shape_cast %288 : vector<16xf32> to vector<16x1xf32>
    %cst_108 = arith.constant 3.200000e+01 : f32
    %290 = vector.broadcast %cst_108 : f32 to vector<16x1xf32>
    %291 = arith.divf %289, %290 : vector<16x1xf32>
    %292 = vector.broadcast %291 : vector<16x1xf32> to vector<16x32xf32>
    %293 = arith.subf %287, %292 : vector<16x32xf32>
    %294 = arith.mulf %293, %293 : vector<16x32xf32>
    %cst_109 = arith.constant dense<0.000000e+00> : vector<16xf32>
    %295 = vector.multi_reduction <add>, %294, %cst_109 [1] : vector<16x32xf32> to vector<16xf32>
    %296 = vector.shape_cast %295 : vector<16xf32> to vector<16x1xf32>
    %cst_110 = arith.constant 3.200000e+01 : f32
    %297 = vector.broadcast %cst_110 : f32 to vector<16x1xf32>
    %298 = arith.divf %296, %297 : vector<16x1xf32>
    %299 = vector.broadcast %291 : vector<16x1xf32> to vector<16x32xf32>
    %300 = arith.subf %287, %299 : vector<16x32xf32>
    %cst_111 = arith.constant 9.99999974E-6 : f32
    %301 = vector.broadcast %cst_111 : f32 to vector<16x1xf32>
    %302 = arith.addf %298, %301 : vector<16x1xf32>
    %303 = math.rsqrt %302 : vector<16x1xf32>
    %304 = vector.broadcast %303 : vector<16x1xf32> to vector<16x32xf32>
    %305 = arith.mulf %300, %304 : vector<16x32xf32>
    %c14 = arith.constant 14 : index
    %c0_112 = arith.constant 0 : index
    %306 = vector.load %arg3[%c14, %c0_112] : memref<47x128xf32, #tpu.memory_space<vmem>>, vector<1x32xf32>
    %307 = vector.broadcast %306 : vector<1x32xf32> to vector<16x32xf32>
    %308 = arith.mulf %305, %307 : vector<16x32xf32>
    %c15 = arith.constant 15 : index
    %c0_113 = arith.constant 0 : index
    %309 = vector.load %arg3[%c15, %c0_113] : memref<47x128xf32, #tpu.memory_space<vmem>>, vector<1x32xf32>
    %310 = vector.broadcast %309 : vector<1x32xf32> to vector<16x32xf32>
    %311 = arith.addf %308, %310 : vector<16x32xf32>
    %cst_114 = arith.constant dense<0.000000e+00> : vector<16xf32>
    %312 = vector.multi_reduction <add>, %311, %cst_114 [1] : vector<16x32xf32> to vector<16xf32>
    %313 = vector.shape_cast %312 : vector<16xf32> to vector<16x1xf32>
    %cst_115 = arith.constant 3.200000e+01 : f32
    %314 = vector.broadcast %cst_115 : f32 to vector<16x1xf32>
    %315 = arith.divf %313, %314 : vector<16x1xf32>
    %316 = vector.broadcast %315 : vector<16x1xf32> to vector<16x32xf32>
    %317 = arith.subf %311, %316 : vector<16x32xf32>
    %318 = arith.mulf %317, %317 : vector<16x32xf32>
    %cst_116 = arith.constant dense<0.000000e+00> : vector<16xf32>
    %319 = vector.multi_reduction <add>, %318, %cst_116 [1] : vector<16x32xf32> to vector<16xf32>
    %320 = vector.shape_cast %319 : vector<16xf32> to vector<16x1xf32>
    %cst_117 = arith.constant 3.200000e+01 : f32
    %321 = vector.broadcast %cst_117 : f32 to vector<16x1xf32>
    %322 = arith.divf %320, %321 : vector<16x1xf32>
    %323 = vector.broadcast %315 : vector<16x1xf32> to vector<16x32xf32>
    %324 = arith.subf %311, %323 : vector<16x32xf32>
    %cst_118 = arith.constant 9.99999974E-6 : f32
    %325 = vector.broadcast %cst_118 : f32 to vector<16x1xf32>
    %326 = arith.addf %322, %325 : vector<16x1xf32>
    %327 = math.rsqrt %326 : vector<16x1xf32>
    %328 = vector.broadcast %327 : vector<16x1xf32> to vector<16x32xf32>
    %329 = arith.mulf %324, %328 : vector<16x32xf32>
    %c16 = arith.constant 16 : index
    %c0_119 = arith.constant 0 : index
    %330 = vector.load %arg3[%c16, %c0_119] : memref<47x128xf32, #tpu.memory_space<vmem>>, vector<1x32xf32>
    %331 = vector.broadcast %330 : vector<1x32xf32> to vector<16x32xf32>
    %332 = arith.mulf %329, %331 : vector<16x32xf32>
    %c17 = arith.constant 17 : index
    %c0_120 = arith.constant 0 : index
    %333 = vector.load %arg3[%c17, %c0_120] : memref<47x128xf32, #tpu.memory_space<vmem>>, vector<1x32xf32>
    %334 = vector.broadcast %333 : vector<1x32xf32> to vector<16x32xf32>
    %335 = arith.addf %332, %334 : vector<16x32xf32>
    %336 = arith.truncf %335 : vector<16x32xf32> to vector<16x32xbf16>
    %c16_121 = arith.constant 16 : index
    %c0_122 = arith.constant 0 : index
    %337 = vector.load %arg0[%c16_121, %c0_122] : memref<32x32xf32, #tpu.memory_space<vmem>>, vector<16x32xf32>
    %c8_123 = arith.constant 8 : index
    %c0_124 = arith.constant 0 : index
    %c0_125 = arith.constant 0 : index
    %338 = vector.load %arg1[%c8_123, %c0_124, %c0_125] : memref<22x32x128xbf16, #tpu.memory_space<vmem>>, vector<1x32x128xbf16>
    %339 = vector.shape_cast %338 : vector<1x32x128xbf16> to vector<32x128xbf16>
    %340 = vector.extract_strided_slice %339 {offsets = [0, 0], sizes = [32, 96], strides = [1, 1]} : vector<32x128xbf16> to vector<32x96xbf16>
    %341 = arith.truncf %337 : vector<16x32xf32> to vector<16x32xbf16>
    %cst_126 = arith.constant dense<0.000000e+00> : vector<16x96xf32>
    %342 = tpu.matmul %341, %340, %cst_126 {dimension_numbers = #tpu.dot_dimension_numbers<[1], [0], [0], [1], [0, 0, 1, 1], [], []>} : vector<16x32xbf16>, vector<32x96xbf16>, vector<16x96xf32> -> vector<16x96xf32>
    %c18 = arith.constant 18 : index
    %c0_127 = arith.constant 0 : index
    %343 = vector.load %arg3[%c18, %c0_127] : memref<47x128xf32, #tpu.memory_space<vmem>>, vector<1x96xf32>
    %344 = vector.broadcast %343 : vector<1x96xf32> to vector<16x96xf32>
    %345 = arith.addf %342, %344 : vector<16x96xf32>
    %346 = vector.extract_strided_slice %345 {offsets = [0, 0], sizes = [16, 32], strides = [1, 1]} : vector<16x96xf32> to vector<16x32xf32>
    %347 = vector.extract_strided_slice %345 {offsets = [0, 32], sizes = [16, 32], strides = [1, 1]} : vector<16x96xf32> to vector<16x32xf32>
    %348 = vector.extract_strided_slice %345 {offsets = [0, 64], sizes = [16, 32], strides = [1, 1]} : vector<16x96xf32> to vector<16x32xf32>
    %349 = arith.truncf %346 : vector<16x32xf32> to vector<16x32xbf16>
    %350 = arith.truncf %347 : vector<16x32xf32> to vector<16x32xbf16>
    %cst_128 = arith.constant dense<0.000000e+00> : vector<16x16xf32>
    %351 = tpu.matmul %349, %350, %cst_128 {dimension_numbers = #tpu.dot_dimension_numbers<[1], [1], [0], [0], [0, 0, 1, 0], [], []>} : vector<16x32xbf16>, vector<16x32xbf16>, vector<16x16xf32> -> vector<16x16xf32>
    %cst_129 = arith.constant -1.000000e+30 : f32
    %352 = vector.broadcast %cst_129 : f32 to vector<16x16xf32>
    %353 = arith.select %69, %351, %352 : vector<16x16xi1>, vector<16x16xf32>
    %cst_130 = arith.constant dense<0xFF800000> : vector<16xf32>
    %354 = vector.multi_reduction <maximumf>, %353, %cst_130 [1] : vector<16x16xf32> to vector<16xf32>
    %355 = vector.shape_cast %354 : vector<16xf32> to vector<16x1xf32>
    %356 = vector.broadcast %355 : vector<16x1xf32> to vector<16x16xf32>
    %357 = arith.subf %353, %356 : vector<16x16xf32>
    %358 = math.exp %357 : vector<16x16xf32>
    %cst_131 = arith.constant dense<0.000000e+00> : vector<16xf32>
    %359 = vector.multi_reduction <add>, %358, %cst_131 [1] : vector<16x16xf32> to vector<16xf32>
    %360 = vector.shape_cast %359 : vector<16xf32> to vector<16x1xf32>
    %361 = tpu.reciprocal %360 {approx = true} : vector<16x1xf32> -> vector<16x1xf32>
    %362 = vector.broadcast %361 : vector<16x1xf32> to vector<16x16xf32>
    %363 = arith.mulf %358, %362 : vector<16x16xf32>
    %364 = arith.truncf %363 : vector<16x16xf32> to vector<16x16xbf16>
    %365 = arith.truncf %348 : vector<16x32xf32> to vector<16x32xbf16>
    %cst_132 = arith.constant dense<0.000000e+00> : vector<16x32xf32>
    %366 = tpu.matmul %364, %365, %cst_132 {dimension_numbers = #tpu.dot_dimension_numbers<[1], [0], [0], [1], [0, 0, 1, 1], [], []>} : vector<16x16xbf16>, vector<16x32xbf16>, vector<16x32xf32> -> vector<16x32xf32>
    %c9_133 = arith.constant 9 : index
    %c0_134 = arith.constant 0 : index
    %c0_135 = arith.constant 0 : index
    %367 = vector.load %arg1[%c9_133, %c0_134, %c0_135] : memref<22x32x128xbf16, #tpu.memory_space<vmem>>, vector<1x32x128xbf16>
    %368 = vector.shape_cast %367 : vector<1x32x128xbf16> to vector<32x128xbf16>
    %369 = vector.extract_strided_slice %368 {offsets = [0, 0], sizes = [32, 32], strides = [1, 1]} : vector<32x128xbf16> to vector<32x32xbf16>
    %370 = arith.truncf %366 : vector<16x32xf32> to vector<16x32xbf16>
    %cst_136 = arith.constant dense<0.000000e+00> : vector<16x32xf32>
    %371 = tpu.matmul %370, %369, %cst_136 {dimension_numbers = #tpu.dot_dimension_numbers<[1], [0], [0], [1], [0, 0, 1, 1], [], []>} : vector<16x32xbf16>, vector<32x32xbf16>, vector<16x32xf32> -> vector<16x32xf32>
    %c19 = arith.constant 19 : index
    %c0_137 = arith.constant 0 : index
    %372 = vector.load %arg3[%c19, %c0_137] : memref<47x128xf32, #tpu.memory_space<vmem>>, vector<1x32xf32>
    %373 = vector.broadcast %372 : vector<1x32xf32> to vector<16x32xf32>
    %374 = arith.addf %371, %373 : vector<16x32xf32>
    %375 = arith.addf %337, %374 : vector<16x32xf32>
    %cst_138 = arith.constant dense<0.000000e+00> : vector<16xf32>
    %376 = vector.multi_reduction <add>, %375, %cst_138 [1] : vector<16x32xf32> to vector<16xf32>
    %377 = vector.shape_cast %376 : vector<16xf32> to vector<16x1xf32>
    %cst_139 = arith.constant 3.200000e+01 : f32
    %378 = vector.broadcast %cst_139 : f32 to vector<16x1xf32>
    %379 = arith.divf %377, %378 : vector<16x1xf32>
    %380 = vector.broadcast %379 : vector<16x1xf32> to vector<16x32xf32>
    %381 = arith.subf %375, %380 : vector<16x32xf32>
    %382 = arith.mulf %381, %381 : vector<16x32xf32>
    %cst_140 = arith.constant dense<0.000000e+00> : vector<16xf32>
    %383 = vector.multi_reduction <add>, %382, %cst_140 [1] : vector<16x32xf32> to vector<16xf32>
    %384 = vector.shape_cast %383 : vector<16xf32> to vector<16x1xf32>
    %cst_141 = arith.constant 3.200000e+01 : f32
    %385 = vector.broadcast %cst_141 : f32 to vector<16x1xf32>
    %386 = arith.divf %384, %385 : vector<16x1xf32>
    %387 = vector.broadcast %379 : vector<16x1xf32> to vector<16x32xf32>
    %388 = arith.subf %375, %387 : vector<16x32xf32>
    %cst_142 = arith.constant 9.99999974E-6 : f32
    %389 = vector.broadcast %cst_142 : f32 to vector<16x1xf32>
    %390 = arith.addf %386, %389 : vector<16x1xf32>
    %391 = math.rsqrt %390 : vector<16x1xf32>
    %392 = vector.broadcast %391 : vector<16x1xf32> to vector<16x32xf32>
    %393 = arith.mulf %388, %392 : vector<16x32xf32>
    %c25 = arith.constant 25 : index
    %c0_143 = arith.constant 0 : index
    %394 = vector.load %arg3[%c25, %c0_143] : memref<47x128xf32, #tpu.memory_space<vmem>>, vector<1x32xf32>
    %395 = vector.broadcast %394 : vector<1x32xf32> to vector<16x32xf32>
    %396 = arith.mulf %393, %395 : vector<16x32xf32>
    %c26 = arith.constant 26 : index
    %c0_144 = arith.constant 0 : index
    %397 = vector.load %arg3[%c26, %c0_144] : memref<47x128xf32, #tpu.memory_space<vmem>>, vector<1x32xf32>
    %398 = vector.broadcast %397 : vector<1x32xf32> to vector<16x32xf32>
    %399 = arith.addf %396, %398 : vector<16x32xf32>
    %c10_145 = arith.constant 10 : index
    %c0_146 = arith.constant 0 : index
    %c0_147 = arith.constant 0 : index
    %400 = vector.load %arg1[%c10_145, %c0_146, %c0_147] : memref<22x32x128xbf16, #tpu.memory_space<vmem>>, vector<1x32x128xbf16>
    %401 = vector.shape_cast %400 : vector<1x32x128xbf16> to vector<32x128xbf16>
    %402 = vector.extract_strided_slice %401 {offsets = [0, 0], sizes = [32, 32], strides = [1, 1]} : vector<32x128xbf16> to vector<32x32xbf16>
    %403 = arith.truncf %399 : vector<16x32xf32> to vector<16x32xbf16>
    %cst_148 = arith.constant dense<0.000000e+00> : vector<16x32xf32>
    %404 = tpu.matmul %403, %402, %cst_148 {dimension_numbers = #tpu.dot_dimension_numbers<[1], [0], [0], [1], [0, 0, 1, 1], [], []>} : vector<16x32xbf16>, vector<32x32xbf16>, vector<16x32xf32> -> vector<16x32xf32>
    %c20 = arith.constant 20 : index
    %c0_149 = arith.constant 0 : index
    %405 = vector.load %arg3[%c20, %c0_149] : memref<47x128xf32, #tpu.memory_space<vmem>>, vector<1x32xf32>
    %406 = vector.broadcast %405 : vector<1x32xf32> to vector<16x32xf32>
    %407 = arith.addf %404, %406 : vector<16x32xf32>
    %c11_150 = arith.constant 11 : index
    %c0_151 = arith.constant 0 : index
    %c0_152 = arith.constant 0 : index
    %408 = vector.load %arg1[%c11_150, %c0_151, %c0_152] : memref<22x32x128xbf16, #tpu.memory_space<vmem>>, vector<1x32x128xbf16>
    %409 = vector.shape_cast %408 : vector<1x32x128xbf16> to vector<32x128xbf16>
    %410 = vector.extract_strided_slice %409 {offsets = [0, 0], sizes = [32, 64], strides = [1, 1]} : vector<32x128xbf16> to vector<32x64xbf16>
    %cst_153 = arith.constant dense<0.000000e+00> : vector<16x64xf32>
    %411 = tpu.matmul %336, %410, %cst_153 {dimension_numbers = #tpu.dot_dimension_numbers<[1], [0], [0], [1], [0, 0, 1, 1], [], []>} : vector<16x32xbf16>, vector<32x64xbf16>, vector<16x64xf32> -> vector<16x64xf32>
    %c21 = arith.constant 21 : index
    %c0_154 = arith.constant 0 : index
    %412 = vector.load %arg3[%c21, %c0_154] : memref<47x128xf32, #tpu.memory_space<vmem>>, vector<1x64xf32>
    %413 = vector.broadcast %412 : vector<1x64xf32> to vector<16x64xf32>
    %414 = arith.addf %411, %413 : vector<16x64xf32>
    %415 = vector.extract_strided_slice %414 {offsets = [0, 0], sizes = [16, 32], strides = [1, 1]} : vector<16x64xf32> to vector<16x32xf32>
    %416 = vector.extract_strided_slice %414 {offsets = [0, 32], sizes = [16, 32], strides = [1, 1]} : vector<16x64xf32> to vector<16x32xf32>
    %417 = arith.truncf %407 : vector<16x32xf32> to vector<16x32xbf16>
    %418 = arith.truncf %415 : vector<16x32xf32> to vector<16x32xbf16>
    %cst_155 = arith.constant dense<0.000000e+00> : vector<16x16xf32>
    %419 = tpu.matmul %417, %418, %cst_155 {dimension_numbers = #tpu.dot_dimension_numbers<[1], [1], [0], [0], [0, 0, 1, 0], [], []>} : vector<16x32xbf16>, vector<16x32xbf16>, vector<16x16xf32> -> vector<16x16xf32>
    %cst_156 = arith.constant -1.000000e+30 : f32
    %420 = vector.broadcast %cst_156 : f32 to vector<16x16xf32>
    %421 = arith.select %104, %419, %420 : vector<16x16xi1>, vector<16x16xf32>
    %cst_157 = arith.constant dense<0xFF800000> : vector<16xf32>
    %422 = vector.multi_reduction <maximumf>, %421, %cst_157 [1] : vector<16x16xf32> to vector<16xf32>
    %423 = vector.shape_cast %422 : vector<16xf32> to vector<16x1xf32>
    %424 = vector.broadcast %423 : vector<16x1xf32> to vector<16x16xf32>
    %425 = arith.subf %421, %424 : vector<16x16xf32>
    %426 = math.exp %425 : vector<16x16xf32>
    %cst_158 = arith.constant dense<0.000000e+00> : vector<16xf32>
    %427 = vector.multi_reduction <add>, %426, %cst_158 [1] : vector<16x16xf32> to vector<16xf32>
    %428 = vector.shape_cast %427 : vector<16xf32> to vector<16x1xf32>
    %429 = tpu.reciprocal %428 {approx = true} : vector<16x1xf32> -> vector<16x1xf32>
    %430 = vector.broadcast %429 : vector<16x1xf32> to vector<16x16xf32>
    %431 = arith.mulf %426, %430 : vector<16x16xf32>
    %432 = arith.truncf %431 : vector<16x16xf32> to vector<16x16xbf16>
    %433 = arith.truncf %416 : vector<16x32xf32> to vector<16x32xbf16>
    %cst_159 = arith.constant dense<0.000000e+00> : vector<16x32xf32>
    %434 = tpu.matmul %432, %433, %cst_159 {dimension_numbers = #tpu.dot_dimension_numbers<[1], [0], [0], [1], [0, 0, 1, 1], [], []>} : vector<16x16xbf16>, vector<16x32xbf16>, vector<16x32xf32> -> vector<16x32xf32>
    %c12_160 = arith.constant 12 : index
    %c0_161 = arith.constant 0 : index
    %c0_162 = arith.constant 0 : index
    %435 = vector.load %arg1[%c12_160, %c0_161, %c0_162] : memref<22x32x128xbf16, #tpu.memory_space<vmem>>, vector<1x32x128xbf16>
    %436 = vector.shape_cast %435 : vector<1x32x128xbf16> to vector<32x128xbf16>
    %437 = vector.extract_strided_slice %436 {offsets = [0, 0], sizes = [32, 32], strides = [1, 1]} : vector<32x128xbf16> to vector<32x32xbf16>
    %438 = arith.truncf %434 : vector<16x32xf32> to vector<16x32xbf16>
    %cst_163 = arith.constant dense<0.000000e+00> : vector<16x32xf32>
    %439 = tpu.matmul %438, %437, %cst_163 {dimension_numbers = #tpu.dot_dimension_numbers<[1], [0], [0], [1], [0, 0, 1, 1], [], []>} : vector<16x32xbf16>, vector<32x32xbf16>, vector<16x32xf32> -> vector<16x32xf32>
    %c22 = arith.constant 22 : index
    %c0_164 = arith.constant 0 : index
    %440 = vector.load %arg3[%c22, %c0_164] : memref<47x128xf32, #tpu.memory_space<vmem>>, vector<1x32xf32>
    %441 = vector.broadcast %440 : vector<1x32xf32> to vector<16x32xf32>
    %442 = arith.addf %439, %441 : vector<16x32xf32>
    %443 = arith.addf %399, %442 : vector<16x32xf32>
    %cst_165 = arith.constant dense<0.000000e+00> : vector<16xf32>
    %444 = vector.multi_reduction <add>, %443, %cst_165 [1] : vector<16x32xf32> to vector<16xf32>
    %445 = vector.shape_cast %444 : vector<16xf32> to vector<16x1xf32>
    %cst_166 = arith.constant 3.200000e+01 : f32
    %446 = vector.broadcast %cst_166 : f32 to vector<16x1xf32>
    %447 = arith.divf %445, %446 : vector<16x1xf32>
    %448 = vector.broadcast %447 : vector<16x1xf32> to vector<16x32xf32>
    %449 = arith.subf %443, %448 : vector<16x32xf32>
    %450 = arith.mulf %449, %449 : vector<16x32xf32>
    %cst_167 = arith.constant dense<0.000000e+00> : vector<16xf32>
    %451 = vector.multi_reduction <add>, %450, %cst_167 [1] : vector<16x32xf32> to vector<16xf32>
    %452 = vector.shape_cast %451 : vector<16xf32> to vector<16x1xf32>
    %cst_168 = arith.constant 3.200000e+01 : f32
    %453 = vector.broadcast %cst_168 : f32 to vector<16x1xf32>
    %454 = arith.divf %452, %453 : vector<16x1xf32>
    %455 = vector.broadcast %447 : vector<16x1xf32> to vector<16x32xf32>
    %456 = arith.subf %443, %455 : vector<16x32xf32>
    %cst_169 = arith.constant 9.99999974E-6 : f32
    %457 = vector.broadcast %cst_169 : f32 to vector<16x1xf32>
    %458 = arith.addf %454, %457 : vector<16x1xf32>
    %459 = math.rsqrt %458 : vector<16x1xf32>
    %460 = vector.broadcast %459 : vector<16x1xf32> to vector<16x32xf32>
    %461 = arith.mulf %456, %460 : vector<16x32xf32>
    %c27 = arith.constant 27 : index
    %c0_170 = arith.constant 0 : index
    %462 = vector.load %arg3[%c27, %c0_170] : memref<47x128xf32, #tpu.memory_space<vmem>>, vector<1x32xf32>
    %463 = vector.broadcast %462 : vector<1x32xf32> to vector<16x32xf32>
    %464 = arith.mulf %461, %463 : vector<16x32xf32>
    %c28 = arith.constant 28 : index
    %c0_171 = arith.constant 0 : index
    %465 = vector.load %arg3[%c28, %c0_171] : memref<47x128xf32, #tpu.memory_space<vmem>>, vector<1x32xf32>
    %466 = vector.broadcast %465 : vector<1x32xf32> to vector<16x32xf32>
    %467 = arith.addf %464, %466 : vector<16x32xf32>
    %c13_172 = arith.constant 13 : index
    %c0_173 = arith.constant 0 : index
    %c0_174 = arith.constant 0 : index
    %468 = vector.load %arg1[%c13_172, %c0_173, %c0_174] : memref<22x32x128xbf16, #tpu.memory_space<vmem>>, vector<1x32x128xbf16>
    %469 = vector.shape_cast %468 : vector<1x32x128xbf16> to vector<32x128xbf16>
    %470 = arith.truncf %467 : vector<16x32xf32> to vector<16x32xbf16>
    %cst_175 = arith.constant dense<0.000000e+00> : vector<16x128xf32>
    %471 = tpu.matmul %470, %469, %cst_175 {dimension_numbers = #tpu.dot_dimension_numbers<[1], [0], [0], [1], [0, 0, 1, 1], [], []>} : vector<16x32xbf16>, vector<32x128xbf16>, vector<16x128xf32> -> vector<16x128xf32>
    %c23 = arith.constant 23 : index
    %c0_176 = arith.constant 0 : index
    %472 = vector.load %arg3[%c23, %c0_176] : memref<47x128xf32, #tpu.memory_space<vmem>>, vector<1x128xf32>
    %473 = vector.broadcast %472 : vector<1x128xf32> to vector<16x128xf32>
    %474 = arith.addf %471, %473 : vector<16x128xf32>
    %cst_177 = arith.constant 0.000000e+00 : f32
    %475 = vector.broadcast %cst_177 : f32 to vector<16x128xf32>
    %476 = arith.maximumf %474, %475 : vector<16x128xf32>
    %c14_178 = arith.constant 14 : index
    %c0_179 = arith.constant 0 : index
    %c0_180 = arith.constant 0 : index
    %477 = vector.load %arg1[%c14_178, %c0_179, %c0_180] : memref<22x32x128xbf16, #tpu.memory_space<vmem>>, vector<1x32x128xbf16>
    %478 = vector.shape_cast %477 : vector<1x32x128xbf16> to vector<32x128xbf16>
    %479 = arith.truncf %476 : vector<16x128xf32> to vector<16x128xbf16>
    %cst_181 = arith.constant dense<0.000000e+00> : vector<16x32xf32>
    %480 = tpu.matmul %479, %478, %cst_181 {dimension_numbers = #tpu.dot_dimension_numbers<[1], [1], [0], [0], [0, 0, 1, 0], [], []>} : vector<16x128xbf16>, vector<32x128xbf16>, vector<16x32xf32> -> vector<16x32xf32>
    %481 = arith.addf %467, %480 : vector<16x32xf32>
    %c24 = arith.constant 24 : index
    %c0_182 = arith.constant 0 : index
    %482 = vector.load %arg3[%c24, %c0_182] : memref<47x128xf32, #tpu.memory_space<vmem>>, vector<1x32xf32>
    %483 = vector.broadcast %482 : vector<1x32xf32> to vector<16x32xf32>
    %484 = arith.addf %481, %483 : vector<16x32xf32>
    %cst_183 = arith.constant dense<0.000000e+00> : vector<16xf32>
    %485 = vector.multi_reduction <add>, %484, %cst_183 [1] : vector<16x32xf32> to vector<16xf32>
    %486 = vector.shape_cast %485 : vector<16xf32> to vector<16x1xf32>
    %cst_184 = arith.constant 3.200000e+01 : f32
    %487 = vector.broadcast %cst_184 : f32 to vector<16x1xf32>
    %488 = arith.divf %486, %487 : vector<16x1xf32>
    %489 = vector.broadcast %488 : vector<16x1xf32> to vector<16x32xf32>
    %490 = arith.subf %484, %489 : vector<16x32xf32>
    %491 = arith.mulf %490, %490 : vector<16x32xf32>
    %cst_185 = arith.constant dense<0.000000e+00> : vector<16xf32>
    %492 = vector.multi_reduction <add>, %491, %cst_185 [1] : vector<16x32xf32> to vector<16xf32>
    %493 = vector.shape_cast %492 : vector<16xf32> to vector<16x1xf32>
    %cst_186 = arith.constant 3.200000e+01 : f32
    %494 = vector.broadcast %cst_186 : f32 to vector<16x1xf32>
    %495 = arith.divf %493, %494 : vector<16x1xf32>
    %496 = vector.broadcast %488 : vector<16x1xf32> to vector<16x32xf32>
    %497 = arith.subf %484, %496 : vector<16x32xf32>
    %cst_187 = arith.constant 9.99999974E-6 : f32
    %498 = vector.broadcast %cst_187 : f32 to vector<16x1xf32>
    %499 = arith.addf %495, %498 : vector<16x1xf32>
    %500 = math.rsqrt %499 : vector<16x1xf32>
    %501 = vector.broadcast %500 : vector<16x1xf32> to vector<16x32xf32>
    %502 = arith.mulf %497, %501 : vector<16x32xf32>
    %c29 = arith.constant 29 : index
    %c0_188 = arith.constant 0 : index
    %503 = vector.load %arg3[%c29, %c0_188] : memref<47x128xf32, #tpu.memory_space<vmem>>, vector<1x32xf32>
    %504 = vector.broadcast %503 : vector<1x32xf32> to vector<16x32xf32>
    %505 = arith.mulf %502, %504 : vector<16x32xf32>
    %c30 = arith.constant 30 : index
    %c0_189 = arith.constant 0 : index
    %506 = vector.load %arg3[%c30, %c0_189] : memref<47x128xf32, #tpu.memory_space<vmem>>, vector<1x32xf32>
    %507 = vector.broadcast %506 : vector<1x32xf32> to vector<16x32xf32>
    %508 = arith.addf %505, %507 : vector<16x32xf32>
    %c15_190 = arith.constant 15 : index
    %c0_191 = arith.constant 0 : index
    %c0_192 = arith.constant 0 : index
    %509 = vector.load %arg1[%c15_190, %c0_191, %c0_192] : memref<22x32x128xbf16, #tpu.memory_space<vmem>>, vector<1x32x128xbf16>
    %510 = vector.shape_cast %509 : vector<1x32x128xbf16> to vector<32x128xbf16>
    %511 = vector.extract_strided_slice %510 {offsets = [0, 0], sizes = [32, 96], strides = [1, 1]} : vector<32x128xbf16> to vector<32x96xbf16>
    %512 = arith.truncf %508 : vector<16x32xf32> to vector<16x32xbf16>
    %cst_193 = arith.constant dense<0.000000e+00> : vector<16x96xf32>
    %513 = tpu.matmul %512, %511, %cst_193 {dimension_numbers = #tpu.dot_dimension_numbers<[1], [0], [0], [1], [0, 0, 1, 1], [], []>} : vector<16x32xbf16>, vector<32x96xbf16>, vector<16x96xf32> -> vector<16x96xf32>
    %c31 = arith.constant 31 : index
    %c0_194 = arith.constant 0 : index
    %514 = vector.load %arg3[%c31, %c0_194] : memref<47x128xf32, #tpu.memory_space<vmem>>, vector<1x96xf32>
    %515 = vector.broadcast %514 : vector<1x96xf32> to vector<16x96xf32>
    %516 = arith.addf %513, %515 : vector<16x96xf32>
    %517 = vector.extract_strided_slice %516 {offsets = [0, 0], sizes = [16, 32], strides = [1, 1]} : vector<16x96xf32> to vector<16x32xf32>
    %518 = vector.extract_strided_slice %516 {offsets = [0, 32], sizes = [16, 32], strides = [1, 1]} : vector<16x96xf32> to vector<16x32xf32>
    %519 = vector.extract_strided_slice %516 {offsets = [0, 64], sizes = [16, 32], strides = [1, 1]} : vector<16x96xf32> to vector<16x32xf32>
    %520 = arith.truncf %517 : vector<16x32xf32> to vector<16x32xbf16>
    %521 = arith.truncf %518 : vector<16x32xf32> to vector<16x32xbf16>
    %cst_195 = arith.constant dense<0.000000e+00> : vector<16x16xf32>
    %522 = tpu.matmul %520, %521, %cst_195 {dimension_numbers = #tpu.dot_dimension_numbers<[1], [1], [0], [0], [0, 0, 1, 0], [], []>} : vector<16x32xbf16>, vector<16x32xbf16>, vector<16x16xf32> -> vector<16x16xf32>
    %cst_196 = arith.constant -1.000000e+30 : f32
    %523 = vector.broadcast %cst_196 : f32 to vector<16x16xf32>
    %524 = arith.select %69, %522, %523 : vector<16x16xi1>, vector<16x16xf32>
    %cst_197 = arith.constant dense<0xFF800000> : vector<16xf32>
    %525 = vector.multi_reduction <maximumf>, %524, %cst_197 [1] : vector<16x16xf32> to vector<16xf32>
    %526 = vector.shape_cast %525 : vector<16xf32> to vector<16x1xf32>
    %527 = vector.broadcast %526 : vector<16x1xf32> to vector<16x16xf32>
    %528 = arith.subf %524, %527 : vector<16x16xf32>
    %529 = math.exp %528 : vector<16x16xf32>
    %cst_198 = arith.constant dense<0.000000e+00> : vector<16xf32>
    %530 = vector.multi_reduction <add>, %529, %cst_198 [1] : vector<16x16xf32> to vector<16xf32>
    %531 = vector.shape_cast %530 : vector<16xf32> to vector<16x1xf32>
    %532 = tpu.reciprocal %531 {approx = true} : vector<16x1xf32> -> vector<16x1xf32>
    %533 = vector.broadcast %532 : vector<16x1xf32> to vector<16x16xf32>
    %534 = arith.mulf %529, %533 : vector<16x16xf32>
    %535 = arith.truncf %534 : vector<16x16xf32> to vector<16x16xbf16>
    %536 = arith.truncf %519 : vector<16x32xf32> to vector<16x32xbf16>
    %cst_199 = arith.constant dense<0.000000e+00> : vector<16x32xf32>
    %537 = tpu.matmul %535, %536, %cst_199 {dimension_numbers = #tpu.dot_dimension_numbers<[1], [0], [0], [1], [0, 0, 1, 1], [], []>} : vector<16x16xbf16>, vector<16x32xbf16>, vector<16x32xf32> -> vector<16x32xf32>
    %c16_200 = arith.constant 16 : index
    %c0_201 = arith.constant 0 : index
    %c0_202 = arith.constant 0 : index
    %538 = vector.load %arg1[%c16_200, %c0_201, %c0_202] : memref<22x32x128xbf16, #tpu.memory_space<vmem>>, vector<1x32x128xbf16>
    %539 = vector.shape_cast %538 : vector<1x32x128xbf16> to vector<32x128xbf16>
    %540 = vector.extract_strided_slice %539 {offsets = [0, 0], sizes = [32, 32], strides = [1, 1]} : vector<32x128xbf16> to vector<32x32xbf16>
    %541 = arith.truncf %537 : vector<16x32xf32> to vector<16x32xbf16>
    %cst_203 = arith.constant dense<0.000000e+00> : vector<16x32xf32>
    %542 = tpu.matmul %541, %540, %cst_203 {dimension_numbers = #tpu.dot_dimension_numbers<[1], [0], [0], [1], [0, 0, 1, 1], [], []>} : vector<16x32xbf16>, vector<32x32xbf16>, vector<16x32xf32> -> vector<16x32xf32>
    %c32 = arith.constant 32 : index
    %c0_204 = arith.constant 0 : index
    %543 = vector.load %arg3[%c32, %c0_204] : memref<47x128xf32, #tpu.memory_space<vmem>>, vector<1x32xf32>
    %544 = vector.broadcast %543 : vector<1x32xf32> to vector<16x32xf32>
    %545 = arith.addf %542, %544 : vector<16x32xf32>
    %546 = arith.addf %508, %545 : vector<16x32xf32>
    %cst_205 = arith.constant dense<0.000000e+00> : vector<16xf32>
    %547 = vector.multi_reduction <add>, %546, %cst_205 [1] : vector<16x32xf32> to vector<16xf32>
    %548 = vector.shape_cast %547 : vector<16xf32> to vector<16x1xf32>
    %cst_206 = arith.constant 3.200000e+01 : f32
    %549 = vector.broadcast %cst_206 : f32 to vector<16x1xf32>
    %550 = arith.divf %548, %549 : vector<16x1xf32>
    %551 = vector.broadcast %550 : vector<16x1xf32> to vector<16x32xf32>
    %552 = arith.subf %546, %551 : vector<16x32xf32>
    %553 = arith.mulf %552, %552 : vector<16x32xf32>
    %cst_207 = arith.constant dense<0.000000e+00> : vector<16xf32>
    %554 = vector.multi_reduction <add>, %553, %cst_207 [1] : vector<16x32xf32> to vector<16xf32>
    %555 = vector.shape_cast %554 : vector<16xf32> to vector<16x1xf32>
    %cst_208 = arith.constant 3.200000e+01 : f32
    %556 = vector.broadcast %cst_208 : f32 to vector<16x1xf32>
    %557 = arith.divf %555, %556 : vector<16x1xf32>
    %558 = vector.broadcast %550 : vector<16x1xf32> to vector<16x32xf32>
    %559 = arith.subf %546, %558 : vector<16x32xf32>
    %cst_209 = arith.constant 9.99999974E-6 : f32
    %560 = vector.broadcast %cst_209 : f32 to vector<16x1xf32>
    %561 = arith.addf %557, %560 : vector<16x1xf32>
    %562 = math.rsqrt %561 : vector<16x1xf32>
    %563 = vector.broadcast %562 : vector<16x1xf32> to vector<16x32xf32>
    %564 = arith.mulf %559, %563 : vector<16x32xf32>
    %c38 = arith.constant 38 : index
    %c0_210 = arith.constant 0 : index
    %565 = vector.load %arg3[%c38, %c0_210] : memref<47x128xf32, #tpu.memory_space<vmem>>, vector<1x32xf32>
    %566 = vector.broadcast %565 : vector<1x32xf32> to vector<16x32xf32>
    %567 = arith.mulf %564, %566 : vector<16x32xf32>
    %c39 = arith.constant 39 : index
    %c0_211 = arith.constant 0 : index
    %568 = vector.load %arg3[%c39, %c0_211] : memref<47x128xf32, #tpu.memory_space<vmem>>, vector<1x32xf32>
    %569 = vector.broadcast %568 : vector<1x32xf32> to vector<16x32xf32>
    %570 = arith.addf %567, %569 : vector<16x32xf32>
    %c17_212 = arith.constant 17 : index
    %c0_213 = arith.constant 0 : index
    %c0_214 = arith.constant 0 : index
    %571 = vector.load %arg1[%c17_212, %c0_213, %c0_214] : memref<22x32x128xbf16, #tpu.memory_space<vmem>>, vector<1x32x128xbf16>
    %572 = vector.shape_cast %571 : vector<1x32x128xbf16> to vector<32x128xbf16>
    %573 = vector.extract_strided_slice %572 {offsets = [0, 0], sizes = [32, 32], strides = [1, 1]} : vector<32x128xbf16> to vector<32x32xbf16>
    %574 = arith.truncf %570 : vector<16x32xf32> to vector<16x32xbf16>
    %cst_215 = arith.constant dense<0.000000e+00> : vector<16x32xf32>
    %575 = tpu.matmul %574, %573, %cst_215 {dimension_numbers = #tpu.dot_dimension_numbers<[1], [0], [0], [1], [0, 0, 1, 1], [], []>} : vector<16x32xbf16>, vector<32x32xbf16>, vector<16x32xf32> -> vector<16x32xf32>
    %c33 = arith.constant 33 : index
    %c0_216 = arith.constant 0 : index
    %576 = vector.load %arg3[%c33, %c0_216] : memref<47x128xf32, #tpu.memory_space<vmem>>, vector<1x32xf32>
    %577 = vector.broadcast %576 : vector<1x32xf32> to vector<16x32xf32>
    %578 = arith.addf %575, %577 : vector<16x32xf32>
    %c18_217 = arith.constant 18 : index
    %c0_218 = arith.constant 0 : index
    %c0_219 = arith.constant 0 : index
    %579 = vector.load %arg1[%c18_217, %c0_218, %c0_219] : memref<22x32x128xbf16, #tpu.memory_space<vmem>>, vector<1x32x128xbf16>
    %580 = vector.shape_cast %579 : vector<1x32x128xbf16> to vector<32x128xbf16>
    %581 = vector.extract_strided_slice %580 {offsets = [0, 0], sizes = [32, 64], strides = [1, 1]} : vector<32x128xbf16> to vector<32x64xbf16>
    %cst_220 = arith.constant dense<0.000000e+00> : vector<16x64xf32>
    %582 = tpu.matmul %336, %581, %cst_220 {dimension_numbers = #tpu.dot_dimension_numbers<[1], [0], [0], [1], [0, 0, 1, 1], [], []>} : vector<16x32xbf16>, vector<32x64xbf16>, vector<16x64xf32> -> vector<16x64xf32>
    %c34 = arith.constant 34 : index
    %c0_221 = arith.constant 0 : index
    %583 = vector.load %arg3[%c34, %c0_221] : memref<47x128xf32, #tpu.memory_space<vmem>>, vector<1x64xf32>
    %584 = vector.broadcast %583 : vector<1x64xf32> to vector<16x64xf32>
    %585 = arith.addf %582, %584 : vector<16x64xf32>
    %586 = vector.extract_strided_slice %585 {offsets = [0, 0], sizes = [16, 32], strides = [1, 1]} : vector<16x64xf32> to vector<16x32xf32>
    %587 = vector.extract_strided_slice %585 {offsets = [0, 32], sizes = [16, 32], strides = [1, 1]} : vector<16x64xf32> to vector<16x32xf32>
    %588 = arith.truncf %578 : vector<16x32xf32> to vector<16x32xbf16>
    %589 = arith.truncf %586 : vector<16x32xf32> to vector<16x32xbf16>
    %cst_222 = arith.constant dense<0.000000e+00> : vector<16x16xf32>
    %590 = tpu.matmul %588, %589, %cst_222 {dimension_numbers = #tpu.dot_dimension_numbers<[1], [1], [0], [0], [0, 0, 1, 0], [], []>} : vector<16x32xbf16>, vector<16x32xbf16>, vector<16x16xf32> -> vector<16x16xf32>
    %cst_223 = arith.constant -1.000000e+30 : f32
    %591 = vector.broadcast %cst_223 : f32 to vector<16x16xf32>
    %592 = arith.select %104, %590, %591 : vector<16x16xi1>, vector<16x16xf32>
    %cst_224 = arith.constant dense<0xFF800000> : vector<16xf32>
    %593 = vector.multi_reduction <maximumf>, %592, %cst_224 [1] : vector<16x16xf32> to vector<16xf32>
    %594 = vector.shape_cast %593 : vector<16xf32> to vector<16x1xf32>
    %595 = vector.broadcast %594 : vector<16x1xf32> to vector<16x16xf32>
    %596 = arith.subf %592, %595 : vector<16x16xf32>
    %597 = math.exp %596 : vector<16x16xf32>
    %cst_225 = arith.constant dense<0.000000e+00> : vector<16xf32>
    %598 = vector.multi_reduction <add>, %597, %cst_225 [1] : vector<16x16xf32> to vector<16xf32>
    %599 = vector.shape_cast %598 : vector<16xf32> to vector<16x1xf32>
    %600 = tpu.reciprocal %599 {approx = true} : vector<16x1xf32> -> vector<16x1xf32>
    %601 = vector.broadcast %600 : vector<16x1xf32> to vector<16x16xf32>
    %602 = arith.mulf %597, %601 : vector<16x16xf32>
    %603 = arith.truncf %602 : vector<16x16xf32> to vector<16x16xbf16>
    %604 = arith.truncf %587 : vector<16x32xf32> to vector<16x32xbf16>
    %cst_226 = arith.constant dense<0.000000e+00> : vector<16x32xf32>
    %605 = tpu.matmul %603, %604, %cst_226 {dimension_numbers = #tpu.dot_dimension_numbers<[1], [0], [0], [1], [0, 0, 1, 1], [], []>} : vector<16x16xbf16>, vector<16x32xbf16>, vector<16x32xf32> -> vector<16x32xf32>
    %c19_227 = arith.constant 19 : index
    %c0_228 = arith.constant 0 : index
    %c0_229 = arith.constant 0 : index
    %606 = vector.load %arg1[%c19_227, %c0_228, %c0_229] : memref<22x32x128xbf16, #tpu.memory_space<vmem>>, vector<1x32x128xbf16>
    %607 = vector.shape_cast %606 : vector<1x32x128xbf16> to vector<32x128xbf16>
    %608 = vector.extract_strided_slice %607 {offsets = [0, 0], sizes = [32, 32], strides = [1, 1]} : vector<32x128xbf16> to vector<32x32xbf16>
    %609 = arith.truncf %605 : vector<16x32xf32> to vector<16x32xbf16>
    %cst_230 = arith.constant dense<0.000000e+00> : vector<16x32xf32>
    %610 = tpu.matmul %609, %608, %cst_230 {dimension_numbers = #tpu.dot_dimension_numbers<[1], [0], [0], [1], [0, 0, 1, 1], [], []>} : vector<16x32xbf16>, vector<32x32xbf16>, vector<16x32xf32> -> vector<16x32xf32>
    %c35 = arith.constant 35 : index
    %c0_231 = arith.constant 0 : index
    %611 = vector.load %arg3[%c35, %c0_231] : memref<47x128xf32, #tpu.memory_space<vmem>>, vector<1x32xf32>
    %612 = vector.broadcast %611 : vector<1x32xf32> to vector<16x32xf32>
    %613 = arith.addf %610, %612 : vector<16x32xf32>
    %614 = arith.addf %570, %613 : vector<16x32xf32>
    %cst_232 = arith.constant dense<0.000000e+00> : vector<16xf32>
    %615 = vector.multi_reduction <add>, %614, %cst_232 [1] : vector<16x32xf32> to vector<16xf32>
    %616 = vector.shape_cast %615 : vector<16xf32> to vector<16x1xf32>
    %cst_233 = arith.constant 3.200000e+01 : f32
    %617 = vector.broadcast %cst_233 : f32 to vector<16x1xf32>
    %618 = arith.divf %616, %617 : vector<16x1xf32>
    %619 = vector.broadcast %618 : vector<16x1xf32> to vector<16x32xf32>
    %620 = arith.subf %614, %619 : vector<16x32xf32>
    %621 = arith.mulf %620, %620 : vector<16x32xf32>
    %cst_234 = arith.constant dense<0.000000e+00> : vector<16xf32>
    %622 = vector.multi_reduction <add>, %621, %cst_234 [1] : vector<16x32xf32> to vector<16xf32>
    %623 = vector.shape_cast %622 : vector<16xf32> to vector<16x1xf32>
    %cst_235 = arith.constant 3.200000e+01 : f32
    %624 = vector.broadcast %cst_235 : f32 to vector<16x1xf32>
    %625 = arith.divf %623, %624 : vector<16x1xf32>
    %626 = vector.broadcast %618 : vector<16x1xf32> to vector<16x32xf32>
    %627 = arith.subf %614, %626 : vector<16x32xf32>
    %cst_236 = arith.constant 9.99999974E-6 : f32
    %628 = vector.broadcast %cst_236 : f32 to vector<16x1xf32>
    %629 = arith.addf %625, %628 : vector<16x1xf32>
    %630 = math.rsqrt %629 : vector<16x1xf32>
    %631 = vector.broadcast %630 : vector<16x1xf32> to vector<16x32xf32>
    %632 = arith.mulf %627, %631 : vector<16x32xf32>
    %c40 = arith.constant 40 : index
    %c0_237 = arith.constant 0 : index
    %633 = vector.load %arg3[%c40, %c0_237] : memref<47x128xf32, #tpu.memory_space<vmem>>, vector<1x32xf32>
    %634 = vector.broadcast %633 : vector<1x32xf32> to vector<16x32xf32>
    %635 = arith.mulf %632, %634 : vector<16x32xf32>
    %c41 = arith.constant 41 : index
    %c0_238 = arith.constant 0 : index
    %636 = vector.load %arg3[%c41, %c0_238] : memref<47x128xf32, #tpu.memory_space<vmem>>, vector<1x32xf32>
    %637 = vector.broadcast %636 : vector<1x32xf32> to vector<16x32xf32>
    %638 = arith.addf %635, %637 : vector<16x32xf32>
    %c20_239 = arith.constant 20 : index
    %c0_240 = arith.constant 0 : index
    %c0_241 = arith.constant 0 : index
    %639 = vector.load %arg1[%c20_239, %c0_240, %c0_241] : memref<22x32x128xbf16, #tpu.memory_space<vmem>>, vector<1x32x128xbf16>
    %640 = vector.shape_cast %639 : vector<1x32x128xbf16> to vector<32x128xbf16>
    %641 = arith.truncf %638 : vector<16x32xf32> to vector<16x32xbf16>
    %cst_242 = arith.constant dense<0.000000e+00> : vector<16x128xf32>
    %642 = tpu.matmul %641, %640, %cst_242 {dimension_numbers = #tpu.dot_dimension_numbers<[1], [0], [0], [1], [0, 0, 1, 1], [], []>} : vector<16x32xbf16>, vector<32x128xbf16>, vector<16x128xf32> -> vector<16x128xf32>
    %c36 = arith.constant 36 : index
    %c0_243 = arith.constant 0 : index
    %643 = vector.load %arg3[%c36, %c0_243] : memref<47x128xf32, #tpu.memory_space<vmem>>, vector<1x128xf32>
    %644 = vector.broadcast %643 : vector<1x128xf32> to vector<16x128xf32>
    %645 = arith.addf %642, %644 : vector<16x128xf32>
    %cst_244 = arith.constant 0.000000e+00 : f32
    %646 = vector.broadcast %cst_244 : f32 to vector<16x128xf32>
    %647 = arith.maximumf %645, %646 : vector<16x128xf32>
    %c21_245 = arith.constant 21 : index
    %c0_246 = arith.constant 0 : index
    %c0_247 = arith.constant 0 : index
    %648 = vector.load %arg1[%c21_245, %c0_246, %c0_247] : memref<22x32x128xbf16, #tpu.memory_space<vmem>>, vector<1x32x128xbf16>
    %649 = vector.shape_cast %648 : vector<1x32x128xbf16> to vector<32x128xbf16>
    %650 = arith.truncf %647 : vector<16x128xf32> to vector<16x128xbf16>
    %cst_248 = arith.constant dense<0.000000e+00> : vector<16x32xf32>
    %651 = tpu.matmul %650, %649, %cst_248 {dimension_numbers = #tpu.dot_dimension_numbers<[1], [1], [0], [0], [0, 0, 1, 0], [], []>} : vector<16x128xbf16>, vector<32x128xbf16>, vector<16x32xf32> -> vector<16x32xf32>
    %652 = arith.addf %638, %651 : vector<16x32xf32>
    %c37 = arith.constant 37 : index
    %c0_249 = arith.constant 0 : index
    %653 = vector.load %arg3[%c37, %c0_249] : memref<47x128xf32, #tpu.memory_space<vmem>>, vector<1x32xf32>
    %654 = vector.broadcast %653 : vector<1x32xf32> to vector<16x32xf32>
    %655 = arith.addf %652, %654 : vector<16x32xf32>
    %cst_250 = arith.constant dense<0.000000e+00> : vector<16xf32>
    %656 = vector.multi_reduction <add>, %655, %cst_250 [1] : vector<16x32xf32> to vector<16xf32>
    %657 = vector.shape_cast %656 : vector<16xf32> to vector<16x1xf32>
    %cst_251 = arith.constant 3.200000e+01 : f32
    %658 = vector.broadcast %cst_251 : f32 to vector<16x1xf32>
    %659 = arith.divf %657, %658 : vector<16x1xf32>
    %660 = vector.broadcast %659 : vector<16x1xf32> to vector<16x32xf32>
    %661 = arith.subf %655, %660 : vector<16x32xf32>
    %662 = arith.mulf %661, %661 : vector<16x32xf32>
    %cst_252 = arith.constant dense<0.000000e+00> : vector<16xf32>
    %663 = vector.multi_reduction <add>, %662, %cst_252 [1] : vector<16x32xf32> to vector<16xf32>
    %664 = vector.shape_cast %663 : vector<16xf32> to vector<16x1xf32>
    %cst_253 = arith.constant 3.200000e+01 : f32
    %665 = vector.broadcast %cst_253 : f32 to vector<16x1xf32>
    %666 = arith.divf %664, %665 : vector<16x1xf32>
    %667 = vector.broadcast %659 : vector<16x1xf32> to vector<16x32xf32>
    %668 = arith.subf %655, %667 : vector<16x32xf32>
    %cst_254 = arith.constant 9.99999974E-6 : f32
    %669 = vector.broadcast %cst_254 : f32 to vector<16x1xf32>
    %670 = arith.addf %666, %669 : vector<16x1xf32>
    %671 = math.rsqrt %670 : vector<16x1xf32>
    %672 = vector.broadcast %671 : vector<16x1xf32> to vector<16x32xf32>
    %673 = arith.mulf %668, %672 : vector<16x32xf32>
    %c42 = arith.constant 42 : index
    %c0_255 = arith.constant 0 : index
    %674 = vector.load %arg3[%c42, %c0_255] : memref<47x128xf32, #tpu.memory_space<vmem>>, vector<1x32xf32>
    %675 = vector.broadcast %674 : vector<1x32xf32> to vector<16x32xf32>
    %676 = arith.mulf %673, %675 : vector<16x32xf32>
    %c43 = arith.constant 43 : index
    %c0_256 = arith.constant 0 : index
    %677 = vector.load %arg3[%c43, %c0_256] : memref<47x128xf32, #tpu.memory_space<vmem>>, vector<1x32xf32>
    %678 = vector.broadcast %677 : vector<1x32xf32> to vector<16x32xf32>
    %679 = arith.addf %676, %678 : vector<16x32xf32>
    %cst_257 = arith.constant dense<0.000000e+00> : vector<16xf32>
    %680 = vector.multi_reduction <add>, %679, %cst_257 [1] : vector<16x32xf32> to vector<16xf32>
    %681 = vector.shape_cast %680 : vector<16xf32> to vector<16x1xf32>
    %cst_258 = arith.constant 3.200000e+01 : f32
    %682 = vector.broadcast %cst_258 : f32 to vector<16x1xf32>
    %683 = arith.divf %681, %682 : vector<16x1xf32>
    %684 = vector.broadcast %683 : vector<16x1xf32> to vector<16x32xf32>
    %685 = arith.subf %679, %684 : vector<16x32xf32>
    %686 = arith.mulf %685, %685 : vector<16x32xf32>
    %cst_259 = arith.constant dense<0.000000e+00> : vector<16xf32>
    %687 = vector.multi_reduction <add>, %686, %cst_259 [1] : vector<16x32xf32> to vector<16xf32>
    %688 = vector.shape_cast %687 : vector<16xf32> to vector<16x1xf32>
    %cst_260 = arith.constant 3.200000e+01 : f32
    %689 = vector.broadcast %cst_260 : f32 to vector<16x1xf32>
    %690 = arith.divf %688, %689 : vector<16x1xf32>
    %691 = vector.broadcast %683 : vector<16x1xf32> to vector<16x32xf32>
    %692 = arith.subf %679, %691 : vector<16x32xf32>
    %cst_261 = arith.constant 9.99999974E-6 : f32
    %693 = vector.broadcast %cst_261 : f32 to vector<16x1xf32>
    %694 = arith.addf %690, %693 : vector<16x1xf32>
    %695 = math.rsqrt %694 : vector<16x1xf32>
    %696 = vector.broadcast %695 : vector<16x1xf32> to vector<16x32xf32>
    %697 = arith.mulf %692, %696 : vector<16x32xf32>
    %c44 = arith.constant 44 : index
    %c0_262 = arith.constant 0 : index
    %698 = vector.load %arg3[%c44, %c0_262] : memref<47x128xf32, #tpu.memory_space<vmem>>, vector<1x32xf32>
    %699 = vector.broadcast %698 : vector<1x32xf32> to vector<16x32xf32>
    %700 = arith.mulf %697, %699 : vector<16x32xf32>
    %c45 = arith.constant 45 : index
    %c0_263 = arith.constant 0 : index
    %701 = vector.load %arg3[%c45, %c0_263] : memref<47x128xf32, #tpu.memory_space<vmem>>, vector<1x32xf32>
    %702 = vector.broadcast %701 : vector<1x32xf32> to vector<16x32xf32>
    %703 = arith.addf %700, %702 : vector<16x32xf32>
    %704 = vector.extract_strided_slice %703 {offsets = [0, 0], sizes = [2, 32], strides = [1, 1]} : vector<16x32xf32> to vector<2x32xf32>
    %c0_264 = arith.constant 0 : index
    %c0_265 = arith.constant 0 : index
    %c0_266 = arith.constant 0 : index
    %705 = vector.load %arg2[%c0_264, %c0_265, %c0_266] : memref<8x32x128xbf16, #tpu.memory_space<vmem>>, vector<1x32x128xbf16>
    %706 = vector.shape_cast %705 : vector<1x32x128xbf16> to vector<32x128xbf16>
    %707 = arith.truncf %704 : vector<2x32xf32> to vector<2x32xbf16>
    %cst_267 = arith.constant dense<0.000000e+00> : vector<2x128xf32>
    %708 = tpu.matmul %707, %706, %cst_267 {dimension_numbers = #tpu.dot_dimension_numbers<[1], [0], [0], [1], [0, 0, 1, 1], [], []>} : vector<2x32xbf16>, vector<32x128xbf16>, vector<2x128xf32> -> vector<2x128xf32>
    %c46 = arith.constant 46 : index
    %c0_268 = arith.constant 0 : index
    %709 = vector.load %arg3[%c46, %c0_268] : memref<47x128xf32, #tpu.memory_space<vmem>>, vector<1x128xf32>
    %710 = vector.broadcast %709 : vector<1x128xf32> to vector<2x128xf32>
    %711 = arith.addf %708, %710 : vector<2x128xf32>
    %712 = vector.extract_strided_slice %703 {offsets = [2, 0], sizes = [2, 32], strides = [1, 1]} : vector<16x32xf32> to vector<2x32xf32>
    %c1_269 = arith.constant 1 : index
    %c0_270 = arith.constant 0 : index
    %c0_271 = arith.constant 0 : index
    %713 = vector.load %arg2[%c1_269, %c0_270, %c0_271] : memref<8x32x128xbf16, #tpu.memory_space<vmem>>, vector<1x32x128xbf16>
    %714 = vector.shape_cast %713 : vector<1x32x128xbf16> to vector<32x128xbf16>
    %715 = arith.truncf %712 : vector<2x32xf32> to vector<2x32xbf16>
    %cst_272 = arith.constant dense<0.000000e+00> : vector<2x128xf32>
    %716 = tpu.matmul %715, %714, %cst_272 {dimension_numbers = #tpu.dot_dimension_numbers<[1], [0], [0], [1], [0, 0, 1, 1], [], []>} : vector<2x32xbf16>, vector<32x128xbf16>, vector<2x128xf32> -> vector<2x128xf32>
    %717 = arith.addf %711, %716 : vector<2x128xf32>
    %718 = vector.extract_strided_slice %703 {offsets = [4, 0], sizes = [2, 32], strides = [1, 1]} : vector<16x32xf32> to vector<2x32xf32>
    %c2_273 = arith.constant 2 : index
    %c0_274 = arith.constant 0 : index
    %c0_275 = arith.constant 0 : index
    %719 = vector.load %arg2[%c2_273, %c0_274, %c0_275] : memref<8x32x128xbf16, #tpu.memory_space<vmem>>, vector<1x32x128xbf16>
    %720 = vector.shape_cast %719 : vector<1x32x128xbf16> to vector<32x128xbf16>
    %721 = arith.truncf %718 : vector<2x32xf32> to vector<2x32xbf16>
    %cst_276 = arith.constant dense<0.000000e+00> : vector<2x128xf32>
    %722 = tpu.matmul %721, %720, %cst_276 {dimension_numbers = #tpu.dot_dimension_numbers<[1], [0], [0], [1], [0, 0, 1, 1], [], []>} : vector<2x32xbf16>, vector<32x128xbf16>, vector<2x128xf32> -> vector<2x128xf32>
    %723 = arith.addf %717, %722 : vector<2x128xf32>
    %724 = vector.extract_strided_slice %703 {offsets = [6, 0], sizes = [2, 32], strides = [1, 1]} : vector<16x32xf32> to vector<2x32xf32>
    %c3_277 = arith.constant 3 : index
    %c0_278 = arith.constant 0 : index
    %c0_279 = arith.constant 0 : index
    %725 = vector.load %arg2[%c3_277, %c0_278, %c0_279] : memref<8x32x128xbf16, #tpu.memory_space<vmem>>, vector<1x32x128xbf16>
    %726 = vector.shape_cast %725 : vector<1x32x128xbf16> to vector<32x128xbf16>
    %727 = arith.truncf %724 : vector<2x32xf32> to vector<2x32xbf16>
    %cst_280 = arith.constant dense<0.000000e+00> : vector<2x128xf32>
    %728 = tpu.matmul %727, %726, %cst_280 {dimension_numbers = #tpu.dot_dimension_numbers<[1], [0], [0], [1], [0, 0, 1, 1], [], []>} : vector<2x32xbf16>, vector<32x128xbf16>, vector<2x128xf32> -> vector<2x128xf32>
    %729 = arith.addf %723, %728 : vector<2x128xf32>
    %730 = vector.extract_strided_slice %703 {offsets = [8, 0], sizes = [2, 32], strides = [1, 1]} : vector<16x32xf32> to vector<2x32xf32>
    %c4_281 = arith.constant 4 : index
    %c0_282 = arith.constant 0 : index
    %c0_283 = arith.constant 0 : index
    %731 = vector.load %arg2[%c4_281, %c0_282, %c0_283] : memref<8x32x128xbf16, #tpu.memory_space<vmem>>, vector<1x32x128xbf16>
    %732 = vector.shape_cast %731 : vector<1x32x128xbf16> to vector<32x128xbf16>
    %733 = arith.truncf %730 : vector<2x32xf32> to vector<2x32xbf16>
    %cst_284 = arith.constant dense<0.000000e+00> : vector<2x128xf32>
    %734 = tpu.matmul %733, %732, %cst_284 {dimension_numbers = #tpu.dot_dimension_numbers<[1], [0], [0], [1], [0, 0, 1, 1], [], []>} : vector<2x32xbf16>, vector<32x128xbf16>, vector<2x128xf32> -> vector<2x128xf32>
    %735 = arith.addf %729, %734 : vector<2x128xf32>
    %736 = vector.extract_strided_slice %703 {offsets = [10, 0], sizes = [2, 32], strides = [1, 1]} : vector<16x32xf32> to vector<2x32xf32>
    %c5_285 = arith.constant 5 : index
    %c0_286 = arith.constant 0 : index
    %c0_287 = arith.constant 0 : index
    %737 = vector.load %arg2[%c5_285, %c0_286, %c0_287] : memref<8x32x128xbf16, #tpu.memory_space<vmem>>, vector<1x32x128xbf16>
    %738 = vector.shape_cast %737 : vector<1x32x128xbf16> to vector<32x128xbf16>
    %739 = arith.truncf %736 : vector<2x32xf32> to vector<2x32xbf16>
    %cst_288 = arith.constant dense<0.000000e+00> : vector<2x128xf32>
    %740 = tpu.matmul %739, %738, %cst_288 {dimension_numbers = #tpu.dot_dimension_numbers<[1], [0], [0], [1], [0, 0, 1, 1], [], []>} : vector<2x32xbf16>, vector<32x128xbf16>, vector<2x128xf32> -> vector<2x128xf32>
    %741 = arith.addf %735, %740 : vector<2x128xf32>
    %742 = vector.extract_strided_slice %703 {offsets = [12, 0], sizes = [2, 32], strides = [1, 1]} : vector<16x32xf32> to vector<2x32xf32>
    %c6_289 = arith.constant 6 : index
    %c0_290 = arith.constant 0 : index
    %c0_291 = arith.constant 0 : index
    %743 = vector.load %arg2[%c6_289, %c0_290, %c0_291] : memref<8x32x128xbf16, #tpu.memory_space<vmem>>, vector<1x32x128xbf16>
    %744 = vector.shape_cast %743 : vector<1x32x128xbf16> to vector<32x128xbf16>
    %745 = arith.truncf %742 : vector<2x32xf32> to vector<2x32xbf16>
    %cst_292 = arith.constant dense<0.000000e+00> : vector<2x128xf32>
    %746 = tpu.matmul %745, %744, %cst_292 {dimension_numbers = #tpu.dot_dimension_numbers<[1], [0], [0], [1], [0, 0, 1, 1], [], []>} : vector<2x32xbf16>, vector<32x128xbf16>, vector<2x128xf32> -> vector<2x128xf32>
    %747 = arith.addf %741, %746 : vector<2x128xf32>
    %748 = vector.extract_strided_slice %703 {offsets = [14, 0], sizes = [2, 32], strides = [1, 1]} : vector<16x32xf32> to vector<2x32xf32>
    %c7_293 = arith.constant 7 : index
    %c0_294 = arith.constant 0 : index
    %c0_295 = arith.constant 0 : index
    %749 = vector.load %arg2[%c7_293, %c0_294, %c0_295] : memref<8x32x128xbf16, #tpu.memory_space<vmem>>, vector<1x32x128xbf16>
    %750 = vector.shape_cast %749 : vector<1x32x128xbf16> to vector<32x128xbf16>
    %751 = arith.truncf %748 : vector<2x32xf32> to vector<2x32xbf16>
    %cst_296 = arith.constant dense<0.000000e+00> : vector<2x128xf32>
    %752 = tpu.matmul %751, %750, %cst_296 {dimension_numbers = #tpu.dot_dimension_numbers<[1], [0], [0], [1], [0, 0, 1, 1], [], []>} : vector<2x32xbf16>, vector<32x128xbf16>, vector<2x128xf32> -> vector<2x128xf32>
    %753 = arith.addf %747, %752 : vector<2x128xf32>
    %cst_297 = arith.constant dense<0xFF800000> : vector<2xf32>
    %754 = vector.multi_reduction <maximumf>, %753, %cst_297 [1] : vector<2x128xf32> to vector<2xf32>
    %755 = vector.shape_cast %754 : vector<2xf32> to vector<2x1xf32>
    %756 = vector.broadcast %755 : vector<2x1xf32> to vector<2x128xf32>
    %757 = arith.subf %753, %756 : vector<2x128xf32>
    %758 = math.exp %757 : vector<2x128xf32>
    %cst_298 = arith.constant dense<0.000000e+00> : vector<2xf32>
    %759 = vector.multi_reduction <add>, %758, %cst_298 [1] : vector<2x128xf32> to vector<2xf32>
    %760 = vector.shape_cast %759 : vector<2xf32> to vector<2x1xf32>
    %761 = tpu.reciprocal %760 : vector<2x1xf32> -> vector<2x1xf32>
    %762 = vector.broadcast %761 : vector<2x1xf32> to vector<2x128xf32>
    %763 = arith.mulf %758, %762 : vector<2x128xf32>
    %c0_299 = arith.constant 0 : index
    %c0_300 = arith.constant 0 : index
    %764 = vector.load %arg4[%c0_299, %c0_300] : memref<2x128xf32, #tpu.memory_space<vmem>>, vector<2x128xf32>
    tpu.vector_store %arg4[%c0_299, %c0_300], %763 {strides = array<i32>} : memref<2x128xf32, #tpu.memory_space<vmem>>, vector<2x128xf32>,
    return
  }
}

</mosaic_0001>

<bundles_post_ra>
// kernel: _lambda_.1
= control target key start
LH: loop header
LB: loop body
LE: loop exit
PB: predicated region body
PF: predicated region fallthrough
CT: control target
= control target key end

     0   :  { %v4207_v1 = vmov 0.0   ;;  %vm4208_vm0 = vmmov 0   ;;  %vm86_vm1 = vcmask 261120   ;;  %s4960_s0 = inlined_call_operand.vmem [shape: f32[32,32], index: 0, kind: input, shape index: {}]   ;;  %s4961_s1 = inlined_call_operand.vmem [shape: bf16[22,32,128], index: 1, kind: input, shape index: {}]   ;;  %s4962_s2 = inlined_call_operand.vmem [shape: bf16[8,32,128], index: 2, kind: input, shape index: {}]   ;;  %s4963_s3 = inlined_call_operand.vmem [shape: f32[47,128], index: 3, kind: input, shape index: {}]   ;;  %s4964_s4 = inlined_call_operand.hbm [shape: f32[2,128], index: 4, kind: output, shape index: {}]  }
   0x1   :  { %v4023_v0 = vld [vmem:[%s4961_s1] sm:$0xff]   ;;  %3677 = vmatprep.subr.bf16.mxu0 %v4207_v1  ;;  %3697 = vmatprep.subr.bf16.mxu1 %v4207_v1  ;;  %v4024_v2 = vld [vmem:[%s4961_s1 + $0x8] sm:$0xff]  }
   0x2   :  { %3678 = vmatpush3.bf16.msra.mxu0 %v4023_v0  ;;  %3681 = vmatprep.mubr.msk.bf16.mxu0 %vm4208_vm0, %v4207_v1  ;;  %v4250_v3 = vld [vmem:[%s4960_s0] sm:$0xff]  ;;  %v4255_v4 = vld [vmem:[%s4960_s0 + $0x8] sm:$0xff] }
   0x3   :  { %3679 = vmatprep.subr.bf16.mxu0 %v4207_v1  ;;  %3701 = vmatprep.mubr.msk.bf16.mxu1 %vm4208_vm0, %v4207_v1  ;;  %v68_v5 = vpack.c.bf16 %v4255_v4, %v4250_v3 }
   0x6   :  { %3680 = vmatpush3.bf16.msra.mxu0 %v4024_v2 }
   0x7   :  { %3685 = vmatprep.subr.bf16.mxu0 %v4207_v1 }
   0x9   :  { %3682 = vmatmul.mubr.msk.bf16.vlgmr.msra.gmra.mrb[0].mxu0 %vm86_vm1, %v68_v5 }
   0xa   :  { %3687 = vmatprep.mubr.msk.bf16.mxu0 %vm4208_vm0, %v4207_v1 }
   0xb   :  { %9 = vsyncpa [#allocation3], 0  ;;  %v3306_v6 = vld [vmem:[%s4963_s3] ss:$0 sm:$0xff]  ;;  %s4209_s25 = smov 96   ;;  %v19_v16 = vlaneseq  ;;  %vm184_vm3 = vcmask 130048  }
   0xc   :  { %s4210_s26 = smov 64   ;;  %v4025_v43 = vld [vmem:[%s4961_s1 + $0x10] sm:$0xff]   ;;  %v4026_v52 = vld [vmem:[%s4961_s1 + $0x18] sm:$0xff]   ;;  %v3316_v58 = vld [vmem:[%s4963_s3 + $0x1] ss:$0 sm:$0xff]  ;;  %vm3279_vm5 = vcmask 1041408  }
   0xd   :  { %v20_v17 = vshrl.u32 %v19_v16, 7  ;;  %v23_v18 = vand.u32 127, %v19_v16  ;;  %3698 = vmatpush3.bf16.msra.mxu1 %v4025_v43 }
   0xe   :  { %3699 = vmatprep.subr.bf16.mxu1 %v4207_v1 }
   0xf   :  { %v21_v19 = vadd.s32 8, %v20_v17  ;;  %v28_v20 = vand.u32 1, %v20_v17  ;;  %v52_v21 = vand.u32 1, %v23_v18  ;;  %v4028_v17 = vld [vmem:[%s4961_s1 + $0x28] sm:$0xff]  }
  0x11   :  { %v35_v22 = vand.u32 1, %v21_v19  ;;  %vm4275_vm2 = vcmp.eq.s32.totalorder %v28_v20, %v52_v21  ;;  %3700 = vmatpush3.bf16.msra.mxu1 %v4026_v52 }
  0x12   :  { %3735 = vmatprep.subr.bf16.mxu1 %v4207_v1 }
  0x13   :  { %vm4279_vm4 = vcmp.eq.s32.totalorder %v35_v22, %v52_v21 }
  0xdc   :  { %v124_v7 = vpop.f32.mrb[0].mxu0 }
  0xdd   :  { %v3683_v8 = vpop.f32.mrb[1].mxu0  ;;  %v125_v10 = vadd.f32 %v3306_v6, %v124_v7 }
  0xde   :  { %v127_v9 = vpop.f32.mrb[2].mxu0 }
  0xdf   :  { %v128_v11 = vadd.f32 %v3306_v6, %v127_v9  ;;  %v3684_v12 = vpop.f32.mrb[3].mxu0 }
  0xe1   :  { %v131_v13 = vpack.c.bf16 %v128_v11, %v125_v10 }
  0xe3   :  { %133 = vrot.lane.b32.xlu0 %v131_v13, %s4209_s25 }
 0x155   :  { %v134_v14 = vpop.permute.xlu0 %133 }
 0x156   :  { %v139_v15 = vsel %vm86_vm1, %v134_v14, 0 }
 0x157   :  { %3686 = vmatpush3.bf16.xpose.msra.mxu0 %v139_v15 }
 0x158   :  { %3691 = vmatprep.subr.bf16.mxu0 %v4207_v1 }
 0x15e   :  { %3688 = vmatmul.mubr.msk.bf16.vlgmr.msra.gmra.mrb[4].mxu0 %vm86_vm1, %v131_v13 }
 0x15f   :  { %3693 = vmatprep.mubr.msk.bf16.mxu0 %vm4208_vm0, %v4207_v1 }
 0x231   :  { %v175_v24 = vpop.f32.mrb[4].mxu0 }
 0x232   :  { %v182_v26 = vsel %vm4275_vm2, %v175_v24, -1e+30  ;;  %v3689_v27 = vpop.f32.mrb[5].mxu0 }
 0x233   :  { %v178_v28 = vpop.f32.mrb[6].mxu0  ;;  %v185_v29 = vsel %vm184_vm3, %v182_v26, -inf }
 0x234   :  { %v183_v30 = vsel %vm4279_vm4, %v178_v28, -1e+30  ;;  %v3690_v31 = vpop.f32.mrb[7].mxu0  ;;  %186 = vmax.xlane.f32.xlu0 %v185_v29  ;;  %v3320_v28 = vld [vmem:[%s4963_s3 + $0x4] ss:$0 sm:$0xff] }
 0x235   :  { %v188_v32 = vsel %vm184_vm3, %v183_v30, -inf }
 0x236   :  { %189 = vmax.xlane.f32.xlu1 %v188_v32  ;;  %v3321_v32 = vld [vmem:[%s4963_s3 + $0x5] ss:$0 sm:$0xff] }
 0x2c1   :  { %v187_v33 = vpop.xlane.xlu0 %186 }
 0x2c2   :  { %v191_v34 = vsub.f32 %v182_v26, %v187_v33 }
 0x2c3   :  { %v190_v35 = vpop.xlane.xlu1 %189 }
 0x2c4   :  { %v193_v36 = vmul.f32 1.442695, %v191_v34  ;;  %v192_v37 = vsub.f32 %v183_v30, %v190_v35 }
 0x2c6   :  { %4083 = vpow2.f32 %v193_v36  ;;  %v195_v38 = vmul.f32 1.442695, %v192_v37  ;;  %v4029_v36 = vld [vmem:[%s4961_s1 + $0x30] sm:$0xff]  }
 0x2c8   :  { %4085 = vpow2.f32 %v195_v38  ;;  %v4030_v38 = vld [vmem:[%s4961_s1 + $0x38] sm:$0xff]  }
 0x2d0   :  { %v4084_v39 = vpop.eup %4083 }
 0x2d1   :  { %v197_v40 = vsel %vm184_vm3, %v4084_v39, 0.0 }
 0x2d2   :  { %v4086_v41 = vpop.eup %4085  ;;  %198 = vadd.xlane.f32.xlu1 %v197_v40 }
 0x2d3   :  { %v200_v42 = vsel %vm184_vm3, %v4086_v41, 0.0 }
 0x2d6   :  { %201 = vadd.xlane.f32.xlu1 %v200_v42 }
 0x2e7   :  { %208 = vrot.lane.b32.xlu1 %v131_v13, %s4210_s26 }
 0x35f   :  { %v199_v44 = vpop.xlane.xlu1 %198 }
 0x360   :  { %4087 = vrcp.f32 %v199_v44 }
 0x363   :  { %v202_v45 = vpop.xlane.xlu1 %201 }
 0x364   :  { %4089 = vrcp.f32 %v202_v45 }
 0x367   :  { %v209_v46 = vpop.permute.xlu1 %208 }
 0x368   :  { %3692 = vmatpush3.bf16.msra.mxu0 %v209_v46 }
 0x369   :  { %3705 = vmatprep.subr.bf16.mxu0 %v4207_v1 }
 0x36a   :  { %v4088_v47 = vpop.eup %4087 }
 0x36b   :  { %v205_v49 = vmul.f32 %v4088_v47, %v4084_v39  ;;  %v3326_v39 = vld [vmem:[%s4963_s3 + $0x2] ss:$0 sm:$0xff] }
 0x36e   :  { %v4090_v48 = vpop.eup %4089 }
 0x36f   :  { %v206_v50 = vmul.f32 %v4090_v48, %v4086_v41 }
 0x371   :  { %v207_v51 = vpack.c.bf16 %v206_v50, %v205_v49  ;;  %v3336_v50 = vld [vmem:[%s4963_s3 + $0x3] ss:$0 sm:$0xff] }
 0x373   :  { %3694 = vmatmul.mubr.msk.bf16.vlgmr.msra.gmra.mrb[8].mxu0 %vm184_vm3, %v207_v51 }
 0x374   :  { %3709 = vmatprep.mubr.msk.bf16.mxu0 %vm4208_vm0, %v4207_v1 }
 0x446   :  { %v248_v53 = vpop.f32.mrb[8].mxu0 }
 0x447   :  { %v3695_v54 = vpop.f32.mrb[9].mxu0 }
 0x448   :  { %v251_v55 = vpop.f32.mrb[10].mxu0 }
 0x449   :  { %v260_v56 = vpack.c.bf16 %v251_v55, %v248_v53  ;;  %v3696_v57 = vpop.f32.mrb[11].mxu0 }
 0x44b   :  { %3702 = vmatmul.mubr.msk.bf16.vlgmr.msra.gmra.mrb[0].mxu1 %vm86_vm1, %v260_v56 }
 0x44c   :  { %3737 = vmatprep.mubr.msk.bf16.mxu1 %vm4208_vm0, %v4207_v1 }
 0x51e   :  { %v315_v59 = vpop.f32.mrb[0].mxu1 }
 0x51f   :  { %v316_v60 = vadd.f32 %v3316_v58, %v315_v59  ;;  %v3703_v61 = vpop.f32.mrb[1].mxu1 }
 0x520   :  { %v318_v62 = vpop.f32.mrb[2].mxu1 }
 0x521   :  { %v319_v63 = vadd.f32 %v3316_v58, %v318_v62  ;;  %v3704_v0 = vpop.f32.mrb[3].mxu1  ;;  %v322_v2 = vadd.f32 %v316_v60, %v4250_v3 }
 0x523   :  { %v324_v5 = vsel %vm86_vm1, %v322_v2, 0.0  ;;  %v323_v6 = vadd.f32 %v319_v63, %v4255_v4  ;;  %v4027_v4 = vld [vmem:[%s4961_s1 + $0x20] sm:$0xff]  }
 0x524   :  { %325 = vadd.xlane.f32.xlu1 %v324_v5  ;;  %3706 = vmatpush3.bf16.msra.mxu0 %v4027_v4 }
 0x525   :  { %v327_v7 = vsel %vm86_vm1, %v323_v6, 0.0  ;;  %3707 = vmatprep.subr.bf16.mxu0 %v4207_v1 }
 0x526   :  { %328 = vadd.xlane.f32.xlu0 %v327_v7 }
 0x528   :  { %3708 = vmatpush3.bf16.msra.mxu0 %v4028_v17  ;;  %v3337_v17 = vld [vmem:[%s4963_s3 + $0x6] ss:$0 sm:$0xff] }
 0x529   :  { %3713 = vmatprep.subr.bf16.mxu0 %v4207_v1 }
 0x5b1   :  { %v326_v8 = vpop.xlane.xlu1 %325 }
 0x5b2   :  { %v331_v9 = vmul.f32 0.03125, %v326_v8 }
 0x5b3   :  { %v329_v10 = vpop.xlane.xlu0 %328 }
 0x5b4   :  { %v333_v11 = vsub.f32 %v322_v2, %v331_v9  ;;  %v332_v12 = vmul.f32 0.03125, %v329_v10  ;;  %v4031_v9 = vld [vmem:[%s4961_s1 + $0x40] sm:$0xff]   ;;  %v4032_v10 = vld [vmem:[%s4961_s1 + $0x48] sm:$0xff]  }
 0x5b6   :  { %v334_v13 = vsub.f32 %v323_v6, %v332_v12  ;;  %v335_v14 = vmul.f32 %v333_v11, %v333_v11 }
 0x5b8   :  { %v337_v15 = vsel %vm86_vm1, %v335_v14, 0.0  ;;  %v336_v16 = vmul.f32 %v334_v13, %v334_v13 }
 0x5b9   :  { %338 = vadd.xlane.f32.xlu0 %v337_v15 }
 0x5ba   :  { %v340_v3 = vsel %vm86_vm1, %v336_v16, 0.0 }
 0x5bd   :  { %341 = vadd.xlane.f32.xlu0 %v340_v3 }
 0x646   :  { %v339_v18 = vpop.xlane.xlu0 %338 }
 0x647   :  { %v343_v19 = vmul.f32 0.03125, %v339_v18 }
 0x649   :  { %v345_v20 = vadd.f32 1e-05, %v343_v19 }
 0x64a   :  { %v342_v21 = vpop.xlane.xlu0 %341 }
 0x64b   :  { %4091 = vrsqrt.f32 %v345_v20  ;;  %v344_v22 = vmul.f32 0.03125, %v342_v21  ;;  %v3338_v21 = vld [vmem:[%s4963_s3 + $0x7] ss:$0 sm:$0xff] }
 0x64d   :  { %v346_v24 = vadd.f32 1e-05, %v344_v22 }
 0x64f   :  { %4093 = vrsqrt.f32 %v346_v24 }
 0x655   :  { %v4092_v26 = vpop.eup %4091 }
 0x656   :  { %v349_v27 = vmul.f32 %v4092_v26, %v333_v11 }
 0x658   :  { %v356_v30 = vmul.f32 %v3320_v28, %v349_v27 }
 0x659   :  { %v4094_v29 = vpop.eup %4093 }
 0x65a   :  { %v350_v31 = vmul.f32 %v4094_v29, %v334_v13  ;;  %v363_v34 = vadd.f32 %v3321_v32, %v356_v30 }
 0x65c   :  { %v357_v33 = vmul.f32 %v3320_v28, %v350_v31  ;;  %v3343_v28 = vld [vmem:[%s4963_s3 + $0x8] ss:$0 sm:$0xff] }
 0x65e   :  { %v364_v35 = vadd.f32 %v3321_v32, %v357_v33 }
 0x660   :  { %v370_v37 = vpack.c.bf16 %v364_v35, %v363_v34 }
 0x662   :  { %3710 = vmatmul.mubr.msk.bf16.vlgmr.msra.gmra.mrb[12].mxu0 %vm86_vm1, %v370_v37 }
 0x663   :  { %3714 = vmatpush3.bf16.xpose.msra.mxu0 %v4029_v36  ;;  %3717 = vmatprep.mubr.msk.bf16.mxu0 %vm4208_vm0, %v4207_v1 }
 0x664   :  { %3715 = vmatprep.subr.bf16.mxu0 %v4207_v1 }
 0x66b   :  { %3716 = vmatpush3.bf16.xpose.msra.mxu0 %v4030_v38 }
 0x66c   :  { %3721 = vmatprep.subr.bf16.mxu0 %v4207_v1 }
 0x735   :  { %v425_v40 = vpop.f32.mrb[12].mxu0 }
 0x736   :  { %v426_v41 = vadd.f32 %v3326_v39, %v425_v40  ;;  %v3711_v42 = vpop.f32.mrb[13].mxu0 }
 0x737   :  { %v428_v43 = vpop.f32.mrb[14].mxu0 }
 0x738   :  { %v429_v44 = vadd.f32 %v3326_v39, %v428_v43  ;;  %v3712_v45 = vpop.f32.mrb[15].mxu0  ;;  %v432_v46 = vmax.f32 %v426_v41, 0.0 }
 0x73a   :  { %v433_v47 = vmax.f32 %v429_v44, 0.0 }
 0x73c   :  { %v439_v48 = vpack.c.bf16 %v433_v47, %v432_v46 }
 0x73e   :  { %3718 = vmatmul.mubr.bf16.vlgmr.msra.gmra.mrb[16].mxu0 %v439_v48 }
 0x73f   :  { %3725 = vmatprep.mubr.msk.bf16.mxu0 %vm4208_vm0, %v4207_v1  ;;  %3722 = vmatpush3.bf16.msra.mxu0 %v4031_v9 }
 0x740   :  { %3723 = vmatprep.subr.bf16.mxu0 %v4207_v1 }
 0x743   :  { %3724 = vmatpush3.bf16.msra.mxu0 %v4032_v10  ;;  %v3353_v10 = vld [vmem:[%s4963_s3 + $0x9] ss:$0 sm:$0xff] }
 0x744   :  { %3729 = vmatprep.subr.bf16.mxu0 %v4207_v1 }
 0x811   :  { %v486_v49 = vpop.f32.mrb[16].mxu0 }
 0x812   :  { %v493_v51 = vadd.f32 %v486_v49, %v363_v34  ;;  %v3719_v52 = vpop.f32.mrb[17].mxu0 }
 0x813   :  { %v489_v53 = vpop.f32.mrb[18].mxu0 }
 0x814   :  { %v494_v54 = vadd.f32 %v489_v53, %v364_v35  ;;  %v3720_v55 = vpop.f32.mrb[19].mxu0  ;;  %v500_v56 = vadd.f32 %v3336_v50, %v493_v51 }
 0x816   :  { %v502_v57 = vsel %vm86_vm1, %v500_v56, 0.0  ;;  %v501_v58 = vadd.f32 %v3336_v50, %v494_v54 }
 0x817   :  { %503 = vadd.xlane.f32.xlu0 %v502_v57 }
 0x818   :  { %v505_v59 = vsel %vm86_vm1, %v501_v58, 0.0 }
 0x81b   :  { %506 = vadd.xlane.f32.xlu0 %v505_v59 }
 0x8a4   :  { %v504_v60 = vpop.xlane.xlu0 %503 }
 0x8a5   :  { %v508_v61 = vmul.f32 0.03125, %v504_v60 }
 0x8a7   :  { %v510_v62 = vsub.f32 %v500_v56, %v508_v61  ;;  %v4033_v56 = vld [vmem:[%s4961_s1 + $0x50] sm:$0xff]  }
 0x8a8   :  { %v507_v63 = vpop.xlane.xlu0 %506 }
 0x8a9   :  { %v509_v0 = vmul.f32 0.03125, %v507_v63  ;;  %v512_v2 = vmul.f32 %v510_v62, %v510_v62 }
 0x8ab   :  { %v511_v5 = vsub.f32 %v501_v58, %v509_v0  ;;  %v514_v6 = vsel %vm86_vm1, %v512_v2, 0.0  ;;  %v4034_v2 = vld [vmem:[%s4961_s1 + $0x58] sm:$0xff]  }
 0x8ac   :  { %515 = vadd.xlane.f32.xlu0 %v514_v6 }
 0x8ad   :  { %v513_v7 = vmul.f32 %v511_v5, %v511_v5 }
 0x8af   :  { %v517_v8 = vsel %vm86_vm1, %v513_v7, 0.0 }
 0x8b0   :  { %518 = vadd.xlane.f32.xlu0 %v517_v8 }
 0x939   :  { %v516_v11 = vpop.xlane.xlu0 %515 }
 0x93a   :  { %v520_v12 = vmul.f32 0.03125, %v516_v11 }
 0x93c   :  { %v522_v13 = vadd.f32 1e-05, %v520_v12 }
 0x93d   :  { %v519_v14 = vpop.xlane.xlu0 %518 }
 0x93e   :  { %4095 = vrsqrt.f32 %v522_v13  ;;  %v521_v15 = vmul.f32 0.03125, %v519_v14 }
 0x940   :  { %v523_v16 = vadd.f32 1e-05, %v521_v15 }
 0x942   :  { %4097 = vrsqrt.f32 %v523_v16 }
 0x948   :  { %v4096_v3 = vpop.eup %4095 }
 0x949   :  { %v526_v4 = vmul.f32 %v4096_v3, %v510_v62 }
 0x94b   :  { %v533_v19 = vmul.f32 %v3337_v17, %v526_v4 }
 0x94c   :  { %v4098_v18 = vpop.eup %4097 }
 0x94d   :  { %v527_v20 = vmul.f32 %v4098_v18, %v511_v5  ;;  %v4367_v24 = vadd.f32 %v3338_v21, %v533_v19 }
 0x94f   :  { %v534_v22 = vmul.f32 %v3337_v17, %v527_v20 }
 0x951   :  { %v4369_v26 = vadd.f32 %v3338_v21, %v534_v22 }
 0x953   :  { %v547_v27 = vpack.c.bf16 %v4369_v26, %v4367_v24 }
 0x955   :  { %3726 = vmatmul.mubr.msk.bf16.vlgmr.msra.gmra.mrb[20].mxu0 %vm86_vm1, %v547_v27 }
 0x956   :  { %3731 = vmatprep.mubr.msk.bf16.mxu0 %vm4208_vm0, %v4207_v1 }
 0xa28   :  { %v602_v29 = vpop.f32.mrb[20].mxu0 }
 0xa29   :  { %v3727_v30 = vpop.f32.mrb[21].mxu0  ;;  %v603_v32 = vadd.f32 %v3343_v28, %v602_v29 }
 0xa2a   :  { %v605_v31 = vpop.f32.mrb[22].mxu0 }
 0xa2b   :  { %v606_v33 = vadd.f32 %v3343_v28, %v605_v31  ;;  %v3728_v34 = vpop.f32.mrb[23].mxu0 }
 0xa2d   :  { %v609_v35 = vpack.c.bf16 %v606_v33, %v603_v32  ;;  %v4036_v32 = vld [vmem:[%s4961_s1 + $0x68] sm:$0xff]   ;;  %v4039_v33 = vld [vmem:[%s4961_s1 + $0x70] sm:$0xff]  }
 0xa2f   :  { %611 = vrot.lane.b32.xlu0 %v609_v35, %s4209_s25 }
 0xaa1   :  { %v612_v36 = vpop.permute.xlu0 %611 }
 0xaa2   :  { %v617_v37 = vsel %vm86_vm1, %v612_v36, 0 }
 0xaa3   :  { %3730 = vmatpush3.bf16.xpose.msra.mxu0 %v617_v37 }
 0xaa4   :  { %3741 = vmatprep.subr.bf16.mxu0 %v4207_v1 }
 0xaaa   :  { %3732 = vmatmul.mubr.msk.bf16.vlgmr.msra.gmra.mrb[24].mxu0 %vm86_vm1, %v609_v35 }
 0xaab   :  { %3745 = vmatprep.mubr.msk.bf16.mxu0 %vm4208_vm0, %v4207_v1  ;;  %3742 = vmatpush3.bf16.msra.mxu0 %v4033_v56  ;;  %v4040_v56 = vld [vmem:[%s4961_s1 + $0x78] sm:$0xff]  }
 0xaac   :  { %3743 = vmatprep.subr.bf16.mxu0 %v4207_v1 }
 0xaaf   :  { %3744 = vmatpush3.bf16.msra.mxu0 %v4034_v2 }
 0xab0   :  { %3757 = vmatprep.subr.bf16.mxu0 %v4207_v1 }
 0xb7d   :  { %v653_v38 = vpop.f32.mrb[24].mxu0 }
 0xb7e   :  { %v660_v39 = vsel %vm4275_vm2, %v653_v38, -1e+30  ;;  %v3733_v40 = vpop.f32.mrb[25].mxu0 }
 0xb7f   :  { %v656_v41 = vpop.f32.mrb[26].mxu0  ;;  %v662_v42 = vsel %vm184_vm3, %v660_v39, -inf }
 0xb80   :  { %v661_v43 = vsel %vm4279_vm4, %v656_v41, -1e+30  ;;  %663 = vmax.xlane.f32.xlu1 %v662_v42  ;;  %v3734_v44 = vpop.f32.mrb[27].mxu0  ;;  %v3357_v42 = vld [vmem:[%s4963_s3 + $0xc] ss:$0 sm:$0xff] }
 0xb81   :  { %v665_v45 = vsel %vm184_vm3, %v661_v43, -inf }
 0xb84   :  { %666 = vmax.xlane.f32.xlu1 %v665_v45 }
 0xc0d   :  { %v664_v46 = vpop.xlane.xlu1 %663 }
 0xc0e   :  { %v668_v47 = vsub.f32 %v660_v39, %v664_v46  ;;  %v3358_v46 = vld [vmem:[%s4963_s3 + $0xd] ss:$0 sm:$0xff] }
 0xc10   :  { %v670_v48 = vmul.f32 1.442695, %v668_v47 }
 0xc11   :  { %v667_v49 = vpop.xlane.xlu1 %666 }
 0xc12   :  { %4099 = vpow2.f32 %v670_v48  ;;  %v669_v50 = vsub.f32 %v661_v43, %v667_v49 }
 0xc14   :  { %v672_v51 = vmul.f32 1.442695, %v669_v50  ;;  %v4037_v50 = vld [vmem:[%s4961_s1 + $0x80] sm:$0xff]  }
 0xc16   :  { %4101 = vpow2.f32 %v672_v51 }
 0xc1c   :  { %v4100_v52 = vpop.eup %4099 }
 0xc1d   :  { %v674_v53 = vsel %vm184_vm3, %v4100_v52, 0.0 }
 0xc1e   :  { %675 = vadd.xlane.f32.xlu1 %v674_v53  ;;  %v4454_v53 = vld [vmem:[%s4960_s0 + $0x10] sm:$0xff] }
 0xc20   :  { %v4102_v54 = vpop.eup %4101 }
 0xc21   :  { %v677_v55 = vsel %vm184_vm3, %v4102_v54, 0.0 }
 0xc22   :  { %678 = vadd.xlane.f32.xlu1 %v677_v55 }
 0xc33   :  { %685 = vrot.lane.b32.xlu1 %v609_v35, %s4210_s26 }
 0xcab   :  { %v676_v57 = vpop.xlane.xlu1 %675 }
 0xcac   :  { %4103 = vrcp.f32 %v676_v57  ;;  %v3363_v57 = vld [vmem:[%s4963_s3 + $0xa] ss:$0 sm:$0xff] }
 0xcaf   :  { %v679_v58 = vpop.xlane.xlu1 %678 }
 0xcb0   :  { %4105 = vrcp.f32 %v679_v58 }
 0xcb3   :  { %v686_v59 = vpop.permute.xlu1 %685 }
 0xcb4   :  { %3736 = vmatpush3.bf16.msra.mxu1 %v686_v59 }
 0xcb5   :  { %3749 = vmatprep.subr.bf16.mxu1 %v4207_v1 }
 0xcb6   :  { %v4104_v60 = vpop.eup %4103 }
 0xcb7   :  { %v682_v62 = vmul.f32 %v4104_v60, %v4100_v52  ;;  %v4038_v52 = vld [vmem:[%s4961_s1 + $0x88] sm:$0xff]  }
 0xcba   :  { %v4106_v61 = vpop.eup %4105 }
 0xcbb   :  { %v683_v63 = vmul.f32 %v4106_v61, %v4102_v54  ;;  %v4459_v54 = vld [vmem:[%s4960_s0 + $0x18] sm:$0xff] }
 0xcbc   :  { %v1066_v55 = vpack.c.bf16 %v4459_v54, %v4454_v53 }
 0xcbd   :  { %v684_v0 = vpack.c.bf16 %v683_v63, %v682_v62 }
 0xcbf   :  { %3738 = vmatmul.mubr.msk.bf16.vlgmr.msra.gmra.mrb[4].mxu1 %vm184_vm3, %v684_v0 }
 0xcc0   :  { %3753 = vmatprep.mubr.msk.bf16.mxu1 %vm4208_vm0, %v4207_v1 }
 0xd92   :  { %v725_v5 = vpop.f32.mrb[4].mxu1 }
 0xd93   :  { %v3739_v6 = vpop.f32.mrb[5].mxu1 }
 0xd94   :  { %v728_v7 = vpop.f32.mrb[6].mxu1  ;;  %v3382_v6 = vld [vmem:[%s4963_s3 + $0x12] ss:$0 sm:$0xff] }
 0xd95   :  { %v737_v8 = vpack.c.bf16 %v728_v7, %v725_v5  ;;  %v3740_v9 = vpop.f32.mrb[7].mxu1 }
 0xd97   :  { %3746 = vmatmul.mubr.msk.bf16.vlgmr.msra.gmra.mrb[28].mxu0 %vm86_vm1, %v737_v8 }
 0xd98   :  { %3761 = vmatprep.mubr.msk.bf16.mxu0 %vm4208_vm0, %v4207_v1  ;;  %3758 = vmatpush3.bf16.xpose.msra.mxu0 %v4039_v33 }
 0xd99   :  { %3759 = vmatprep.subr.bf16.mxu0 %v4207_v1 }
 0xda0   :  { %3760 = vmatpush3.bf16.xpose.msra.mxu0 %v4040_v56 }
 0xda1   :  { %3779 = vmatprep.subr.bf16.mxu0 %v4207_v1 }
 0xe6a   :  { %v792_v11 = vpop.f32.mrb[28].mxu0 }
 0xe6b   :  { %v793_v12 = vadd.f32 %v3353_v10, %v792_v11  ;;  %v3747_v13 = vpop.f32.mrb[29].mxu0 }
 0xe6c   :  { %v795_v14 = vpop.f32.mrb[30].mxu0 }
 0xe6d   :  { %v796_v15 = vadd.f32 %v3353_v10, %v795_v14  ;;  %v3748_v16 = vpop.f32.mrb[31].mxu0  ;;  %v799_v3 = vadd.f32 %v793_v12, %v4367_v24 }
 0xe6f   :  { %v801_v4 = vsel %vm86_vm1, %v799_v3, 0.0  ;;  %v800_v17 = vadd.f32 %v796_v15, %v4369_v26  ;;  %v4035_v26 = vld [vmem:[%s4961_s1 + $0x60] sm:$0xff]  }
 0xe70   :  { %802 = vadd.xlane.f32.xlu0 %v801_v4  ;;  %3750 = vmatpush3.bf16.msra.mxu1 %v4035_v26 }
 0xe71   :  { %v804_v18 = vsel %vm86_vm1, %v800_v17, 0.0  ;;  %3751 = vmatprep.subr.bf16.mxu1 %v4207_v1 }
 0xe72   :  { %805 = vadd.xlane.f32.xlu1 %v804_v18 }
 0xe74   :  { %3752 = vmatpush3.bf16.msra.mxu1 %v4036_v32 }
 0xe75   :  { %3765 = vmatprep.subr.bf16.mxu1 %v4207_v1 }
 0xefd   :  { %v803_v19 = vpop.xlane.xlu0 %802 }
 0xefe   :  { %v807_v20 = vmul.f32 0.03125, %v803_v19 }
 0xeff   :  { %v806_v21 = vpop.xlane.xlu1 %805 }
 0xf00   :  { %v809_v22 = vsub.f32 %v799_v3, %v807_v20  ;;  %v808_v27 = vmul.f32 0.03125, %v806_v21 }
 0xf02   :  { %v810_v28 = vsub.f32 %v800_v17, %v808_v27  ;;  %v811_v29 = vmul.f32 %v809_v22, %v809_v22 }
 0xf04   :  { %v813_v30 = vsel %vm86_vm1, %v811_v29, 0.0  ;;  %v812_v31 = vmul.f32 %v810_v28, %v810_v28 }
 0xf05   :  { %814 = vadd.xlane.f32.xlu0 %v813_v30 }
 0xf06   :  { %v816_v24 = vsel %vm86_vm1, %v812_v31, 0.0 }
 0xf09   :  { %817 = vadd.xlane.f32.xlu0 %v816_v24 }
 0xf92   :  { %v815_v34 = vpop.xlane.xlu0 %814 }
 0xf93   :  { %v819_v35 = vmul.f32 0.03125, %v815_v34 }
 0xf95   :  { %v821_v36 = vadd.f32 1e-05, %v819_v35 }
 0xf96   :  { %v818_v37 = vpop.xlane.xlu0 %817 }
 0xf97   :  { %4107 = vrsqrt.f32 %v821_v36  ;;  %v820_v38 = vmul.f32 0.03125, %v818_v37 }
 0xf99   :  { %v822_v39 = vadd.f32 1e-05, %v820_v38  ;;  %v3373_v38 = vld [vmem:[%s4963_s3 + $0xb] ss:$0 sm:$0xff] }
 0xf9b   :  { %4109 = vrsqrt.f32 %v822_v39 }
 0xfa1   :  { %v4108_v40 = vpop.eup %4107 }
 0xfa2   :  { %v825_v41 = vmul.f32 %v4108_v40, %v809_v22 }
 0xfa4   :  { %v832_v44 = vmul.f32 %v3357_v42, %v825_v41 }
 0xfa5   :  { %v4110_v43 = vpop.eup %4109 }
 0xfa6   :  { %v826_v45 = vmul.f32 %v4110_v43, %v810_v28  ;;  %v4436_v48 = vadd.f32 %v3358_v46, %v832_v44 }
 0xfa8   :  { %v833_v47 = vmul.f32 %v3357_v42, %v826_v45 }
 0xfaa   :  { %v4438_v49 = vadd.f32 %v3358_v46, %v833_v47 }
 0xfac   :  { %v846_v51 = vpack.c.bf16 %v4438_v49, %v4436_v48 }
 0xfae   :  { %3754 = vmatmul.mubr.msk.bf16.vlgmr.msra.gmra.mrb[8].mxu1 %vm86_vm1, %v846_v51 }
 0xfaf   :  { %3766 = vmatpush3.bf16.msra.mxu1 %v4037_v50  ;;  %3769 = vmatprep.mubr.msk.bf16.mxu1 %vm4208_vm0, %v4207_v1 }
 0xfb0   :  { %3767 = vmatprep.subr.bf16.mxu1 %v4207_v1 }
 0xfb3   :  { %3768 = vmatpush3.bf16.msra.mxu1 %v4038_v52 }
 0xfb4   :  { %3773 = vmatprep.subr.bf16.mxu1 %v4207_v1 }
 0xfb6   :  { %3770 = vmatmul.mubr.msk.bf16.vlgmr.msra.gmra.mrb[12].mxu1 %vm86_vm1, %v1066_v55 }
 0xfb7   :  { %3775 = vmatprep.mubr.msk.bf16.mxu1 %vm4208_vm0, %v4207_v1 }
0x1081   :  { %v901_v58 = vpop.f32.mrb[8].mxu1 }
0x1082   :  { %v902_v59 = vadd.f32 %v3363_v57, %v901_v58  ;;  %v3755_v60 = vpop.f32.mrb[9].mxu1 }
0x1083   :  { %v904_v61 = vpop.f32.mrb[10].mxu1 }
0x1084   :  { %v905_v62 = vadd.f32 %v3363_v57, %v904_v61  ;;  %v3756_v63 = vpop.f32.mrb[11].mxu1  ;;  %v908_v0 = vmax.f32 %v902_v59, 0.0 }
0x1086   :  { %v909_v2 = vmax.f32 %v905_v62, 0.0 }
0x1088   :  { %v915_v5 = vpack.c.bf16 %v909_v2, %v908_v0  ;;  %v4041_v2 = vld [vmem:[%s4961_s1 + $0x90] sm:$0xff]  }
0x1089   :  { %v1121_v7 = vpop.f32.mrb[12].mxu1 }
0x108a   :  { %3762 = vmatmul.mubr.bf16.vlgmr.msra.gmra.mrb[32].mxu0 %v915_v5  ;;  %v3771_v8 = vpop.f32.mrb[13].mxu1  ;;  %v1122_v10 = vadd.f32 %v3382_v6, %v1121_v7  ;;  %v4042_v5 = vld [vmem:[%s4961_s1 + $0x98] sm:$0xff]  }
0x108b   :  { %v1124_v9 = vpop.f32.mrb[14].mxu1  ;;  %3781 = vmatprep.mubr.msk.bf16.mxu0 %vm4208_vm0, %v4207_v1 }
0x108c   :  { %v1125_v11 = vadd.f32 %v3382_v6, %v1124_v9  ;;  %v3772_v12 = vpop.f32.mrb[15].mxu1 }
0x108e   :  { %v1128_v13 = vpack.c.bf16 %v1125_v11, %v1122_v10 }
0x1090   :  { %1130 = vrot.lane.b32.xlu0 %v1128_v13, %s4209_s25 }
0x1102   :  { %v1131_v14 = vpop.permute.xlu0 %1130 }
0x1103   :  { %v1136_v15 = vsel %vm86_vm1, %v1131_v14, 0 }
0x1104   :  { %3774 = vmatpush3.bf16.xpose.msra.mxu1 %v1136_v15  ;;  %v3375_v15 = vld [vmem:[%s4963_s3 + $0xf] ss:$0 sm:$0xff] }
0x1105   :  { %3785 = vmatprep.subr.bf16.mxu1 %v4207_v1 }
0x110b   :  { %3776 = vmatmul.mubr.msk.bf16.vlgmr.msra.gmra.mrb[16].mxu1 %vm86_vm1, %v1128_v13 }
0x110c   :  { %3789 = vmatprep.mubr.msk.bf16.mxu1 %vm4208_vm0, %v4207_v1  ;;  %3786 = vmatpush3.bf16.msra.mxu1 %v4041_v2 }
0x110d   :  { %3787 = vmatprep.subr.bf16.mxu1 %v4207_v1 }
0x1110   :  { %3788 = vmatpush3.bf16.msra.mxu1 %v4042_v5 }
0x1111   :  { %3801 = vmatprep.subr.bf16.mxu1 %v4207_v1 }
0x115d   :  { %v962_v16 = vpop.f32.mrb[32].mxu0 }
0x115e   :  { %v3763_v3 = vpop.f32.mrb[33].mxu0  ;;  %v969_v42 = vadd.f32 %v962_v16, %v4436_v48 }
0x115f   :  { %v965_v4 = vpop.f32.mrb[34].mxu0 }
0x1160   :  { %v3764_v17 = vpop.f32.mrb[35].mxu0  ;;  %v970_v35 = vadd.f32 %v965_v4, %v4438_v49  ;;  %v976_v43 = vadd.f32 %v3373_v38, %v969_v42 }
0x1162   :  { %v977_v40 = vadd.f32 %v3373_v38, %v970_v35  ;;  %v978_v44 = vsel %vm86_vm1, %v976_v43, 0.0 }
0x1164   :  { %v981_v41 = vsel %vm86_vm1, %v977_v40, 0.0 }
0x11de   :  { %v1172_v18 = vpop.f32.mrb[16].mxu1 }
0x11df   :  { %v1179_v19 = vsel %vm4275_vm2, %v1172_v18, -1e+30  ;;  %v3777_v20 = vpop.f32.mrb[17].mxu1 }
0x11e0   :  { %v1175_v21 = vpop.f32.mrb[18].mxu1  ;;  %v1181_v22 = vsel %vm184_vm3, %v1179_v19, -inf }
0x11e1   :  { %v1180_v27 = vsel %vm4279_vm4, %v1175_v21, -1e+30  ;;  %1182 = vmax.xlane.f32.xlu1 %v1181_v22  ;;  %v3778_v28 = vpop.f32.mrb[19].mxu1 }
0x11e2   :  { %v1184_v29 = vsel %vm184_vm3, %v1180_v27, -inf }
0x11e5   :  { %1185 = vmax.xlane.f32.xlu1 %v1184_v29 }
0x126e   :  { %v1183_v30 = vpop.xlane.xlu1 %1182 }
0x126f   :  { %v1187_v31 = vsub.f32 %v1179_v19, %v1183_v30 }
0x1271   :  { %v1189_v24 = vmul.f32 1.442695, %v1187_v31 }
0x1272   :  { %v1186_v26 = vpop.xlane.xlu1 %1185 }
0x1273   :  { %4111 = vpow2.f32 %v1189_v24  ;;  %v1188_v32 = vsub.f32 %v1180_v27, %v1186_v26 }
0x1275   :  { %v1191_v33 = vmul.f32 1.442695, %v1188_v32  ;;  %v3392_v32 = vld [vmem:[%s4963_s3 + $0x13] ss:$0 sm:$0xff] }
0x1277   :  { %4113 = vpow2.f32 %v1191_v33 }
0x127d   :  { %v4112_v34 = vpop.eup %4111 }
0x127e   :  { %v1193_v36 = vsel %vm184_vm3, %v4112_v34, 0.0 }
0x127f   :  { %1194 = vadd.xlane.f32.xlu1 %v1193_v36 }
0x1281   :  { %v4114_v37 = vpop.eup %4113 }
0x1282   :  { %v1196_v39 = vsel %vm184_vm3, %v4114_v37, 0.0 }
0x1283   :  { %1197 = vadd.xlane.f32.xlu0 %v1196_v39 }
0x1287   :  { %982 = vadd.xlane.f32.xlu0 %v981_v41 }
0x1290   :  { %1204 = vrot.lane.b32.xlu1 %v1128_v13, %s4210_s26  ;;  %v3374_v13 = vld [vmem:[%s4963_s3 + $0xe] ss:$0 sm:$0xff] }
0x12b4   :  { %979 = vadd.xlane.f32.xlu1 %v978_v44 }
0x130c   :  { %v1195_v45 = vpop.xlane.xlu1 %1194 }
0x130d   :  { %4115 = vrcp.f32 %v1195_v45 }
0x1310   :  { %v1198_v46 = vpop.xlane.xlu0 %1197  ;;  %v1205_v47 = vpop.permute.xlu1 %1204 }
0x1311   :  { %4117 = vrcp.f32 %v1198_v46  ;;  %3780 = vmatpush3.bf16.msra.mxu0 %v1205_v47 }
0x1312   :  { %3793 = vmatprep.subr.bf16.mxu0 %v4207_v1 }
0x1314   :  { %v983_v48 = vpop.xlane.xlu0 %982 }
0x1315   :  { %v985_v56 = vmul.f32 0.03125, %v983_v48 }
0x1317   :  { %v4116_v49 = vpop.eup %4115  ;;  %v987_v59 = vsub.f32 %v977_v40, %v985_v56 }
0x1318   :  { %v1201_v51 = vmul.f32 %v4116_v49, %v4112_v34 }
0x1319   :  { %v989_v63 = vmul.f32 %v987_v59, %v987_v59 }
0x131b   :  { %v4118_v50 = vpop.eup %4117  ;;  %v993_v0 = vsel %vm86_vm1, %v989_v63, 0.0 }
0x131c   :  { %v1202_v52 = vmul.f32 %v4118_v50, %v4114_v37 }
0x131e   :  { %v1203_v55 = vpack.c.bf16 %v1202_v52, %v1201_v51 }
0x1320   :  { %3782 = vmatmul.mubr.msk.bf16.vlgmr.msra.gmra.mrb[36].mxu0 %vm184_vm3, %v1203_v55 }
0x1321   :  { %3797 = vmatprep.mubr.msk.bf16.mxu0 %vm4208_vm0, %v4207_v1 }
0x1341   :  { %v980_v57 = vpop.xlane.xlu1 %979 }
0x1342   :  { %v984_v58 = vmul.f32 0.03125, %v980_v57 }
0x1344   :  { %v986_v60 = vsub.f32 %v976_v43, %v984_v58 }
0x1346   :  { %v988_v61 = vmul.f32 %v986_v60, %v986_v60 }
0x1348   :  { %v990_v62 = vsel %vm86_vm1, %v988_v61, 0.0 }
0x1349   :  { %991 = vadd.xlane.f32.xlu0 %v990_v62 }
0x134d   :  { %994 = vadd.xlane.f32.xlu0 %v993_v0 }
0x13d6   :  { %v992_v6 = vpop.xlane.xlu0 %991 }
0x13d7   :  { %v996_v7 = vmul.f32 0.03125, %v992_v6 }
0x13d9   :  { %v998_v8 = vadd.f32 1e-05, %v996_v7 }
0x13da   :  { %v995_v9 = vpop.xlane.xlu0 %994 }
0x13db   :  { %4119 = vrsqrt.f32 %v998_v8  ;;  %v997_v10 = vmul.f32 0.03125, %v995_v9  ;;  %v3376_v8 = vld [vmem:[%s4963_s3 + $0x10] ss:$0 sm:$0xff] }
0x13dd   :  { %v999_v11 = vadd.f32 1e-05, %v997_v10 }
0x13df   :  { %4121 = vrsqrt.f32 %v999_v11 }
0x13e5   :  { %v4120_v12 = vpop.eup %4119 }
0x13e6   :  { %v1002_v14 = vmul.f32 %v4120_v12, %v986_v60 }
0x13e8   :  { %v1009_v16 = vmul.f32 %v3374_v13, %v1002_v14 }
0x13e9   :  { %v4122_v3 = vpop.eup %4121 }
0x13ea   :  { %v1016_v4 = vadd.f32 %v3375_v15, %v1009_v16  ;;  %v1003_v17 = vmul.f32 %v4122_v3, %v987_v59 }
0x13ec   :  { %v1018_v18 = vsel %vm86_vm1, %v1016_v4, 0.0  ;;  %v1010_v19 = vmul.f32 %v3374_v13, %v1003_v17  ;;  %v3377_v13 = vld [vmem:[%s4963_s3 + $0x11] ss:$0 sm:$0xff]  ;;  %v4046_v17 = vld [vmem:[%s4961_s1 + $0xa8] sm:$0xff]  }
0x13ed   :  { %1019 = vadd.xlane.f32.xlu0 %v1018_v18 }
0x13ee   :  { %v1017_v20 = vadd.f32 %v3375_v15, %v1010_v19 }
0x13f0   :  { %v1021_v21 = vsel %vm86_vm1, %v1017_v20, 0.0 }
0x13f1   :  { %1022 = vadd.xlane.f32.xlu0 %v1021_v21 }
0x13f3   :  { %v1244_v22 = vpop.f32.mrb[36].mxu0 }
0x13f4   :  { %v3783_v27 = vpop.f32.mrb[37].mxu0 }
0x13f5   :  { %v1247_v28 = vpop.f32.mrb[38].mxu0 }
0x13f6   :  { %v1256_v29 = vpack.c.bf16 %v1247_v28, %v1244_v22  ;;  %v3784_v30 = vpop.f32.mrb[39].mxu0 }
0x13f8   :  { %3790 = vmatmul.mubr.msk.bf16.vlgmr.msra.gmra.mrb[20].mxu1 %vm86_vm1, %v1256_v29  ;;  %v3396_v29 = vld [vmem:[%s4963_s3 + $0x19] ss:$0 sm:$0xff] }
0x13f9   :  { %3805 = vmatprep.mubr.msk.bf16.mxu1 %vm4208_vm0, %v4207_v1 }
0x147a   :  { %v1020_v31 = vpop.xlane.xlu0 %1019 }
0x147b   :  { %v1024_v26 = vmul.f32 0.03125, %v1020_v31 }
0x147d   :  { %v1026_v35 = vsub.f32 %v1016_v4, %v1024_v26  ;;  %v4045_v4 = vld [vmem:[%s4961_s1 + $0xa0] sm:$0xff]  }
0x147e   :  { %v1023_v24 = vpop.xlane.xlu0 %1022  ;;  %3794 = vmatpush3.bf16.msra.mxu0 %v4045_v4 }
0x147f   :  { %v1025_v33 = vmul.f32 0.03125, %v1023_v24  ;;  %v1028_v45 = vmul.f32 %v1026_v35, %v1026_v35  ;;  %3795 = vmatprep.subr.bf16.mxu0 %v4207_v1 }
0x1481   :  { %v1027_v39 = vsub.f32 %v1017_v20, %v1025_v33  ;;  %v1030_v49 = vsel %vm86_vm1, %v1028_v45, 0.0 }
0x1482   :  { %3796 = vmatpush3.bf16.msra.mxu0 %v4046_v17 }
0x1483   :  { %v1029_v47 = vmul.f32 %v1027_v39, %v1027_v39  ;;  %3809 = vmatprep.subr.bf16.mxu0 %v4207_v1 }
0x1485   :  { %v1033_v50 = vsel %vm86_vm1, %v1029_v47, 0.0 }
0x14cb   :  { %v1311_v34 = vpop.f32.mrb[20].mxu1 }
0x14cc   :  { %v1312_v36 = vadd.f32 %v3392_v32, %v1311_v34  ;;  %v3791_v37 = vpop.f32.mrb[21].mxu1 }
0x14cd   :  { %v1314_v38 = vpop.f32.mrb[22].mxu1  ;;  %v3410_v37 = vld [vmem:[%s4963_s3 + $0x15] ss:$0 sm:$0xff] }
0x14ce   :  { %v1315_v40 = vadd.f32 %v3392_v32, %v1314_v38  ;;  %v3792_v41 = vpop.f32.mrb[23].mxu1  ;;  %v1318_v42 = vadd.f32 %v1312_v36, %v4454_v53  ;;  %v4043_v53 = vld [vmem:[%s4961_s1 + $0xb0] sm:$0xff]   ;;  %v3397_v32 = vld [vmem:[%s4963_s3 + $0x1a] ss:$0 sm:$0xff] }
0x14cf   :  { %3802 = vmatpush3.bf16.msra.mxu1 %v4043_v53 }
0x14d0   :  { %v1320_v43 = vsel %vm86_vm1, %v1318_v42, 0.0  ;;  %v1319_v44 = vadd.f32 %v1315_v40, %v4459_v54  ;;  %3803 = vmatprep.subr.bf16.mxu1 %v4207_v1  ;;  %v4044_v54 = vld [vmem:[%s4961_s1 + $0xb8] sm:$0xff]  }
0x14d1   :  { %1321 = vadd.xlane.f32.xlu0 %v1320_v43 }
0x14d2   :  { %v1323_v46 = vsel %vm86_vm1, %v1319_v44, 0.0 }
0x14d3   :  { %1324 = vadd.xlane.f32.xlu1 %v1323_v46  ;;  %3804 = vmatpush3.bf16.msra.mxu1 %v4044_v54  ;;  %v3402_v46 = vld [vmem:[%s4963_s3 + $0x14] ss:$0 sm:$0xff] }
0x14d4   :  { %3815 = vmatprep.subr.bf16.mxu1 %v4207_v1 }
0x14d5   :  { %1031 = vadd.xlane.f32.xlu0 %v1030_v49 }
0x14d7   :  { %1034 = vadd.xlane.f32.xlu1 %v1033_v50 }
0x155e   :  { %v1322_v51 = vpop.xlane.xlu0 %1321 }
0x155f   :  { %v1326_v52 = vmul.f32 0.03125, %v1322_v51 }
0x1560   :  { %v1325_v55 = vpop.xlane.xlu1 %1324 }
0x1561   :  { %v1328_v48 = vsub.f32 %v1318_v42, %v1326_v52  ;;  %v1327_v56 = vmul.f32 0.03125, %v1325_v55 }
0x1562   :  { %v1032_v57 = vpop.xlane.xlu0 %1031 }
0x1563   :  { %v1329_v58 = vsub.f32 %v1319_v44, %v1327_v56  ;;  %v1036_v59 = vmul.f32 0.03125, %v1032_v57  ;;  %v1330_v60 = vmul.f32 %v1328_v48, %v1328_v48 }
0x1564   :  { %v1035_v61 = vpop.xlane.xlu1 %1034 }
0x1565   :  { %v1038_v62 = vadd.f32 1e-05, %v1036_v59  ;;  %v1037_v63 = vmul.f32 0.03125, %v1035_v61  ;;  %v1332_v0 = vsel %vm86_vm1, %v1330_v60, 0.0  ;;  %v1331_v2 = vmul.f32 %v1329_v58, %v1329_v58 }
0x1566   :  { %1333 = vadd.xlane.f32.xlu0 %v1332_v0 }
0x1567   :  { %4123 = vrsqrt.f32 %v1038_v62  ;;  %v1039_v5 = vadd.f32 1e-05, %v1037_v63  ;;  %v1335_v6 = vsel %vm86_vm1, %v1331_v2, 0.0 }
0x1568   :  { %1336 = vadd.xlane.f32.xlu1 %v1335_v6 }
0x1569   :  { %4125 = vrsqrt.f32 %v1039_v5 }
0x1571   :  { %v4124_v7 = vpop.eup %4123 }
0x1572   :  { %v1042_v9 = vmul.f32 %v4124_v7, %v1026_v35 }
0x1573   :  { %v4126_v10 = vpop.eup %4125 }
0x1574   :  { %v1049_v11 = vmul.f32 %v3376_v8, %v1042_v9  ;;  %v1043_v12 = vmul.f32 %v4126_v10, %v1027_v39 }
0x1576   :  { %v1050_v14 = vmul.f32 %v3376_v8, %v1043_v12  ;;  %v1056_v15 = vadd.f32 %v3377_v13, %v1049_v11  ;;  %v4047_v11 = vld [vmem:[%s4961_s1 + $0xc0] sm:$0xff]  }
0x1578   :  { %v1057_v16 = vadd.f32 %v3377_v13, %v1050_v14 }
0x157a   :  { %v4552_v3 = vpack.c.bf16 %v1057_v16, %v1056_v15 }
0x157c   :  { %3806 = vmatmul.mubr.msk.bf16.vlgmr.msra.gmra.mrb[24].mxu1 %vm86_vm1, %v4552_v3 }
0x157d   :  { %3817 = vmatprep.mubr.msk.bf16.mxu1 %vm4208_vm0, %v4207_v1 }
0x15f3   :  { %v1334_v18 = vpop.xlane.xlu0 %1333 }
0x15f4   :  { %v1338_v19 = vmul.f32 0.03125, %v1334_v18 }
0x15f5   :  { %v1337_v20 = vpop.xlane.xlu1 %1336 }
0x15f6   :  { %v1340_v21 = vadd.f32 1e-05, %v1338_v19  ;;  %v1339_v22 = vmul.f32 0.03125, %v1337_v20  ;;  %v4048_v19 = vld [vmem:[%s4961_s1 + $0xc8] sm:$0xff]  }
0x15f8   :  { %4127 = vrsqrt.f32 %v1340_v21  ;;  %v1341_v27 = vadd.f32 1e-05, %v1339_v22 }
0x15fa   :  { %4129 = vrsqrt.f32 %v1341_v27 }
0x1602   :  { %v4128_v28 = vpop.eup %4127 }
0x1603   :  { %v1344_v30 = vmul.f32 %v4128_v28, %v1328_v48 }
0x1604   :  { %v4130_v31 = vpop.eup %4129 }
0x1605   :  { %v1351_v24 = vmul.f32 %v3396_v29, %v1344_v30  ;;  %v1345_v26 = vmul.f32 %v4130_v31, %v1329_v58 }
0x1607   :  { %v1352_v33 = vmul.f32 %v3396_v29, %v1345_v26  ;;  %v4572_v34 = vadd.f32 %v3397_v32, %v1351_v24  ;;  %v3420_v29 = vld [vmem:[%s4963_s3 + $0x16] ss:$0 sm:$0xff] }
0x1609   :  { %v4574_v35 = vadd.f32 %v3397_v32, %v1352_v33 }
0x160b   :  { %v1365_v36 = vpack.c.bf16 %v4574_v35, %v4572_v34 }
0x160d   :  { %3798 = vmatmul.mubr.msk.bf16.vlgmr.msra.gmra.mrb[40].mxu0 %vm86_vm1, %v1365_v36 }
0x160e   :  { %3811 = vmatprep.mubr.msk.bf16.mxu0 %vm4208_vm0, %v4207_v1 }
0x164f   :  { %v1486_v38 = vpop.f32.mrb[24].mxu1 }
0x1650   :  { %v3807_v39 = vpop.f32.mrb[25].mxu1  ;;  %v1487_v41 = vadd.f32 %v3410_v37, %v1486_v38 }
0x1651   :  { %v1489_v40 = vpop.f32.mrb[26].mxu1 }
0x1652   :  { %v1490_v42 = vadd.f32 %v3410_v37, %v1489_v40  ;;  %v3808_v43 = vpop.f32.mrb[27].mxu1 }
0x1654   :  { %v1494_v44 = vpack.c.bf16 %v1490_v42, %v1487_v41 }
0x1656   :  { %v1499_v45 = vsel %vm86_vm1, %v1494_v44, 0 }
0x1657   :  { %3810 = vmatpush3.bf16.xpose.msra.mxu0 %v1499_v45 }
0x1658   :  { %3821 = vmatprep.subr.bf16.mxu0 %v4207_v1 }
0x16e0   :  { %v1420_v47 = vpop.f32.mrb[40].mxu0 }
0x16e1   :  { %v3799_v49 = vpop.f32.mrb[41].mxu0  ;;  %v1421_v53 = vadd.f32 %v3402_v46, %v1420_v47 }
0x16e2   :  { %v1423_v50 = vpop.f32.mrb[42].mxu0 }
0x16e3   :  { %v1424_v54 = vadd.f32 %v3402_v46, %v1423_v50  ;;  %v3800_v51 = vpop.f32.mrb[43].mxu0  ;;  %v4050_v50 = vld [vmem:[%s4961_s1 + $0xd8] sm:$0xff]  }
0x16e5   :  { %v1493_v52 = vpack.c.bf16 %v1424_v54, %v1421_v53  ;;  %v4051_v53 = vld [vmem:[%s4961_s1 + $0xe0] sm:$0xff]  }
0x16e7   :  { %3812 = vmatmul.mubr.msk.bf16.vlgmr.msra.gmra.mrb[44].mxu0 %vm86_vm1, %v1493_v52 }
0x16e8   :  { %3825 = vmatprep.mubr.msk.bf16.mxu0 %vm4208_vm0, %v4207_v1  ;;  %3822 = vmatpush3.bf16.msra.mxu0 %v4047_v11 }
0x16e9   :  { %3823 = vmatprep.subr.bf16.mxu0 %v4207_v1 }
0x16ec   :  { %3824 = vmatpush3.bf16.msra.mxu0 %v4048_v19 }
0x16ed   :  { %3837 = vmatprep.subr.bf16.mxu0 %v4207_v1 }
0x17ba   :  { %v1535_v55 = vpop.f32.mrb[44].mxu0 }
0x17bb   :  { %v1542_v48 = vsel %vm4275_vm2, %v1535_v55, -1e+30  ;;  %v3813_v56 = vpop.f32.mrb[45].mxu0 }
0x17bc   :  { %v1538_v57 = vpop.f32.mrb[46].mxu0  ;;  %v1544_v58 = vsel %vm184_vm3, %v1542_v48, -inf }
0x17bd   :  { %v1543_v59 = vsel %vm4279_vm4, %v1538_v57, -1e+30  ;;  %1545 = vmax.xlane.f32.xlu0 %v1544_v58  ;;  %v3814_v60 = vpop.f32.mrb[47].mxu0 }
0x17be   :  { %v1547_v61 = vsel %vm184_vm3, %v1543_v59, -inf }
0x17bf   :  { %1548 = vmax.xlane.f32.xlu1 %v1547_v61 }
0x184a   :  { %v1546_v62 = vpop.xlane.xlu0 %1545 }
0x184b   :  { %v1550_v63 = vsub.f32 %v1542_v48, %v1546_v62 }
0x184c   :  { %v1549_v0 = vpop.xlane.xlu1 %1548 }
0x184d   :  { %v1552_v2 = vmul.f32 1.442695, %v1550_v63  ;;  %v1551_v5 = vsub.f32 %v1543_v59, %v1549_v0  ;;  %v3424_v59 = vld [vmem:[%s4963_s3 + $0x1b] ss:$0 sm:$0xff]  ;;  %v3425_v63 = vld [vmem:[%s4963_s3 + $0x1c] ss:$0 sm:$0xff] }
0x184f   :  { %4131 = vpow2.f32 %v1552_v2  ;;  %v1554_v6 = vmul.f32 1.442695, %v1551_v5 }
0x1851   :  { %4133 = vpow2.f32 %v1554_v6 }
0x1859   :  { %v4132_v7 = vpop.eup %4131 }
0x185a   :  { %v1556_v8 = vsel %vm184_vm3, %v4132_v7, 0.0 }
0x185b   :  { %v4134_v9 = vpop.eup %4133  ;;  %1557 = vadd.xlane.f32.xlu0 %v1556_v8  ;;  %v3430_v8 = vld [vmem:[%s4963_s3 + $0x17] ss:$0 sm:$0xff] }
0x185c   :  { %v1559_v10 = vsel %vm184_vm3, %v4134_v9, 0.0 }
0x185d   :  { %1560 = vadd.xlane.f32.xlu1 %v1559_v10 }
0x1871   :  { %1568 = vrot.lane.b32.xlu0 %v1494_v44, %s4209_s25 }
0x18e8   :  { %v1558_v12 = vpop.xlane.xlu0 %1557 }
0x18e9   :  { %4135 = vrcp.f32 %v1558_v12 }
0x18ea   :  { %v1561_v13 = vpop.xlane.xlu1 %1560 }
0x18eb   :  { %4137 = vrcp.f32 %v1561_v13 }
0x18ec   :  { %v1569_v14 = vpop.permute.xlu0 %1568 }
0x18ed   :  { %3816 = vmatpush3.bf16.msra.mxu1 %v1569_v14 }
0x18ee   :  { %3829 = vmatprep.subr.bf16.mxu1 %v4207_v1 }
0x18f3   :  { %v4136_v15 = vpop.eup %4135 }
0x18f4   :  { %v1564_v4 = vmul.f32 %v4136_v15, %v4132_v7  ;;  %v4052_v7 = vld [vmem:[%s4961_s1 + $0xe8] sm:$0xff]  }
0x18f5   :  { %v4138_v16 = vpop.eup %4137 }
0x18f6   :  { %v1565_v17 = vmul.f32 %v4138_v16, %v4134_v9 }
0x18f8   :  { %v1566_v18 = vpack.c.bf16 %v1565_v17, %v1564_v4 }
0x18fa   :  { %3818 = vmatmul.mubr.msk.bf16.vlgmr.msra.gmra.mrb[28].mxu1 %vm184_vm3, %v1566_v18  ;;  %v3440_v18 = vld [vmem:[%s4963_s3 + $0x18] ss:$0 sm:$0xff] }
0x18fb   :  { %3833 = vmatprep.mubr.msk.bf16.mxu1 %vm4208_vm0, %v4207_v1 }
0x19cd   :  { %v1608_v20 = vpop.f32.mrb[28].mxu1 }
0x19ce   :  { %v3819_v21 = vpop.f32.mrb[29].mxu1 }
0x19cf   :  { %v1611_v22 = vpop.f32.mrb[30].mxu1 }
0x19d0   :  { %v1620_v27 = vpack.c.bf16 %v1611_v22, %v1608_v20  ;;  %v3820_v28 = vpop.f32.mrb[31].mxu1 }
0x19d2   :  { %3826 = vmatmul.mubr.msk.bf16.vlgmr.msra.gmra.mrb[48].mxu0 %vm86_vm1, %v1620_v27 }
0x19d3   :  { %3841 = vmatprep.mubr.msk.bf16.mxu0 %vm4208_vm0, %v4207_v1  ;;  %3838 = vmatpush3.bf16.xpose.msra.mxu0 %v4051_v53  ;;  %v3441_v53 = vld [vmem:[%s4963_s3 + $0x1d] ss:$0 sm:$0xff] }
0x19d4   :  { %3839 = vmatprep.subr.bf16.mxu0 %v4207_v1 }
0x19db   :  { %3840 = vmatpush3.bf16.xpose.msra.mxu0 %v4052_v7 }
0x19dc   :  { %3859 = vmatprep.subr.bf16.mxu0 %v4207_v1 }
0x1aa5   :  { %v1675_v30 = vpop.f32.mrb[48].mxu0 }
0x1aa6   :  { %v1676_v31 = vadd.f32 %v3420_v29, %v1675_v30  ;;  %v3827_v24 = vpop.f32.mrb[49].mxu0 }
0x1aa7   :  { %v1678_v26 = vpop.f32.mrb[50].mxu0 }
0x1aa8   :  { %v1679_v32 = vadd.f32 %v3420_v29, %v1678_v26  ;;  %v3828_v33 = vpop.f32.mrb[51].mxu0  ;;  %v1682_v36 = vadd.f32 %v1676_v31, %v4572_v34 }
0x1aaa   :  { %v1684_v37 = vsel %vm86_vm1, %v1682_v36, 0.0  ;;  %v1683_v38 = vadd.f32 %v1679_v32, %v4574_v35  ;;  %v4049_v35 = vld [vmem:[%s4961_s1 + $0xd0] sm:$0xff]  }
0x1aab   :  { %1685 = vadd.xlane.f32.xlu1 %v1684_v37  ;;  %3830 = vmatpush3.bf16.msra.mxu1 %v4049_v35 }
0x1aac   :  { %v1687_v39 = vsel %vm86_vm1, %v1683_v38, 0.0  ;;  %3831 = vmatprep.subr.bf16.mxu1 %v4207_v1 }
0x1aaf   :  { %1688 = vadd.xlane.f32.xlu1 %v1687_v39  ;;  %3832 = vmatpush3.bf16.msra.mxu1 %v4050_v50 }
0x1ab0   :  { %3845 = vmatprep.subr.bf16.mxu1 %v4207_v1 }
0x1b38   :  { %v1686_v40 = vpop.xlane.xlu1 %1685 }
0x1b39   :  { %v1690_v41 = vmul.f32 0.03125, %v1686_v40 }
0x1b3b   :  { %v1692_v42 = vsub.f32 %v1682_v36, %v1690_v41 }
0x1b3c   :  { %v1689_v43 = vpop.xlane.xlu1 %1688 }
0x1b3d   :  { %v1691_v44 = vmul.f32 0.03125, %v1689_v43  ;;  %v1694_v45 = vmul.f32 %v1692_v42, %v1692_v42  ;;  %v4054_v43 = vld [vmem:[%s4961_s1 + $0xf8] sm:$0xff]  }
0x1b3f   :  { %v1693_v46 = vsub.f32 %v1683_v38, %v1691_v44  ;;  %v1696_v47 = vsel %vm86_vm1, %v1694_v45, 0.0 }
0x1b40   :  { %1697 = vadd.xlane.f32.xlu1 %v1696_v47 }
0x1b41   :  { %v1695_v49 = vmul.f32 %v1693_v46, %v1693_v46 }
0x1b43   :  { %v1699_v34 = vsel %vm86_vm1, %v1695_v49, 0.0 }
0x1b44   :  { %1700 = vadd.xlane.f32.xlu1 %v1699_v34 }
0x1bcd   :  { %v1698_v54 = vpop.xlane.xlu1 %1697 }
0x1bce   :  { %v1702_v51 = vmul.f32 0.03125, %v1698_v54 }
0x1bd0   :  { %v1704_v52 = vadd.f32 1e-05, %v1702_v51 }
0x1bd1   :  { %v1701_v55 = vpop.xlane.xlu1 %1700 }
0x1bd2   :  { %4139 = vrsqrt.f32 %v1704_v52  ;;  %v1703_v48 = vmul.f32 0.03125, %v1701_v55  ;;  %v3442_v55 = vld [vmem:[%s4963_s3 + $0x1e] ss:$0 sm:$0xff] }
0x1bd4   :  { %v1705_v56 = vadd.f32 1e-05, %v1703_v48 }
0x1bd6   :  { %4141 = vrsqrt.f32 %v1705_v56 }
0x1bdc   :  { %v4140_v57 = vpop.eup %4139 }
0x1bdd   :  { %v1708_v58 = vmul.f32 %v4140_v57, %v1692_v42  ;;  %v4053_v42 = vld [vmem:[%s4961_s1 + $0xf0] sm:$0xff]  }
0x1bdf   :  { %v1715_v61 = vmul.f32 %v3424_v59, %v1708_v58 }
0x1be0   :  { %v4142_v60 = vpop.eup %4141 }
0x1be1   :  { %v1709_v62 = vmul.f32 %v4142_v60, %v1693_v46  ;;  %v1722_v2 = vadd.f32 %v3425_v63, %v1715_v61 }
0x1be3   :  { %v1716_v0 = vmul.f32 %v3424_v59, %v1709_v62  ;;  %v3447_v59 = vld [vmem:[%s4963_s3 + $0x1f] ss:$0 sm:$0xff] }
0x1be5   :  { %v1723_v5 = vadd.f32 %v3425_v63, %v1716_v0 }
0x1be7   :  { %v1729_v6 = vpack.c.bf16 %v1723_v5, %v1722_v2 }
0x1be9   :  { %3834 = vmatmul.mubr.msk.bf16.vlgmr.msra.gmra.mrb[32].mxu1 %vm86_vm1, %v1729_v6 }
0x1bea   :  { %3849 = vmatprep.mubr.msk.bf16.mxu1 %vm4208_vm0, %v4207_v1  ;;  %3846 = vmatpush3.bf16.msra.mxu1 %v4053_v42  ;;  %v4057_v42 = vld [vmem:[%s4961_s1 + $0x120] sm:$0xff]  }
0x1beb   :  { %3847 = vmatprep.subr.bf16.mxu1 %v4207_v1 }
0x1bee   :  { %3848 = vmatpush3.bf16.msra.mxu1 %v4054_v43 }
0x1bef   :  { %3853 = vmatprep.subr.bf16.mxu1 %v4207_v1 }
0x1cbc   :  { %v1784_v9 = vpop.f32.mrb[32].mxu1 }
0x1cbd   :  { %v1785_v10 = vadd.f32 %v3430_v8, %v1784_v9  ;;  %v3835_v11 = vpop.f32.mrb[33].mxu1 }
0x1cbe   :  { %v1787_v12 = vpop.f32.mrb[34].mxu1 }
0x1cbf   :  { %v1788_v13 = vadd.f32 %v3430_v8, %v1787_v12  ;;  %v3836_v14 = vpop.f32.mrb[35].mxu1  ;;  %v1791_v15 = vmax.f32 %v1785_v10, 0.0 }
0x1cc1   :  { %v1792_v16 = vmax.f32 %v1788_v13, 0.0 }
0x1cc3   :  { %v1798_v4 = vpack.c.bf16 %v1792_v16, %v1791_v15 }
0x1cc5   :  { %3842 = vmatmul.mubr.bf16.vlgmr.msra.gmra.mrb[52].mxu0 %v1798_v4 }
0x1cc6   :  { %3861 = vmatprep.mubr.msk.bf16.mxu0 %vm4208_vm0, %v4207_v1 }
0x1d98   :  { %v1845_v17 = vpop.f32.mrb[52].mxu0 }
0x1d99   :  { %v1852_v19 = vadd.f32 %v1845_v17, %v1722_v2  ;;  %v3843_v20 = vpop.f32.mrb[53].mxu0 }
0x1d9a   :  { %v1848_v21 = vpop.f32.mrb[54].mxu0 }
0x1d9b   :  { %v1853_v22 = vadd.f32 %v1848_v21, %v1723_v5  ;;  %v3844_v27 = vpop.f32.mrb[55].mxu0  ;;  %v1859_v28 = vadd.f32 %v3440_v18, %v1852_v19 }
0x1d9d   :  { %v1861_v29 = vsel %vm86_vm1, %v1859_v28, 0.0  ;;  %v1860_v30 = vadd.f32 %v3440_v18, %v1853_v22 }
0x1d9e   :  { %1862 = vadd.xlane.f32.xlu1 %v1861_v29  ;;  %v4055_v29 = vld [vmem:[%s4961_s1 + $0x100] sm:$0xff]  }
0x1d9f   :  { %v1864_v31 = vsel %vm86_vm1, %v1860_v30, 0.0 }
0x1da0   :  { %1865 = vadd.xlane.f32.xlu0 %v1864_v31 }
0x1e2b   :  { %v1863_v24 = vpop.xlane.xlu1 %1862 }
0x1e2c   :  { %v1867_v26 = vmul.f32 0.03125, %v1863_v24 }
0x1e2d   :  { %v1866_v32 = vpop.xlane.xlu0 %1865 }
0x1e2e   :  { %v1869_v33 = vsub.f32 %v1859_v28, %v1867_v26  ;;  %v1868_v36 = vmul.f32 0.03125, %v1866_v32 }
0x1e30   :  { %v1870_v37 = vsub.f32 %v1860_v30, %v1868_v36  ;;  %v1871_v38 = vmul.f32 %v1869_v33, %v1869_v33 }
0x1e32   :  { %v1873_v39 = vsel %vm86_vm1, %v1871_v38, 0.0  ;;  %v1872_v40 = vmul.f32 %v1870_v37, %v1870_v37  ;;  %v4056_v38 = vld [vmem:[%s4961_s1 + $0x108] sm:$0xff]  }
0x1e33   :  { %1874 = vadd.xlane.f32.xlu1 %v1873_v39 }
0x1e34   :  { %v1876_v41 = vsel %vm86_vm1, %v1872_v40, 0.0 }
0x1e37   :  { %1877 = vadd.xlane.f32.xlu1 %v1876_v41 }
0x1ec0   :  { %v1875_v44 = vpop.xlane.xlu1 %1874 }
0x1ec1   :  { %v1879_v45 = vmul.f32 0.03125, %v1875_v44 }
0x1ec3   :  { %v1881_v46 = vadd.f32 1e-05, %v1879_v45  ;;  %v4058_v45 = vld [vmem:[%s4961_s1 + $0x128] sm:$0xff]  }
0x1ec4   :  { %v1878_v47 = vpop.xlane.xlu1 %1877 }
0x1ec5   :  { %4143 = vrsqrt.f32 %v1881_v46  ;;  %v1880_v49 = vmul.f32 0.03125, %v1878_v47  ;;  %v3457_v46 = vld [vmem:[%s4963_s3 + $0x20] ss:$0 sm:$0xff] }
0x1ec7   :  { %v1882_v34 = vadd.f32 1e-05, %v1880_v49 }
0x1ec9   :  { %4145 = vrsqrt.f32 %v1882_v34 }
0x1ecf   :  { %v4144_v35 = vpop.eup %4143 }
0x1ed0   :  { %v1885_v50 = vmul.f32 %v4144_v35, %v1869_v33 }
0x1ed2   :  { %v1892_v51 = vmul.f32 %v3441_v53, %v1885_v50 }
0x1ed3   :  { %v4146_v54 = vpop.eup %4145 }
0x1ed4   :  { %v1886_v52 = vmul.f32 %v4146_v54, %v1870_v37  ;;  %v4676_v56 = vadd.f32 %v3442_v55, %v1892_v51 }
0x1ed6   :  { %v1893_v48 = vmul.f32 %v3441_v53, %v1886_v52 }
0x1ed8   :  { %v4678_v57 = vadd.f32 %v3442_v55, %v1893_v48  ;;  %v3475_v55 = vld [vmem:[%s4963_s3 + $0x22] ss:$0 sm:$0xff] }
0x1eda   :  { %v1906_v58 = vpack.c.bf16 %v4678_v57, %v4676_v56 }
0x1edc   :  { %3850 = vmatmul.mubr.msk.bf16.vlgmr.msra.gmra.mrb[36].mxu1 %vm86_vm1, %v1906_v58 }
0x1edd   :  { %3855 = vmatprep.mubr.msk.bf16.mxu1 %vm4208_vm0, %v4207_v1 }
0x1faf   :  { %v1961_v60 = vpop.f32.mrb[36].mxu1 }
0x1fb0   :  { %v3851_v61 = vpop.f32.mrb[37].mxu1  ;;  %v1962_v63 = vadd.f32 %v3447_v59, %v1961_v60 }
0x1fb1   :  { %v1964_v62 = vpop.f32.mrb[38].mxu1 }
0x1fb2   :  { %v1965_v0 = vadd.f32 %v3447_v59, %v1964_v62  ;;  %v3852_v2 = vpop.f32.mrb[39].mxu1 }
0x1fb4   :  { %v1968_v5 = vpack.c.bf16 %v1965_v0, %v1962_v63 }
0x1fb6   :  { %1970 = vrot.lane.b32.xlu1 %v1968_v5, %s4209_s25 }
0x2028   :  { %v1971_v6 = vpop.permute.xlu1 %1970 }
0x2029   :  { %v1976_v7 = vsel %vm86_vm1, %v1971_v6, 0 }
0x202a   :  { %3854 = vmatpush3.bf16.xpose.msra.mxu1 %v1976_v7 }
0x202b   :  { %3865 = vmatprep.subr.bf16.mxu1 %v4207_v1 }
0x2031   :  { %3856 = vmatmul.mubr.msk.bf16.vlgmr.msra.gmra.mrb[40].mxu1 %vm86_vm1, %v1968_v5 }
0x2032   :  { %3869 = vmatprep.mubr.msk.bf16.mxu1 %vm4208_vm0, %v4207_v1  ;;  %3866 = vmatpush3.bf16.msra.mxu1 %v4055_v29 }
0x2033   :  { %3867 = vmatprep.subr.bf16.mxu1 %v4207_v1 }
0x2036   :  { %3868 = vmatpush3.bf16.msra.mxu1 %v4056_v38 }
0x2037   :  { %3881 = vmatprep.subr.bf16.mxu1 %v4207_v1 }
0x2104   :  { %v2012_v8 = vpop.f32.mrb[40].mxu1 }
0x2105   :  { %v2019_v9 = vsel %vm4275_vm2, %v2012_v8, -1e+30  ;;  %v3857_v10 = vpop.f32.mrb[41].mxu1 }
0x2106   :  { %v2015_v11 = vpop.f32.mrb[42].mxu1  ;;  %v2021_v12 = vsel %vm184_vm3, %v2019_v9, -inf }
0x2107   :  { %v2020_v13 = vsel %vm4279_vm4, %v2015_v11, -1e+30  ;;  %2022 = vmax.xlane.f32.xlu1 %v2021_v12  ;;  %v3858_v14 = vpop.f32.mrb[43].mxu1  ;;  %v4059_v11 = vld [vmem:[%s4961_s1 + $0x110] sm:$0xff]   ;;  %v4060_v12 = vld [vmem:[%s4961_s1 + $0x118] sm:$0xff]  }
0x2108   :  { %v2024_v15 = vsel %vm184_vm3, %v2020_v13, -inf }
0x2109   :  { %2025 = vmax.xlane.f32.xlu0 %v2024_v15 }
0x2194   :  { %v2023_v16 = vpop.xlane.xlu1 %2022 }
0x2195   :  { %v2027_v4 = vsub.f32 %v2019_v9, %v2023_v16 }
0x2196   :  { %v2026_v17 = vpop.xlane.xlu0 %2025 }
0x2197   :  { %v2029_v18 = vmul.f32 1.442695, %v2027_v4  ;;  %v2028_v19 = vsub.f32 %v2020_v13, %v2026_v17 }
0x2199   :  { %4147 = vpow2.f32 %v2029_v18  ;;  %v2031_v20 = vmul.f32 1.442695, %v2028_v19 }
0x219b   :  { %4149 = vpow2.f32 %v2031_v20  ;;  %v3461_v20 = vld [vmem:[%s4963_s3 + $0x26] ss:$0 sm:$0xff] }
0x21a3   :  { %v4148_v21 = vpop.eup %4147 }
0x21a4   :  { %v2033_v22 = vsel %vm184_vm3, %v4148_v21, 0.0 }
0x21a5   :  { %v4150_v27 = vpop.eup %4149  ;;  %2034 = vadd.xlane.f32.xlu0 %v2033_v22 }
0x21a6   :  { %v2036_v28 = vsel %vm184_vm3, %v4150_v27, 0.0 }
0x21a9   :  { %2037 = vadd.xlane.f32.xlu0 %v2036_v28  ;;  %v3462_v28 = vld [vmem:[%s4963_s3 + $0x27] ss:$0 sm:$0xff] }
0x21bf   :  { %2044 = vrot.lane.b32.xlu0 %v1968_v5, %s4210_s26 }
0x2232   :  { %v2035_v30 = vpop.xlane.xlu0 %2034 }
0x2233   :  { %4151 = vrcp.f32 %v2035_v30 }
0x2236   :  { %v2038_v31 = vpop.xlane.xlu0 %2037 }
0x2237   :  { %4153 = vrcp.f32 %v2038_v31 }
0x223a   :  { %v2045_v24 = vpop.permute.xlu0 %2044 }
0x223b   :  { %3860 = vmatpush3.bf16.msra.mxu0 %v2045_v24 }
0x223c   :  { %3873 = vmatprep.subr.bf16.mxu0 %v4207_v1 }
0x223d   :  { %v4152_v26 = vpop.eup %4151 }
0x223e   :  { %v2041_v33 = vmul.f32 %v4152_v26, %v4148_v21 }
0x2241   :  { %v4154_v32 = vpop.eup %4153 }
0x2242   :  { %v2042_v36 = vmul.f32 %v4154_v32, %v4150_v27  ;;  %v3467_v32 = vld [vmem:[%s4963_s3 + $0x21] ss:$0 sm:$0xff] }
0x2244   :  { %v2043_v37 = vpack.c.bf16 %v2042_v36, %v2041_v33 }
0x2246   :  { %3862 = vmatmul.mubr.msk.bf16.vlgmr.msra.gmra.mrb[56].mxu0 %vm184_vm3, %v2043_v37 }
0x2247   :  { %3877 = vmatprep.mubr.msk.bf16.mxu0 %vm4208_vm0, %v4207_v1  ;;  %3874 = vmatpush3.bf16.msra.mxu0 %v4059_v11 }
0x2248   :  { %3875 = vmatprep.subr.bf16.mxu0 %v4207_v1 }
0x224b   :  { %3876 = vmatpush3.bf16.msra.mxu0 %v4060_v12 }
0x224c   :  { %3889 = vmatprep.subr.bf16.mxu0 %v4207_v1 }
0x2319   :  { %v2084_v39 = vpop.f32.mrb[56].mxu0 }
0x231a   :  { %v3863_v40 = vpop.f32.mrb[57].mxu0 }
0x231b   :  { %v2087_v41 = vpop.f32.mrb[58].mxu0 }
0x231c   :  { %v2096_v43 = vpack.c.bf16 %v2087_v41, %v2084_v39  ;;  %v3864_v44 = vpop.f32.mrb[59].mxu0 }
0x231e   :  { %3870 = vmatmul.mubr.msk.bf16.vlgmr.msra.gmra.mrb[44].mxu1 %vm86_vm1, %v2096_v43 }
0x231f   :  { %3882 = vmatpush3.bf16.msra.mxu1 %v4057_v42  ;;  %3885 = vmatprep.mubr.msk.bf16.mxu1 %vm4208_vm0, %v4207_v1 }
0x2320   :  { %3883 = vmatprep.subr.bf16.mxu1 %v4207_v1 }
0x2323   :  { %3884 = vmatpush3.bf16.msra.mxu1 %v4058_v45 }
0x2324   :  { %3895 = vmatprep.subr.bf16.mxu1 %v4207_v1 }
0x2326   :  { %3886 = vmatmul.mubr.msk.bf16.vlgmr.msra.gmra.mrb[48].mxu1 %vm86_vm1, %v4552_v3 }
0x2327   :  { %3897 = vmatprep.mubr.msk.bf16.mxu1 %vm4208_vm0, %v4207_v1 }
0x23f1   :  { %v2151_v47 = vpop.f32.mrb[44].mxu1 }
0x23f2   :  { %v2152_v49 = vadd.f32 %v3457_v46, %v2151_v47  ;;  %v3871_v34 = vpop.f32.mrb[45].mxu1 }
0x23f3   :  { %v2154_v35 = vpop.f32.mrb[46].mxu1 }
0x23f4   :  { %v2155_v50 = vadd.f32 %v3457_v46, %v2154_v35  ;;  %v3872_v53 = vpop.f32.mrb[47].mxu1  ;;  %v2158_v54 = vadd.f32 %v2152_v49, %v4676_v56 }
0x23f6   :  { %v2160_v51 = vsel %vm86_vm1, %v2158_v54, 0.0  ;;  %v2159_v52 = vadd.f32 %v2155_v50, %v4678_v57 }
0x23f7   :  { %2161 = vadd.xlane.f32.xlu1 %v2160_v51 }
0x23f8   :  { %v2163_v3 = vsel %vm86_vm1, %v2159_v52, 0.0 }
0x23f9   :  { %2164 = vadd.xlane.f32.xlu0 %v2163_v3  ;;  %v2323_v48 = vpop.f32.mrb[48].mxu1 }
0x23fa   :  { %v3887_v58 = vpop.f32.mrb[49].mxu1  ;;  %v2324_v60 = vadd.f32 %v3475_v55, %v2323_v48  ;;  %v4061_v48 = vld [vmem:[%s4961_s1 + $0x130] sm:$0xff]  }
0x23fb   :  { %v2326_v59 = vpop.f32.mrb[50].mxu1 }
0x23fc   :  { %v2327_v61 = vadd.f32 %v3475_v55, %v2326_v59  ;;  %v3888_v62 = vpop.f32.mrb[51].mxu1 }
0x23fe   :  { %v4740_v63 = vpack.c.bf16 %v2327_v61, %v2324_v60 }
0x2400   :  { %v2336_v26 = vsel %vm86_vm1, %v4740_v63, 0 }
0x2484   :  { %v2162_v56 = vpop.xlane.xlu1 %2161 }
0x2485   :  { %v2166_v0 = vmul.f32 0.03125, %v2162_v56 }
0x2486   :  { %v2165_v2 = vpop.xlane.xlu0 %2164 }
0x2487   :  { %v2168_v57 = vsub.f32 %v2158_v54, %v2166_v0  ;;  %v2167_v5 = vmul.f32 0.03125, %v2165_v2  ;;  %v4062_v2 = vld [vmem:[%s4961_s1 + $0x138] sm:$0xff]  }
0x2489   :  { %v2169_v6 = vsub.f32 %v2159_v52, %v2167_v5  ;;  %v2170_v7 = vmul.f32 %v2168_v57, %v2168_v57 }
0x248b   :  { %v2172_v8 = vsel %vm86_vm1, %v2170_v7, 0.0  ;;  %v2171_v9 = vmul.f32 %v2169_v6, %v2169_v6 }
0x248c   :  { %2173 = vadd.xlane.f32.xlu1 %v2172_v8 }
0x248d   :  { %v2175_v10 = vsel %vm86_vm1, %v2171_v9, 0.0  ;;  %v3485_v9 = vld [vmem:[%s4963_s3 + $0x23] ss:$0 sm:$0xff] }
0x2490   :  { %2176 = vadd.xlane.f32.xlu1 %v2175_v10 }
0x2519   :  { %v2174_v13 = vpop.xlane.xlu1 %2173 }
0x251a   :  { %v2178_v14 = vmul.f32 0.03125, %v2174_v13 }
0x251c   :  { %v2180_v15 = vadd.f32 1e-05, %v2178_v14 }
0x251d   :  { %v2177_v16 = vpop.xlane.xlu1 %2176 }
0x251e   :  { %4155 = vrsqrt.f32 %v2180_v15  ;;  %v2179_v4 = vmul.f32 0.03125, %v2177_v16 }
0x2520   :  { %v2181_v17 = vadd.f32 1e-05, %v2179_v4 }
0x2522   :  { %4157 = vrsqrt.f32 %v2181_v17 }
0x2528   :  { %v4156_v18 = vpop.eup %4155 }
0x2529   :  { %v2184_v19 = vmul.f32 %v4156_v18, %v2168_v57 }
0x252b   :  { %v2191_v22 = vmul.f32 %v3461_v20, %v2184_v19 }
0x252c   :  { %v4158_v21 = vpop.eup %4157 }
0x252d   :  { %v2185_v27 = vmul.f32 %v4158_v21, %v2169_v6  ;;  %v4758_v30 = vadd.f32 %v3462_v28, %v2191_v22 }
0x252f   :  { %v2192_v29 = vmul.f32 %v3461_v20, %v2185_v27 }
0x2531   :  { %v4760_v31 = vadd.f32 %v3462_v28, %v2192_v29 }
0x2533   :  { %v2205_v24 = vpack.c.bf16 %v4760_v31, %v4758_v30 }
0x2535   :  { %3878 = vmatmul.mubr.msk.bf16.vlgmr.msra.gmra.mrb[60].mxu0 %vm86_vm1, %v2205_v24 }
0x2536   :  { %3890 = vmatpush3.bf16.xpose.msra.mxu0 %v2336_v26  ;;  %3891 = vmatprep.mubr.msk.bf16.mxu0 %vm4208_vm0, %v4207_v1 }
0x2537   :  { %3901 = vmatprep.subr.bf16.mxu0 %v4207_v1 }
0x2608   :  { %v2260_v33 = vpop.f32.mrb[60].mxu0 }
0x2609   :  { %v3879_v36 = vpop.f32.mrb[61].mxu0  ;;  %v2261_v38 = vadd.f32 %v3467_v32, %v2260_v33  ;;  %v4065_v33 = vld [vmem:[%s4961_s1 + $0x150] sm:$0xff]  }
0x260a   :  { %v2263_v37 = vpop.f32.mrb[62].mxu0 }
0x260b   :  { %v2264_v39 = vadd.f32 %v3467_v32, %v2263_v37  ;;  %v3880_v40 = vpop.f32.mrb[63].mxu0  ;;  %v4064_v32 = vld [vmem:[%s4961_s1 + $0x148] sm:$0xff]  }
0x260d   :  { %v2330_v41 = vpack.c.bf16 %v2264_v39, %v2261_v38 }
0x260f   :  { %3892 = vmatmul.mubr.msk.bf16.vlgmr.msra.gmra.mrb[64].mxu0 %vm86_vm1, %v2330_v41 }
0x2610   :  { %3905 = vmatprep.mubr.msk.bf16.mxu0 %vm4208_vm0, %v4207_v1  ;;  %3902 = vmatpush3.bf16.msra.mxu0 %v4061_v48 }
0x2611   :  { %3903 = vmatprep.subr.bf16.mxu0 %v4207_v1 }
0x2614   :  { %3904 = vmatpush3.bf16.msra.mxu0 %v4062_v2 }
0x2615   :  { %3917 = vmatprep.subr.bf16.mxu0 %v4207_v1 }
0x26e2   :  { %v2372_v42 = vpop.f32.mrb[64].mxu0 }
0x26e3   :  { %v2379_v43 = vsel %vm4275_vm2, %v2372_v42, -1e+30  ;;  %v3893_v44 = vpop.f32.mrb[65].mxu0 }
0x26e4   :  { %v2375_v45 = vpop.f32.mrb[66].mxu0  ;;  %v2381_v46 = vsel %vm184_vm3, %v2379_v43, -inf  ;;  %v3489_v44 = vld [vmem:[%s4963_s3 + $0x28] ss:$0 sm:$0xff] }
0x26e5   :  { %v2380_v47 = vsel %vm4279_vm4, %v2375_v45, -1e+30  ;;  %2382 = vmax.xlane.f32.xlu1 %v2381_v46  ;;  %v3894_v49 = vpop.f32.mrb[67].mxu0 }
0x26e6   :  { %v2384_v34 = vsel %vm184_vm3, %v2380_v47, -inf  ;;  %v3490_v49 = vld [vmem:[%s4963_s3 + $0x29] ss:$0 sm:$0xff] }
0x26e9   :  { %2385 = vmax.xlane.f32.xlu1 %v2384_v34 }
0x2772   :  { %v2383_v35 = vpop.xlane.xlu1 %2382 }
0x2773   :  { %v2387_v50 = vsub.f32 %v2379_v43, %v2383_v35 }
0x2775   :  { %v2389_v53 = vmul.f32 1.442695, %v2387_v50 }
0x2776   :  { %v2386_v54 = vpop.xlane.xlu1 %2385 }
0x2777   :  { %4159 = vpow2.f32 %v2389_v53  ;;  %v2388_v51 = vsub.f32 %v2380_v47, %v2386_v54  ;;  %v4066_v54 = vld [vmem:[%s4961_s1 + $0x158] sm:$0xff]  }
0x2779   :  { %v2391_v23 = vmul.f32 1.442695, %v2388_v51  ;;  %v3495_v51 = vld [vmem:[%s4963_s3 + $0x24] ss:$0 sm:$0xff] }
0x277b   :  { %4161 = vpow2.f32 %v2391_v23 }
0x2781   :  { %v4160_v52 = vpop.eup %4159 }
0x2782   :  { %v2393_v3 = vsel %vm184_vm3, %v4160_v52, 0.0 }
0x2783   :  { %2394 = vadd.xlane.f32.xlu1 %v2393_v3 }
0x2785   :  { %v4162_v55 = vpop.eup %4161 }
0x2786   :  { %v2396_v25 = vsel %vm184_vm3, %v4162_v55, 0.0 }
0x2787   :  { %2397 = vadd.xlane.f32.xlu1 %v2396_v25 }
0x2798   :  { %2405 = vrot.lane.b32.xlu1 %v4740_v63, %s4209_s25 }
0x2810   :  { %v2395_v58 = vpop.xlane.xlu1 %2394 }
0x2811   :  { %4163 = vrcp.f32 %v2395_v58 }
0x2814   :  { %v2398_v59 = vpop.xlane.xlu1 %2397 }
0x2815   :  { %4165 = vrcp.f32 %v2398_v59 }
0x2818   :  { %v2406_v60 = vpop.permute.xlu1 %2405 }
0x2819   :  { %3896 = vmatpush3.bf16.msra.mxu1 %v2406_v60 }
0x281a   :  { %3909 = vmatprep.subr.bf16.mxu1 %v4207_v1 }
0x281b   :  { %v4164_v61 = vpop.eup %4163 }
0x281c   :  { %v2401_v56 = vmul.f32 %v4164_v61, %v4160_v52 }
0x281f   :  { %v4166_v62 = vpop.eup %4165 }
0x2820   :  { %v2402_v0 = vmul.f32 %v4166_v62, %v4162_v55  ;;  %v3505_v62 = vld [vmem:[%s4963_s3 + $0x25] ss:$0 sm:$0xff] }
0x2822   :  { %v2403_v63 = vpack.c.bf16 %v2402_v0, %v2401_v56 }
0x2824   :  { %3898 = vmatmul.mubr.msk.bf16.vlgmr.msra.gmra.mrb[52].mxu1 %vm184_vm3, %v2403_v63 }
0x2825   :  { %3913 = vmatprep.mubr.msk.bf16.mxu1 %vm4208_vm0, %v4207_v1 }
0x28f7   :  { %v2445_v57 = vpop.f32.mrb[52].mxu1 }
0x28f8   :  { %v3899_v5 = vpop.f32.mrb[53].mxu1 }
0x28f9   :  { %v2448_v6 = vpop.f32.mrb[54].mxu1 }
0x28fa   :  { %v2457_v7 = vpack.c.bf16 %v2448_v6, %v2445_v57  ;;  %v3900_v8 = vpop.f32.mrb[55].mxu1 }
0x28fc   :  { %3906 = vmatmul.mubr.msk.bf16.vlgmr.msra.gmra.mrb[68].mxu0 %vm86_vm1, %v2457_v7 }
0x28fd   :  { %3921 = vmatprep.mubr.msk.bf16.mxu0 %vm4208_vm0, %v4207_v1  ;;  %3918 = vmatpush3.bf16.xpose.msra.mxu0 %v4065_v33 }
0x28fe   :  { %3919 = vmatprep.subr.bf16.mxu0 %v4207_v1 }
0x2905   :  { %3920 = vmatpush3.bf16.xpose.msra.mxu0 %v4066_v54 }
0x29cf   :  { %v2512_v10 = vpop.f32.mrb[68].mxu0 }
0x29d0   :  { %v2513_v11 = vadd.f32 %v3485_v9, %v2512_v10  ;;  %v3907_v12 = vpop.f32.mrb[69].mxu0 }
0x29d1   :  { %v2515_v13 = vpop.f32.mrb[70].mxu0 }
0x29d2   :  { %v2516_v14 = vadd.f32 %v3485_v9, %v2515_v13  ;;  %v3908_v15 = vpop.f32.mrb[71].mxu0  ;;  %v2519_v16 = vadd.f32 %v2513_v11, %v4758_v30 }
0x29d4   :  { %v2521_v4 = vsel %vm86_vm1, %v2519_v16, 0.0  ;;  %v2520_v17 = vadd.f32 %v2516_v14, %v4760_v31  ;;  %v4063_v31 = vld [vmem:[%s4961_s1 + $0x140] sm:$0xff]  }
0x29d5   :  { %2522 = vadd.xlane.f32.xlu0 %v2521_v4  ;;  %3910 = vmatpush3.bf16.msra.mxu1 %v4063_v31 }
0x29d6   :  { %v2524_v18 = vsel %vm86_vm1, %v2520_v17, 0.0  ;;  %3911 = vmatprep.subr.bf16.mxu1 %v4207_v1 }
0x29d9   :  { %2525 = vadd.xlane.f32.xlu0 %v2524_v18  ;;  %3912 = vmatpush3.bf16.msra.mxu1 %v4064_v32 }
0x29da   :  { %3925 = vmatprep.subr.bf16.mxu1 %v4207_v1 }
0x2a62   :  { %v2523_v19 = vpop.xlane.xlu0 %2522 }
0x2a63   :  { %v2527_v20 = vmul.f32 0.03125, %v2523_v19 }
0x2a65   :  { %v2529_v21 = vsub.f32 %v2519_v16, %v2527_v20 }
0x2a66   :  { %v2526_v22 = vpop.xlane.xlu0 %2525 }
0x2a67   :  { %v2528_v27 = vmul.f32 0.03125, %v2526_v22  ;;  %v2531_v28 = vmul.f32 %v2529_v21, %v2529_v21 }
0x2a69   :  { %v2530_v29 = vsub.f32 %v2520_v17, %v2528_v27  ;;  %v2533_v24 = vsel %vm86_vm1, %v2531_v28, 0.0 }
0x2a6a   :  { %2534 = vadd.xlane.f32.xlu0 %v2533_v24 }
0x2a6b   :  { %v2532_v26 = vmul.f32 %v2530_v29, %v2530_v29 }
0x2a6d   :  { %v2536_v30 = vsel %vm86_vm1, %v2532_v26, 0.0  ;;  %v3507_v26 = vld [vmem:[%s4963_s3 + $0x2b] ss:$0 sm:$0xff] }
0x2a6e   :  { %2537 = vadd.xlane.f32.xlu1 %v2536_v30 }
0x2af7   :  { %v2535_v36 = vpop.xlane.xlu0 %2534 }
0x2af8   :  { %v2539_v37 = vmul.f32 0.03125, %v2535_v36 }
0x2afa   :  { %v2541_v38 = vadd.f32 1e-05, %v2539_v37 }
0x2afb   :  { %v2538_v39 = vpop.xlane.xlu1 %2537 }
0x2afc   :  { %4167 = vrsqrt.f32 %v2541_v38  ;;  %v2540_v40 = vmul.f32 0.03125, %v2538_v39 }
0x2afe   :  { %v2542_v41 = vadd.f32 1e-05, %v2540_v40 }
0x2b00   :  { %4169 = vrsqrt.f32 %v2542_v41 }
0x2b06   :  { %v4168_v42 = vpop.eup %4167 }
0x2b07   :  { %v2545_v43 = vmul.f32 %v4168_v42, %v2529_v21 }
0x2b09   :  { %v2552_v46 = vmul.f32 %v3489_v44, %v2545_v43 }
0x2b0a   :  { %v4170_v45 = vpop.eup %4169 }
0x2b0b   :  { %v2546_v47 = vmul.f32 %v4170_v45, %v2530_v29  ;;  %v2559_v35 = vadd.f32 %v3490_v49, %v2552_v46  ;;  %v3506_v29 = vld [vmem:[%s4963_s3 + $0x2a] ss:$0 sm:$0xff] }
0x2b0d   :  { %v2553_v34 = vmul.f32 %v3489_v44, %v2546_v47 }
0x2b0f   :  { %v2560_v50 = vadd.f32 %v3490_v49, %v2553_v34 }
0x2b11   :  { %v2566_v53 = vpack.c.bf16 %v2560_v50, %v2559_v35 }
0x2b13   :  { %3914 = vmatmul.mubr.msk.bf16.vlgmr.msra.gmra.mrb[56].mxu1 %vm86_vm1, %v2566_v53 }
0x2b14   :  { %3929 = vmatprep.mubr.msk.bf16.mxu1 %vm4208_vm0, %v4207_v1 }
0x2be6   :  { %v2621_v23 = vpop.f32.mrb[56].mxu1 }
0x2be7   :  { %v2622_v52 = vadd.f32 %v3495_v51, %v2621_v23  ;;  %v3915_v3 = vpop.f32.mrb[57].mxu1 }
0x2be8   :  { %v2624_v55 = vpop.f32.mrb[58].mxu1 }
0x2be9   :  { %v2625_v25 = vadd.f32 %v3495_v51, %v2624_v55  ;;  %v3916_v48 = vpop.f32.mrb[59].mxu1  ;;  %v2628_v58 = vmax.f32 %v2622_v52, 0.0  ;;  %v3508_v52 = vld [vmem:[%s4963_s3 + $0x2c] ss:$0 sm:$0xff]  ;;  %v3509_v55 = vld [vmem:[%s4963_s3 + $0x2d] ss:$0 sm:$0xff] }
0x2beb   :  { %v2629_v59 = vmax.f32 %v2625_v25, 0.0 }
0x2bed   :  { %v2635_v60 = vpack.c.bf16 %v2629_v59, %v2628_v58  ;;  %v4069_v58 = vld [vmem:[%s4962_s2 + $0x10] sm:$0xff]  }
0x2bef   :  { %3922 = vmatmul.mubr.bf16.vlgmr.msra.gmra.mrb[72].mxu0 %v2635_v60  ;;  %v4070_v60 = vld [vmem:[%s4962_s2 + $0x18] sm:$0xff]  }
0x2cc2   :  { %v2682_v61 = vpop.f32.mrb[72].mxu0 }
0x2cc3   :  { %v2689_v56 = vadd.f32 %v2682_v61, %v2559_v35  ;;  %v3923_v0 = vpop.f32.mrb[73].mxu0  ;;  %v4067_v35 = vld [vmem:[%s4962_s2] sm:$0xff]  }
0x2cc4   :  { %v2685_v63 = vpop.f32.mrb[74].mxu0  ;;  %3926 = vmatpush3.bf16.msra.mxu1 %v4067_v35  ;;  %v4071_v61 = vld [vmem:[%s4962_s2 + $0x20] sm:$0xff]  }
0x2cc5   :  { %v2690_v2 = vadd.f32 %v2685_v63, %v2560_v50  ;;  %v3924_v57 = vpop.f32.mrb[75].mxu0  ;;  %v2696_v5 = vadd.f32 %v3505_v62, %v2689_v56  ;;  %3927 = vmatprep.subr.bf16.mxu1 %v4207_v1  ;;  %v4068_v50 = vld [vmem:[%s4962_s2 + $0x8] sm:$0xff]  }
0x2cc6   :  { %v4072_v63 = vld [vmem:[%s4962_s2 + $0x28] sm:$0xff]   ;;  %v4073_v57 = vld [vmem:[%s4962_s2 + $0x30] sm:$0xff]  }
0x2cc7   :  { %v2698_v6 = vsel %vm86_vm1, %v2696_v5, 0.0  ;;  %v2697_v7 = vadd.f32 %v3505_v62, %v2690_v2 }
0x2cc8   :  { %2699 = vadd.xlane.f32.xlu0 %v2698_v6  ;;  %3928 = vmatpush3.bf16.msra.mxu1 %v4068_v50  ;;  %v4074_v6 = vld [vmem:[%s4962_s2 + $0x38] sm:$0xff]  }
0x2cc9   :  { %v2701_v8 = vsel %vm86_vm1, %v2697_v7, 0.0  ;;  %3933 = vmatprep.subr.bf16.mxu1 %v4207_v1 }
0x2ccc   :  { %2702 = vadd.xlane.f32.xlu0 %v2701_v8  ;;  %v4075_v8 = vld [vmem:[%s4962_s2 + $0x40] sm:$0xff]  }
0x2d55   :  { %v2700_v9 = vpop.xlane.xlu0 %2699 }
0x2d56   :  { %v2704_v10 = vmul.f32 0.03125, %v2700_v9 }
0x2d58   :  { %v2706_v11 = vsub.f32 %v2696_v5, %v2704_v10 }
0x2d59   :  { %v2703_v12 = vpop.xlane.xlu0 %2702 }
0x2d5a   :  { %v2705_v13 = vmul.f32 0.03125, %v2703_v12  ;;  %v2708_v14 = vmul.f32 %v2706_v11, %v2706_v11 }
0x2d5c   :  { %v2707_v15 = vsub.f32 %v2697_v7, %v2705_v13  ;;  %v2710_v16 = vsel %vm86_vm1, %v2708_v14, 0.0  ;;  %v4077_v14 = vld [vmem:[%s4962_s2 + $0x50] sm:$0xff]  }
0x2d5d   :  { %2711 = vadd.xlane.f32.xlu0 %v2710_v16  ;;  %v4078_v16 = vld [vmem:[%s4962_s2 + $0x58] sm:$0xff]  }
0x2d5e   :  { %v2709_v4 = vmul.f32 %v2707_v15, %v2707_v15 }
0x2d60   :  { %v2713_v17 = vsel %vm86_vm1, %v2709_v4, 0.0  ;;  %v4079_v4 = vld [vmem:[%s4962_s2 + $0x60] sm:$0xff]  }
0x2d61   :  { %2714 = vadd.xlane.f32.xlu0 %v2713_v17 }
0x2dea   :  { %v2712_v18 = vpop.xlane.xlu0 %2711 }
0x2deb   :  { %v2716_v19 = vmul.f32 0.03125, %v2712_v18  ;;  %v4080_v18 = vld [vmem:[%s4962_s2 + $0x68] sm:$0xff]  }
0x2ded   :  { %v2718_v20 = vadd.f32 1e-05, %v2716_v19  ;;  %v4081_v19 = vld [vmem:[%s4962_s2 + $0x70] sm:$0xff]  }
0x2dee   :  { %v2715_v21 = vpop.xlane.xlu0 %2714 }
0x2def   :  { %4171 = vrsqrt.f32 %v2718_v20  ;;  %v2717_v22 = vmul.f32 0.03125, %v2715_v21  ;;  %v4082_v21 = vld [vmem:[%s4962_s2 + $0x78] sm:$0xff]  }
0x2df1   :  { %v2719_v27 = vadd.f32 1e-05, %v2717_v22 }
0x2df3   :  { %4173 = vrsqrt.f32 %v2719_v27  ;;  %v3510_v27 = vld [vmem:[%s4963_s3 + $0x2e] ss:$0 sm:$0xff] }
0x2df9   :  { %v4172_v28 = vpop.eup %4171 }
0x2dfa   :  { %v2722_v24 = vmul.f32 %v4172_v28, %v2706_v11  ;;  %v4076_v11 = vld [vmem:[%s4962_s2 + $0x48] sm:$0xff]   ;;  %s4211_s2 = smov [#allocation2]  }
0x2dfb   :  { %s3298_s6 = sshll.u32 %s4211_s2, 4  ;;  %s3299_s6 = int_to_ptr.vmem [resolvable:$true] %s3298_s6 }
0x2dfc   :  { %v2729_v30 = vmul.f32 %v3506_v29, %v2722_v24  ;;  %s4183_s3 = scalar_lea.vmem %s3299_s6, 32  ;;  %p4188_p1 = scmp.lt.s32.totalorder %s3299_s6, %s3299_s6 }
0x2dfd   :  { %v4174_v31 = vpop.eup %4173  ;;  %p4184_p0 = scmp.ne.s32.totalorder %s3299_s6, %s4183_s3  ;;  %p4189_p2 = scmp.lt.s32.totalorder %s4183_s3, %s4183_s3 }
0x2dfe   :  { %v2736_v32 = vadd.f32 %v3507_v26, %v2729_v30  ;;  %v2723_v33 = vmul.f32 %v4174_v31, %v2707_v15 }
0x2dff   :  { %p4190_p3 = por %p4189_p2, %p4188_p1 }
0x2e00   :  { %v2738_v36 = vsel %vm86_vm1, %v2736_v32, 0.0  ;;  %v2730_v37 = vmul.f32 %v3506_v29, %v2723_v33 }
0x2e01   :  { %2739 = vadd.xlane.f32.xlu0 %v2738_v36  ;;  %p4191_p4 = pnand %p4190_p3, %p4184_p0 }
0x2e02   :  { %v2737_v38 = vadd.f32 %v3507_v26, %v2730_v37 }
0x2e04   :  { %v2741_v39 = vsel %vm86_vm1, %v2737_v38, 0.0 }
0x2e05   :  { %2742 = vadd.xlane.f32.xlu0 %v2741_v39 }
0x2e8e   :  { %v2740_v40 = vpop.xlane.xlu0 %2739 }
0x2e8f   :  { %v2744_v41 = vmul.f32 0.03125, %v2740_v40 }
0x2e91   :  { %v2746_v42 = vsub.f32 %v2736_v32, %v2744_v41 }
0x2e92   :  { %v2743_v43 = vpop.xlane.xlu0 %2742 }
0x2e93   :  { %v2745_v44 = vmul.f32 0.03125, %v2743_v43  ;;  %v2748_v45 = vmul.f32 %v2746_v42, %v2746_v42 }
0x2e95   :  { %v2747_v46 = vsub.f32 %v2737_v38, %v2745_v44  ;;  %v2750_v47 = vsel %vm86_vm1, %v2748_v45, 0.0 }
0x2e96   :  { %2751 = vadd.xlane.f32.xlu0 %v2750_v47 }
0x2e97   :  { %v2749_v49 = vmul.f32 %v2747_v46, %v2747_v46 }
0x2e99   :  { %v2753_v34 = vsel %vm86_vm1, %v2749_v49, 0.0 }
0x2e9a   :  { %2754 = vadd.xlane.f32.xlu0 %v2753_v34 }
0x2f23   :  { %v2752_v53 = vpop.xlane.xlu0 %2751 }
0x2f24   :  { %v2756_v54 = vmul.f32 0.03125, %v2752_v53 }
0x2f26   :  { %v2758_v51 = vadd.f32 1e-05, %v2756_v54 }
0x2f27   :  { %v2755_v62 = vpop.xlane.xlu0 %2754 }
0x2f28   :  { %4175 = vrsqrt.f32 %v2758_v51  ;;  %v2757_v0 = vmul.f32 0.03125, %v2755_v62 }
0x2f2a   :  { %v2759_v2 = vadd.f32 1e-05, %v2757_v0 }
0x2f2c   :  { %4177 = vrsqrt.f32 %v2759_v2 }
0x2f32   :  { %v4176_v23 = vpop.eup %4175 }
0x2f33   :  { %v2762_v3 = vmul.f32 %v4176_v23, %v2746_v42 }
0x2f35   :  { %v2769_v25 = vmul.f32 %v3508_v52, %v2762_v3 }
0x2f36   :  { %v4178_v7 = vpop.eup %4177 }
0x2f37   :  { %v2776_v48 = vadd.f32 %v3509_v55, %v2769_v25  ;;  %v2763_v9 = vmul.f32 %v4178_v7, %v2747_v46 }
0x2f39   :  { %v2782_v59 = vpack.c.bf16 %v2776_v48, %v2776_v48  ;;  %v2770_v12 = vmul.f32 %v3508_v52, %v2763_v9 }
0x2f3b   :  { %3930 = vmatmul.mubr.msk.bf16.vlgmr.msra.gmra.mrb[60].mxu1 %vm86_vm1, %v2782_v59  ;;  %v2849_v56 = vrot.slane %v2782_v59, 1  ;;  %v2911_v5 = vrot.slane %v2782_v59, 2  ;;  %v2973_v10 = vrot.slane %v2782_v59, 3  ;;  %v2777_v13 = vadd.f32 %v3509_v55, %v2770_v12 }
0x2f3c   :  { %3934 = vmatpush3.bf16.msra.mxu1 %v4069_v58  ;;  %3937 = vmatprep.mubr.msk.bf16.mxu1 %vm4208_vm0, %v4207_v1 }
0x2f3d   :  { %3935 = vmatprep.subr.bf16.mxu1 %v4207_v1  ;;  %v3035_v15 = vpack.c.bf16 %v2777_v13, %v2777_v13 }
0x2f3f   :  { %v3098_v17 = vrot.slane %v3035_v15, 1  ;;  %v3160_v20 = vrot.slane %v3035_v15, 2  ;;  %v3222_v22 = vrot.slane %v3035_v15, 3 }
0x2f40   :  { %3936 = vmatpush3.bf16.msra.mxu1 %v4070_v60 }
0x2f41   :  { %3941 = vmatprep.subr.bf16.mxu1 %v4207_v1 }
0x2f47   :  { %3938 = vmatmul.mubr.msk.bf16.vlgmr.msra.gmra.mrb[60].mxu1 %vm86_vm1, %v2849_v56 }
0x2f48   :  { %3942 = vmatpush3.bf16.msra.mxu1 %v4071_v61  ;;  %3945 = vmatprep.mubr.msk.bf16.mxu1 %vm4208_vm0, %v4207_v1 }
0x2f49   :  { %3943 = vmatprep.subr.bf16.mxu1 %v4207_v1 }
0x2f4c   :  { %3944 = vmatpush3.bf16.msra.mxu1 %v4072_v63 }
0x2f4d   :  { %3949 = vmatprep.subr.bf16.mxu1 %v4207_v1 }
0x2f53   :  { %3946 = vmatmul.mubr.msk.bf16.vlgmr.msra.gmra.mrb[60].mxu1 %vm86_vm1, %v2911_v5 }
0x2f54   :  { %3950 = vmatpush3.bf16.msra.mxu1 %v4073_v57  ;;  %3953 = vmatprep.mubr.msk.bf16.mxu1 %vm4208_vm0, %v4207_v1 }
0x2f55   :  { %3951 = vmatprep.subr.bf16.mxu1 %v4207_v1 }
0x2f58   :  { %3952 = vmatpush3.bf16.msra.mxu1 %v4074_v6 }
0x2f59   :  { %3957 = vmatprep.subr.bf16.mxu1 %v4207_v1 }
0x2f5f   :  { %3954 = vmatmul.mubr.msk.bf16.vlgmr.msra.gmra.mrb[60].mxu1 %vm86_vm1, %v2973_v10 }
0x2f60   :  { %3958 = vmatpush3.bf16.msra.mxu1 %v4075_v8  ;;  %3961 = vmatprep.mubr.msk.bf16.mxu1 %vm4208_vm0, %v4207_v1 }
0x2f61   :  { %3959 = vmatprep.subr.bf16.mxu1 %v4207_v1 }
0x2f64   :  { %3960 = vmatpush3.bf16.msra.mxu1 %v4076_v11 }
0x2f65   :  { %3965 = vmatprep.subr.bf16.mxu1 %v4207_v1 }
0x2f6b   :  { %3962 = vmatmul.mubr.msk.bf16.vlgmr.msra.gmra.mrb[60].mxu1 %vm86_vm1, %v3035_v15 }
0x2f6c   :  { %3966 = vmatpush3.bf16.msra.mxu1 %v4077_v14  ;;  %3969 = vmatprep.mubr.msk.bf16.mxu1 %vm4208_vm0, %v4207_v1 }
0x2f6d   :  { %3967 = vmatprep.subr.bf16.mxu1 %v4207_v1 }
0x2f70   :  { %3968 = vmatpush3.bf16.msra.mxu1 %v4078_v16 }
0x2f71   :  { %3973 = vmatprep.subr.bf16.mxu1 %v4207_v1 }
0x2f77   :  { %3970 = vmatmul.mubr.msk.bf16.vlgmr.msra.gmra.mrb[60].mxu1 %vm86_vm1, %v3098_v17 }
0x2f78   :  { %3974 = vmatpush3.bf16.msra.mxu1 %v4079_v4  ;;  %3977 = vmatprep.mubr.msk.bf16.mxu1 %vm4208_vm0, %v4207_v1 }
0x2f79   :  { %3975 = vmatprep.subr.bf16.mxu1 %v4207_v1 }
0x2f7c   :  { %3976 = vmatpush3.bf16.msra.mxu1 %v4080_v18 }
0x2f7d   :  { %3981 = vmatprep.subr.bf16.mxu1 %v4207_v1 }
0x2f83   :  { %3978 = vmatmul.mubr.msk.bf16.vlgmr.msra.gmra.mrb[60].mxu1 %vm86_vm1, %v3160_v20 }
0x2f84   :  { %3982 = vmatpush3.bf16.msra.mxu1 %v4081_v19  ;;  %3985 = vmatprep.mubr.msk.bf16.mxu1 %vm4208_vm0, %v4207_v1 }
0x2f85   :  { %3983 = vmatprep.subr.bf16.mxu1 %v4207_v1 }
0x2f88   :  { %3984 = vmatpush3.bf16.msra.mxu1 %v4082_v21 }
0x2f8f   :  { %3986 = vmatmul.mubr.msk.bf16.vlgmr.msra.gmra.mrb[60].mxu1 %vm86_vm1, %v3222_v22 }
0x3062   :  { %v3272_v28 = vpop.f32.mrb[60].mxu1 }
0x3063   :  { %v3989_v29 = vadd.f32 %v3510_v27, %v3272_v28  ;;  %v3987_v24 = vpop.f32.mrb[61].mxu1 }
0x3064   :  { %v3275_v26 = vpop.f32.mrb[62].mxu1 }
0x3065   :  { %v3988_v30 = vpop.f32.mrb[63].mxu1  ;;  %v3280_v31 = vsel %vm3279_vm5, %v3989_v29, -inf }
0x3066   :  { %3281 = vmax.xlane.f32.xlu0 %v3280_v31 }
0x30f3   :  { %v3282_v32 = vpop.xlane.xlu0 %3281 }
0x30f4   :  { %v3283_v33 = vsub.f32 %v3989_v29, %v3282_v32 }
0x30f6   :  { %v3284_v36 = vmul.f32 1.442695, %v3283_v33 }
0x30f8   :  { %4179 = vpow2.f32 %v3284_v36 }
0x3102   :  { %v4180_v1 = vpop.eup %4179 }
0x3103   :  { %v3286_v37 = vsel %vm3279_vm5, %v4180_v1, 0.0 }
0x3104   :  { %3287 = vadd.xlane.f32.xlu1 %v3286_v37 }
0x3191   :  { %v3288_v38 = vpop.xlane.xlu1 %3287 }
0x3192   :  { %4181 = vrcp.f32 %v3288_v38 }
0x319c   :  { %v4182_v39 = vpop.eup %4181 }
0x319d   :  { %v3290_v40 = vmul.f32 %v4182_v39, %v4180_v1 }
0x319f   :  { %3291 = vst [vmem:[#allocation2] sm:$0x3] %v3290_v40 }
0x31a0   :  { %4194 = shalt.err (!%p4191_p4)
}
0x31a1   :  { %s4195_s9 = scalar_lea.hbm %s4964_s4, 32 }
0x31a2   :  { %p4196_p5 = scmp.ne.s32.totalorder %s4964_s4, %s4195_s9  ;;  %p4199_p6 = scmp.lt.u32.totalorder %s4195_s9, %s4964_s4 }
0x31a4   :  { %p4201_p7 = pnand %p4199_p6, %p4196_p5 }
0x31a6   :  { %4204 = shalt.err (!%p4201_p7)
}
0x31a7   :  { %3301 = dma.vmem_to_hbm [thread:$0]  %s3299_s6, 32, %s4964_s4, [#allocation3]  }
0x31a8   :  { %4205 = dma.done.wait [#allocation3], 32  }
0x31a9   :  { %4206 = vsyncadd [#allocation3], 4294967264 }
0x31aa   :  { %3305 = vsyncpa [#allocation3], 1 }

</bundles_post_ra>
